<compile_context>
chip_gen: v7x
topology: tpu7x:2x2x1
jax: 0.10.0
libtpu: 0.0.40
codegen_flags: <defaults>
</compile_context>

<pallas_src>
import functools

import jax
import jax.numpy as jnp
from jax.experimental import pallas as pl
from jax.experimental.pallas import tpu as pltpu

LRELU_SLOPE = 0.2
IN_EPS = 1e-5
KSIZE = 4        # every conv is 4x4, pad=1
LEFT_PAD = 8     # left zero-halo width; keeps interior stores sublane-aligned (offset 8)


def _round_up(x, m):
    return ((x + m - 1) // m) * m


def _phys_vmem_bytes(shape, dtype):
    """Physical VMEM footprint including (sublane, lane) tile padding.  With small
    channel counts on the lane axis this is up to 128/C x the logical size."""
    shape = tuple(shape)
    if len(shape) == 1:
        shape = (1,) + shape
    *lead, sl, ln = shape
    if dtype == jnp.bfloat16:
        sub, item = 16, 2
    else:
        sub, item = 8, 4
    n = 1
    for d in lead:
        n *= d
    return n * _round_up(sl, sub) * _round_up(max(ln, 1), 128) * item


def _batch_dimension_semantics():
    """CORE_PARALLEL on the batch axis when the chip has >1 TensorCore (v7x/megacore):
    plain 'parallel' alone does not split the grid across cores.  Falls back to
    'parallel' when the core count cannot be determined."""
    cores = 1
    try:
        info = pltpu.get_tpu_info()
        for name in ("num_cores", "core_count", "num_tensorcores", "tensorcore_count"):
            val = getattr(info, name, None)
            if isinstance(val, int) and val > 0:
                cores = val
                break
    except Exception:  # unknown runtime / interpret mode
        cores = 1
    return (pltpu.CORE_PARALLEL,) if cores > 1 else ("parallel",)


# ---------------------------------------------------------------------------
# In-kernel building blocks
# ---------------------------------------------------------------------------
def _conv4x4(src_ref, w_ref, b_ref, lc):
    """4x4 conv over the zero-ring-padded feature buffer as ONE MXU matmul.

    src_ref : (h_in+2, W_store, Cin) VMEM ref; padded map column 0 lives at buffer
              column LEFT_PAD-1, data at [1:1+h_in, LEFT_PAD:LEFT_PAD+w_in, :].
    w_ref   : (16*Cin, Cmm) bf16, K flattened row-major as (kh, kw, cin)
    b_ref   : (1, Cmm) f32
    returns : (ho, wo, Cout) f32 with bias added (lane/sublane slack stripped)
    """
    s, ho, wo, wp, cout = lc["s"], lc["ho"], lc["wo"], lc["wp"], lc["cout"]
    cin = src_ref.shape[-1]
    cmm = w_ref.shape[-1]
    kc = KSIZE * cin

    # Column taps j = 0..3 (shared by all kernel rows).  Cast to bf16 immediately so all
    # the packing below moves half the bytes (the concat is the dominant non-MXU work).
    colparts = []
    for j in range(KSIZE):
        c0 = LEFT_PAD - 1 + j
        if s == 2:
            part = src_ref[:, pl.ds(c0, wp, 2), :]
        else:
            part = src_ref[:, c0:c0 + wp, :]
        colparts.append(part.astype(jnp.bfloat16))
    cols = jnp.concatenate(colparts, axis=-1)                # (h_in+2, wp, 4*cin) bf16

    # Row taps i = 0..3.  For stride 2 deinterleave even/odd rows ONCE; each row tap is
    # then a plain contiguous slice (no per-tap reshape/select copy, no discarded rows
    # flowing through the concat).
    if s == 2:
        de = cols[: 2 * (ho + 1)].reshape(ho + 1, 2, wp, kc)
        even, odd = de[:, 0], de[:, 1]
        rowparts = [even[0:ho], odd[0:ho], even[1:ho + 1], odd[1:ho + 1]]
    else:
        rowparts = [cols[i:i + ho] for i in range(KSIZE)]

    # Single big-K matmul per conv (K = 16*cin), bias folded in with one broadcast add.
    lhs = jnp.concatenate(rowparts, axis=-1).reshape(ho * wp, KSIZE * kc)
    y = jnp.dot(lhs, w_ref[...], preferred_element_type=jnp.float32) + b_ref[...]
    return y.reshape(ho, wp, cmm)[:, :wo, :cout]


def _instnorm_lrelu(x):
    # InstanceNorm2d (affine=False, biased var, eps=1e-5) + LeakyReLU(0.2) on (H, W, C).
    mean = jnp.mean(x, axis=(0, 1), keepdims=True)
    var = jnp.mean(jnp.square(x - mean), axis=(0, 1), keepdims=True)
    y = (x - mean) * jax.lax.rsqrt(var + IN_EPS)
    return jnp.where(y > 0, y, LRELU_SLOPE * y)


def _zero_pad_ring(f, h_data, w_data):
    """Zero only the pad=1 ring the convs actually read (top/bottom row, left/right
    column of the logical padded map).  Remaining halo/slack elements feed only output
    columns that are sliced away, so they may safely hold garbage."""
    H, W, C = f.shape
    zrow = jnp.zeros((1, W, C), f.dtype)
    zcol = jnp.zeros((H, 1, C), f.dtype)
    f[0:1, :, :] = zrow                                        # padded row 0
    f[h_data + 1:h_data + 2, :, :] = zrow                      # padded row h+1
    f[:, LEFT_PAD - 1:LEFT_PAD, :] = zcol                      # padded col 0
    f[:, LEFT_PAD + w_data:LEFT_PAD + w_data + 1, :] = zcol    # padded col w+1


def _make_kernel(cfg, data_dims):
    def kernel(x_ref, w1, b1, w2, b2, w3, b3, w4, b4, w5, b5, o_ref,
               f0, f1, f2, f3, f4):
        bufs = (f0, f1, f2, f3, f4)
        wrefs = (w1, w2, w3, w4, w5)
        brefs = (b1, b2, b3, b4, b5)

        # Ring-only zeroing, every step (cheap: 2 rows + 2 cols per buffer).  Re-doing
        # it per step keeps correctness independent of how the batch grid is split
        # across TensorCores; the old code zeroed whole buffers per layer per element.
        for f, (hd, wd) in zip(bufs, data_dims):
            _zero_pad_ring(f, hd, wd)

        # Stage the unpadded network input into the layer-0 buffer interior (pad=1 halo
        # is the ring zeroed above) -- no padded HBM copy in the wrapper.
        h0, w0 = data_dims[0]
        f0[1:1 + h0, LEFT_PAD:LEFT_PAD + w0, :] = x_ref[...].astype(f0.dtype)

        y = None
        for layer in range(5):
            lc = cfg[layer]
            y = _conv4x4(bufs[layer], wrefs[layer], brefs[layer], lc)
            if 1 <= layer <= 3:            # conv2..conv4: InstanceNorm + LeakyReLU
                y = _instnorm_lrelu(y)     # (conv1 has no norm/activation, per spec)
            if layer < 4:                  # stage next conv's input: aligned interior store
                dst = bufs[layer + 1]
                dst[1:1 + lc["ho"], LEFT_PAD:LEFT_PAD + lc["wo"], :] = y.astype(dst.dtype)

        # conv5 head: LeakyReLU(0.2), then exact sigmoid (output is 2x2x1; an approx
        # reciprocal could push the model output slightly outside [0, 1]).
        y = jnp.where(y > 0, y, LRELU_SLOPE * y)
        o_ref[...] = 1.0 / (1.0 + jnp.exp(-y))

    return kernel


# ---------------------------------------------------------------------------
# Forward pass (wrapper: layout prep only, all compute in the one kernel)
# ---------------------------------------------------------------------------
def discriminator_forward(params, x_nchw, label_nchw):
    x = jnp.concatenate([x_nchw, label_nchw], axis=1)          # channel concat (NCHW)
    x = jnp.transpose(x, (0, 2, 3, 1)).astype(jnp.float32)     # -> NHWC
    n, h, w, cin = x.shape

    weights = [params[f"w{i}"] for i in range(1, 6)]
    biases = [params[f"b{i}"] for i in range(1, 6)]
    strides = (2, 2, 2, 1, 1)

    # Static per-layer geometry.
    cfg = []
    hh, ww, cc = h, w, cin
    for wt, s in zip(weights, strides):
        cout = wt.shape[0]
        ho = (hh + 2 - KSIZE) // s + 1
        wo = (ww + 2 - KSIZE) // s + 1
        cfg.append(dict(s=s, ho=ho, wo=wo, wp=_round_up(wo, 8), cin=cc, cout=cout))
        hh, ww, cc = ho, wo, cout

    # Feature scratch: buffer i holds the (ring-padded) input of conv i+1; data sits at
    # [1:1+h, LEFT_PAD:LEFT_PAD+w, :].  Stride-1-consumed buffers are bf16; the ones read
    # with sublane-strided loads (stride-2 convs) stay f32.
    # TODO(synk): with C=6..64 on the lane axis every row pads to 128 lanes (physical
    # size up to 128/C x logical); fine at toy shapes, but real resolutions need a
    # lane-dense (W*C folded) layout and H-strip tiling of the first layers.
    data_dims = [(h, w)] + [(cfg[l]["ho"], cfg[l]["wo"]) for l in range(4)]
    in_ch = [cin] + [cfg[l]["cout"] for l in range(4)]
    buf_shapes, buf_dtypes = [], []
    for l in range(5):
        hd, wd = data_dims[l]
        s, wp = cfg[l]["s"], cfg[l]["wp"]
        h_store = hd + 2
        w_store = _round_up(max(LEFT_PAD + wd + 1, LEFT_PAD + 3 + s * (wp - 1) + 1), 8)
        buf_shapes.append((h_store, w_store, in_ch[l]))
        buf_dtypes.append(jnp.float32 if s == 2 else jnp.bfloat16)

    # (Cout, Cin, KH, KW) -> (KH*KW*Cin, Cmm) bf16 matching the in-kernel tap order
    # (kh major, then kw, then cin); Cout padded to a multiple of 8 (only the head).
    wmats, bvecs = [], []
    for wt, bias in zip(weights, biases):
        cout, ci, kh, kw = wt.shape
        cmm = _round_up(cout, 8)
        wm = jnp.transpose(wt, (2, 3, 1, 0)).reshape(kh * kw * ci, cout)
        wm = jnp.zeros((kh * kw * ci, cmm), jnp.float32).at[:, :cout].set(wm)
        wmats.append(wm.astype(jnp.bfloat16))
        bvecs.append(jnp.zeros((1, cmm), jnp.float32).at[0, :cout].set(bias))

    in_specs = [pl.BlockSpec((None, h, w, cin), lambda b: (b, 0, 0, 0))]
    flat_in = [x]
    for wm, bv in zip(wmats, bvecs):
        in_specs.append(pl.BlockSpec(wm.shape, lambda b: (0, 0)))
        in_specs.append(pl.BlockSpec(bv.shape, lambda b: (0, 0)))
        flat_in += [wm, bv]

    ho5, wo5, co5 = cfg[4]["ho"], cfg[4]["wo"], cfg[4]["cout"]

    # VMEM budget (lane-padding aware): scratch + double-buffered inputs/outputs + a
    # generous allowance for the transient im2col values.
    vmem = sum(_phys_vmem_bytes(s_, d_) for s_, d_ in zip(buf_shapes, buf_dtypes))
    vmem += 2 * _phys_vmem_bytes((h, w, cin), jnp.float32)
    vmem += 2 * _phys_vmem_bytes((ho5, wo5, co5), jnp.float32)
    for wm, bv in zip(wmats, bvecs):
        vmem += 2 * (_phys_vmem_bytes(wm.shape, jnp.bfloat16)
                     + _phys_vmem_bytes(bv.shape, jnp.float32))
    vmem += 4 * max(_phys_vmem_bytes(s_, jnp.bfloat16) for s_ in buf_shapes)
    vmem_limit = int(min(max(2 * vmem, 32 << 20), 60 << 20))

    out = pl.pallas_call(
        _make_kernel(cfg, data_dims),
        out_shape=jax.ShapeDtypeStruct((n, ho5, wo5, co5), jnp.float32),
        grid=(n,),
        in_specs=in_specs,
        out_specs=pl.BlockSpec((None, ho5, wo5, co5), lambda b: (b, 0, 0, 0)),
        scratch_shapes=[pltpu.VMEM(s_, d_) for s_, d_ in zip(buf_shapes, buf_dtypes)],
        compiler_params=pltpu.CompilerParams(
            dimension_semantics=_batch_dimension_semantics(),
            vmem_limit_bytes=vmem_limit),
    )(*flat_in)

    return jnp.transpose(out, (0, 3, 1, 2))                    # NHWC -> NCHW


# ---------------------------------------------------------------------------
# Pure-JAX reference (same bf16-matmul precision policy) for a correctness check
# ---------------------------------------------------------------------------
def reference_forward(params, x_nchw, label_nchw):
    x = jnp.concatenate([x_nchw, label_nchw], axis=1)
    x = jnp.transpose(x, (0, 2, 3, 1)).astype(jnp.float32)

    def conv(v, wt, b, stride):
        hwio = jnp.transpose(wt, (2, 3, 1, 0)).astype(jnp.bfloat16)
        y = jax.lax.conv_general_dilated(
            v.astype(jnp.bfloat16), hwio, window_strides=(stride, stride),
            padding=((1, 1), (1, 1)), dimension_numbers=("NHWC", "HWIO", "NHWC"),
            preferred_element_type=jnp.float32)
        return y + b.reshape(1, 1, 1, -1)

    def inorm_lrelu(v):
        m = jnp.mean(v, axis=(1, 2), keepdims=True)
        var = jnp.mean((v - m) ** 2, axis=(1, 2), keepdims=True)
        v = (v - m) * jax.lax.rsqrt(var + IN_EPS)
        return jnp.where(v > 0, v, LRELU_SLOPE * v)

    x = conv(x, params["w1"], params["b1"], 2)
    x = inorm_lrelu(conv(x, params["w2"], params["b2"], 2))
    x = inorm_lrelu(conv(x, params["w3"], params["b3"], 2))
    x = inorm_lrelu(conv(x, params["w4"], params["b4"], 1))
    x = conv(x, params["w5"], params["b5"], 1)
    x = jnp.where(x > 0, x, LRELU_SLOPE * x)
    x = jax.nn.sigmoid(x)
    return jnp.transpose(x, (0, 3, 1, 2))


def init_params(key, input_dim, num_filter, output_dim):
    # normal_weight_init(mean=0, std=0.02); biases drawn small & deterministic.
    specs = [
        (num_filter, input_dim),
        (num_filter * 2, num_filter),
        (num_filter * 4, num_filter * 2),
        (num_filter * 8, num_filter * 4),
        (output_dim, num_filter * 8),
    ]
    params = {}
    for idx, (cout, cin) in enumerate(specs, start=1):
        key, wk, bk = jax.random.split(key, 3)
        params[f"w{idx}"] = 0.02 * jax.random.normal(wk, (cout, cin, 4, 4), jnp.float32)
        params[f"b{idx}"] = 0.02 * jax.random.normal(bk, (cout,), jnp.float32)
    return params


if __name__ == "__main__":
    key = jax.random.PRNGKey(0)
    kx, kl, kp = jax.random.split(key, 3)

    N, Cx, Cl, H, W = 2, 3, 3, 32, 32
    num_filter, output_dim = 8, 1

    x = jax.random.normal(kx, (N, Cx, H, W), jnp.float32)
    label = jax.random.normal(kl, (N, Cl, H, W), jnp.float32)
    params = init_params(kp, Cx + Cl, num_filter, output_dim)

    fwd = jax.jit(functools.partial(discriminator_forward, params))
    out = jax.block_until_ready(fwd(x, label))

    # 32 -> 16 -> 8 -> 4 -> 3 -> 2 spatial; exact sigmoid output stays within [0, 1].
    assert out.shape == (N, output_dim, 2, 2), out.shape
    assert bool(jnp.all(jnp.isfinite(out)))
    assert bool(jnp.all((out >= 0.0) & (out <= 1.0)))

    ref = reference_forward(params, x, label)
    assert bool(jnp.max(jnp.abs(out - ref)) < 5e-2), float(jnp.max(jnp.abs(out - ref)))

    print("KERNEL_OK")
</pallas_src>

<mosaic_0001>
module attributes {stable_mosaic.version = 11 : i64} {
  func.func @kernel(%arg0: i32, %arg1: memref<1x32x32x6xf32, #tpu.memory_space<vmem>>, %arg2: memref<96x8xbf16, #tpu.memory_space<vmem>>, %arg3: memref<1x8xf32, #tpu.memory_space<vmem>>, %arg4: memref<128x16xbf16, #tpu.memory_space<vmem>>, %arg5: memref<1x16xf32, #tpu.memory_space<vmem>>, %arg6: memref<256x32xbf16, #tpu.memory_space<vmem>>, %arg7: memref<1x32xf32, #tpu.memory_space<vmem>>, %arg8: memref<512x64xbf16, #tpu.memory_space<vmem>>, %arg9: memref<1x64xf32, #tpu.memory_space<vmem>>, %arg10: memref<1024x8xbf16, #tpu.memory_space<vmem>>, %arg11: memref<1x8xf32, #tpu.memory_space<vmem>>, %arg12: memref<1x2x2x1xf32, #tpu.memory_space<vmem>>, %arg13: memref<34x48x6xf32, #tpu.memory_space<vmem>>, %arg14: memref<18x32x8xf32, #tpu.memory_space<vmem>>, %arg15: memref<10x32x16xf32, #tpu.memory_space<vmem>>, %arg16: memref<6x24x32xbf16, #tpu.memory_space<vmem>>, %arg17: memref<5x24x64xbf16, #tpu.memory_space<vmem>>) attributes {dimension_semantics = [#tpu.dimension_semantics<parallel>], iteration_bounds = array<i64: 2>, scalar_prefetch = 0 : i64, scratch_operands = 5 : i64, tpu.core_type = #tpu.core_type<tc>, window_params = [{transform_indices = @transform_0, window_bounds = array<i64: 1, 32, 32, 6>}, {pipeline_mode = #tpu.pipeline_mode<synchronous>, transform_indices = @transform_1, window_bounds = array<i64: 96, 8>}, {pipeline_mode = #tpu.pipeline_mode<synchronous>, transform_indices = @transform_2, window_bounds = array<i64: 1, 8>}, {pipeline_mode = #tpu.pipeline_mode<synchronous>, transform_indices = @transform_3, window_bounds = array<i64: 128, 16>}, {pipeline_mode = #tpu.pipeline_mode<synchronous>, transform_indices = @transform_4, window_bounds = array<i64: 1, 16>}, {pipeline_mode = #tpu.pipeline_mode<synchronous>, transform_indices = @transform_5, window_bounds = array<i64: 256, 32>}, {pipeline_mode = #tpu.pipeline_mode<synchronous>, transform_indices = @transform_6, window_bounds = array<i64: 1, 32>}, {pipeline_mode = #tpu.pipeline_mode<synchronous>, transform_indices = @transform_7, window_bounds = array<i64: 512, 64>}, {pipeline_mode = #tpu.pipeline_mode<synchronous>, transform_indices = @transform_8, window_bounds = array<i64: 1, 64>}, {pipeline_mode = #tpu.pipeline_mode<synchronous>, transform_indices = @transform_9, window_bounds = array<i64: 1024, 8>}, {pipeline_mode = #tpu.pipeline_mode<synchronous>, transform_indices = @transform_10, window_bounds = array<i64: 1, 8>}, {transform_indices = @transform_11, window_bounds = array<i64: 1, 2, 2, 1>}]} {
    %cst = arith.constant 0.000000e+00 : f32
    %0 = vector.broadcast %cst : f32 to vector<1x48x6xf32>
    %cst_0 = arith.constant 0.000000e+00 : f32
    %1 = vector.broadcast %cst_0 : f32 to vector<34x1x6xf32>
    %c0 = arith.constant 0 : index
    %c0_1 = arith.constant 0 : index
    %c0_2 = arith.constant 0 : index
    %2 = vector.load %arg13[%c0, %c0_1, %c0_2] : memref<34x48x6xf32, #tpu.memory_space<vmem>>, vector<1x48x6xf32>
    tpu.vector_store %arg13[%c0, %c0_1, %c0_2], %0 {strides = array<i32>} : memref<34x48x6xf32, #tpu.memory_space<vmem>>, vector<1x48x6xf32>,
    %c33 = arith.constant 33 : index
    %c0_3 = arith.constant 0 : index
    %c0_4 = arith.constant 0 : index
    %3 = vector.load %arg13[%c33, %c0_3, %c0_4] : memref<34x48x6xf32, #tpu.memory_space<vmem>>, vector<1x48x6xf32>
    tpu.vector_store %arg13[%c33, %c0_3, %c0_4], %0 {strides = array<i32>} : memref<34x48x6xf32, #tpu.memory_space<vmem>>, vector<1x48x6xf32>,
    %c0_5 = arith.constant 0 : index
    %c7 = arith.constant 7 : index
    %c0_6 = arith.constant 0 : index
    %4 = vector.load %arg13[%c0_5, %c7, %c0_6] : memref<34x48x6xf32, #tpu.memory_space<vmem>>, vector<34x1x6xf32>
    tpu.vector_store %arg13[%c0_5, %c7, %c0_6], %1 {strides = array<i32>} : memref<34x48x6xf32, #tpu.memory_space<vmem>>, vector<34x1x6xf32>,
    %c0_7 = arith.constant 0 : index
    %c40 = arith.constant 40 : index
    %c0_8 = arith.constant 0 : index
    %5 = vector.load %arg13[%c0_7, %c40, %c0_8] : memref<34x48x6xf32, #tpu.memory_space<vmem>>, vector<34x1x6xf32>
    tpu.vector_store %arg13[%c0_7, %c40, %c0_8], %1 {strides = array<i32>} : memref<34x48x6xf32, #tpu.memory_space<vmem>>, vector<34x1x6xf32>,
    %cst_9 = arith.constant 0.000000e+00 : f32
    %6 = vector.broadcast %cst_9 : f32 to vector<1x32x8xf32>
    %cst_10 = arith.constant 0.000000e+00 : f32
    %7 = vector.broadcast %cst_10 : f32 to vector<18x1x8xf32>
    %c0_11 = arith.constant 0 : index
    %c0_12 = arith.constant 0 : index
    %c0_13 = arith.constant 0 : index
    %8 = vector.load %arg14[%c0_11, %c0_12, %c0_13] : memref<18x32x8xf32, #tpu.memory_space<vmem>>, vector<1x32x8xf32>
    tpu.vector_store %arg14[%c0_11, %c0_12, %c0_13], %6 {strides = array<i32>} : memref<18x32x8xf32, #tpu.memory_space<vmem>>, vector<1x32x8xf32>,
    %c17 = arith.constant 17 : index
    %c0_14 = arith.constant 0 : index
    %c0_15 = arith.constant 0 : index
    %9 = vector.load %arg14[%c17, %c0_14, %c0_15] : memref<18x32x8xf32, #tpu.memory_space<vmem>>, vector<1x32x8xf32>
    tpu.vector_store %arg14[%c17, %c0_14, %c0_15], %6 {strides = array<i32>} : memref<18x32x8xf32, #tpu.memory_space<vmem>>, vector<1x32x8xf32>,
    %c0_16 = arith.constant 0 : index
    %c7_17 = arith.constant 7 : index
    %c0_18 = arith.constant 0 : index
    %10 = vector.load %arg14[%c0_16, %c7_17, %c0_18] : memref<18x32x8xf32, #tpu.memory_space<vmem>>, vector<18x1x8xf32>
    tpu.vector_store %arg14[%c0_16, %c7_17, %c0_18], %7 {strides = array<i32>} : memref<18x32x8xf32, #tpu.memory_space<vmem>>, vector<18x1x8xf32>,
    %c0_19 = arith.constant 0 : index
    %c24 = arith.constant 24 : index
    %c0_20 = arith.constant 0 : index
    %11 = vector.load %arg14[%c0_19, %c24, %c0_20] : memref<18x32x8xf32, #tpu.memory_space<vmem>>, vector<18x1x8xf32>
    tpu.vector_store %arg14[%c0_19, %c24, %c0_20], %7 {strides = array<i32>} : memref<18x32x8xf32, #tpu.memory_space<vmem>>, vector<18x1x8xf32>,
    %cst_21 = arith.constant 0.000000e+00 : f32
    %12 = vector.broadcast %cst_21 : f32 to vector<1x32x16xf32>
    %cst_22 = arith.constant 0.000000e+00 : f32
    %13 = vector.broadcast %cst_22 : f32 to vector<10x1x16xf32>
    %c0_23 = arith.constant 0 : index
    %c0_24 = arith.constant 0 : index
    %c0_25 = arith.constant 0 : index
    %14 = vector.load %arg15[%c0_23, %c0_24, %c0_25] : memref<10x32x16xf32, #tpu.memory_space<vmem>>, vector<1x32x16xf32>
    tpu.vector_store %arg15[%c0_23, %c0_24, %c0_25], %12 {strides = array<i32>} : memref<10x32x16xf32, #tpu.memory_space<vmem>>, vector<1x32x16xf32>,
    %c9 = arith.constant 9 : index
    %c0_26 = arith.constant 0 : index
    %c0_27 = arith.constant 0 : index
    %15 = vector.load %arg15[%c9, %c0_26, %c0_27] : memref<10x32x16xf32, #tpu.memory_space<vmem>>, vector<1x32x16xf32>
    tpu.vector_store %arg15[%c9, %c0_26, %c0_27], %12 {strides = array<i32>} : memref<10x32x16xf32, #tpu.memory_space<vmem>>, vector<1x32x16xf32>,
    %c0_28 = arith.constant 0 : index
    %c7_29 = arith.constant 7 : index
    %c0_30 = arith.constant 0 : index
    %16 = vector.load %arg15[%c0_28, %c7_29, %c0_30] : memref<10x32x16xf32, #tpu.memory_space<vmem>>, vector<10x1x16xf32>
    tpu.vector_store %arg15[%c0_28, %c7_29, %c0_30], %13 {strides = array<i32>} : memref<10x32x16xf32, #tpu.memory_space<vmem>>, vector<10x1x16xf32>,
    %c0_31 = arith.constant 0 : index
    %c16 = arith.constant 16 : index
    %c0_32 = arith.constant 0 : index
    %17 = vector.load %arg15[%c0_31, %c16, %c0_32] : memref<10x32x16xf32, #tpu.memory_space<vmem>>, vector<10x1x16xf32>
    tpu.vector_store %arg15[%c0_31, %c16, %c0_32], %13 {strides = array<i32>} : memref<10x32x16xf32, #tpu.memory_space<vmem>>, vector<10x1x16xf32>,
    %cst_33 = arith.constant 0.000000e+00 : bf16
    %18 = vector.broadcast %cst_33 : bf16 to vector<1x24x32xbf16>
    %cst_34 = arith.constant 0.000000e+00 : bf16
    %19 = vector.broadcast %cst_34 : bf16 to vector<6x1x32xbf16>
    %c0_35 = arith.constant 0 : index
    %c0_36 = arith.constant 0 : index
    %c0_37 = arith.constant 0 : index
    %20 = vector.load %arg16[%c0_35, %c0_36, %c0_37] : memref<6x24x32xbf16, #tpu.memory_space<vmem>>, vector<1x24x32xbf16>
    tpu.vector_store %arg16[%c0_35, %c0_36, %c0_37], %18 {strides = array<i32>} : memref<6x24x32xbf16, #tpu.memory_space<vmem>>, vector<1x24x32xbf16>,
    %c5 = arith.constant 5 : index
    %c0_38 = arith.constant 0 : index
    %c0_39 = arith.constant 0 : index
    %21 = vector.load %arg16[%c5, %c0_38, %c0_39] : memref<6x24x32xbf16, #tpu.memory_space<vmem>>, vector<1x24x32xbf16>
    tpu.vector_store %arg16[%c5, %c0_38, %c0_39], %18 {strides = array<i32>} : memref<6x24x32xbf16, #tpu.memory_space<vmem>>, vector<1x24x32xbf16>,
    %c0_40 = arith.constant 0 : index
    %c7_41 = arith.constant 7 : index
    %c0_42 = arith.constant 0 : index
    %22 = vector.load %arg16[%c0_40, %c7_41, %c0_42] : memref<6x24x32xbf16, #tpu.memory_space<vmem>>, vector<6x1x32xbf16>
    tpu.vector_store %arg16[%c0_40, %c7_41, %c0_42], %19 {strides = array<i32>} : memref<6x24x32xbf16, #tpu.memory_space<vmem>>, vector<6x1x32xbf16>,
    %c0_43 = arith.constant 0 : index
    %c12 = arith.constant 12 : index
    %c0_44 = arith.constant 0 : index
    %23 = vector.load %arg16[%c0_43, %c12, %c0_44] : memref<6x24x32xbf16, #tpu.memory_space<vmem>>, vector<6x1x32xbf16>
    tpu.vector_store %arg16[%c0_43, %c12, %c0_44], %19 {strides = array<i32>} : memref<6x24x32xbf16, #tpu.memory_space<vmem>>, vector<6x1x32xbf16>,
    %cst_45 = arith.constant 0.000000e+00 : bf16
    %24 = vector.broadcast %cst_45 : bf16 to vector<1x24x64xbf16>
    %cst_46 = arith.constant 0.000000e+00 : bf16
    %25 = vector.broadcast %cst_46 : bf16 to vector<5x1x64xbf16>
    %c0_47 = arith.constant 0 : index
    %c0_48 = arith.constant 0 : index
    %c0_49 = arith.constant 0 : index
    %26 = vector.load %arg17[%c0_47, %c0_48, %c0_49] : memref<5x24x64xbf16, #tpu.memory_space<vmem>>, vector<1x24x64xbf16>
    tpu.vector_store %arg17[%c0_47, %c0_48, %c0_49], %24 {strides = array<i32>} : memref<5x24x64xbf16, #tpu.memory_space<vmem>>, vector<1x24x64xbf16>,
    %c4 = arith.constant 4 : index
    %c0_50 = arith.constant 0 : index
    %c0_51 = arith.constant 0 : index
    %27 = vector.load %arg17[%c4, %c0_50, %c0_51] : memref<5x24x64xbf16, #tpu.memory_space<vmem>>, vector<1x24x64xbf16>
    tpu.vector_store %arg17[%c4, %c0_50, %c0_51], %24 {strides = array<i32>} : memref<5x24x64xbf16, #tpu.memory_space<vmem>>, vector<1x24x64xbf16>,
    %c0_52 = arith.constant 0 : index
    %c7_53 = arith.constant 7 : index
    %c0_54 = arith.constant 0 : index
    %28 = vector.load %arg17[%c0_52, %c7_53, %c0_54] : memref<5x24x64xbf16, #tpu.memory_space<vmem>>, vector<5x1x64xbf16>
    tpu.vector_store %arg17[%c0_52, %c7_53, %c0_54], %25 {strides = array<i32>} : memref<5x24x64xbf16, #tpu.memory_space<vmem>>, vector<5x1x64xbf16>,
    %c0_55 = arith.constant 0 : index
    %c11 = arith.constant 11 : index
    %c0_56 = arith.constant 0 : index
    %29 = vector.load %arg17[%c0_55, %c11, %c0_56] : memref<5x24x64xbf16, #tpu.memory_space<vmem>>, vector<5x1x64xbf16>
    tpu.vector_store %arg17[%c0_55, %c11, %c0_56], %25 {strides = array<i32>} : memref<5x24x64xbf16, #tpu.memory_space<vmem>>, vector<5x1x64xbf16>,
    %c0_57 = arith.constant 0 : index
    %c0_58 = arith.constant 0 : index
    %c0_59 = arith.constant 0 : index
    %c0_60 = arith.constant 0 : index
    %30 = vector.load %arg1[%c0_57, %c0_58, %c0_59, %c0_60] : memref<1x32x32x6xf32, #tpu.memory_space<vmem>>, vector<1x32x32x6xf32>
    %31 = vector.shape_cast %30 : vector<1x32x32x6xf32> to vector<32x32x6xf32>
    %c1 = arith.constant 1 : index
    %c8 = arith.constant 8 : index
    %c0_61 = arith.constant 0 : index
    %32 = vector.load %arg13[%c1, %c8, %c0_61] : memref<34x48x6xf32, #tpu.memory_space<vmem>>, vector<32x32x6xf32>
    tpu.vector_store %arg13[%c1, %c8, %c0_61], %31 {strides = array<i32>} : memref<34x48x6xf32, #tpu.memory_space<vmem>>, vector<32x32x6xf32>,
    %c0_62 = arith.constant 0 : index
    %c7_63 = arith.constant 7 : index
    %c0_64 = arith.constant 0 : index
    %33 = tpu.strided_load %arg13[%c0_62, %c7_63, %c0_64] {strides = array<i32: 1, 2, 1>} : memref<34x48x6xf32, #tpu.memory_space<vmem>>, vector<34x16x6xf32>
    %34 = arith.truncf %33 : vector<34x16x6xf32> to vector<34x16x6xbf16>
    %c0_65 = arith.constant 0 : index
    %c8_66 = arith.constant 8 : index
    %c0_67 = arith.constant 0 : index
    %35 = tpu.strided_load %arg13[%c0_65, %c8_66, %c0_67] {strides = array<i32: 1, 2, 1>} : memref<34x48x6xf32, #tpu.memory_space<vmem>>, vector<34x16x6xf32>
    %36 = arith.truncf %35 : vector<34x16x6xf32> to vector<34x16x6xbf16>
    %c0_68 = arith.constant 0 : index
    %c9_69 = arith.constant 9 : index
    %c0_70 = arith.constant 0 : index
    %37 = tpu.strided_load %arg13[%c0_68, %c9_69, %c0_70] {strides = array<i32: 1, 2, 1>} : memref<34x48x6xf32, #tpu.memory_space<vmem>>, vector<34x16x6xf32>
    %38 = arith.truncf %37 : vector<34x16x6xf32> to vector<34x16x6xbf16>
    %c0_71 = arith.constant 0 : index
    %c10 = arith.constant 10 : index
    %c0_72 = arith.constant 0 : index
    %39 = tpu.strided_load %arg13[%c0_71, %c10, %c0_72] {strides = array<i32: 1, 2, 1>} : memref<34x48x6xf32, #tpu.memory_space<vmem>>, vector<34x16x6xf32>
    %40 = arith.truncf %39 : vector<34x16x6xf32> to vector<34x16x6xbf16>
    %41 = tpu.concatenate %34, %36, %38, %40 in 2 : vector<34x16x6xbf16>, vector<34x16x6xbf16>, vector<34x16x6xbf16>, vector<34x16x6xbf16> -> vector<34x16x24xbf16>
    %42 = vector.shape_cast %41 : vector<34x16x24xbf16> to vector<17x2x16x24xbf16>
    %43 = vector.extract_strided_slice %42 {offsets = [0, 0, 0, 0], sizes = [17, 1, 16, 24], strides = [1, 1, 1, 1]} : vector<17x2x16x24xbf16> to vector<17x1x16x24xbf16>
    %44 = vector.shape_cast %43 : vector<17x1x16x24xbf16> to vector<17x16x24xbf16>
    %45 = vector.extract_strided_slice %42 {offsets = [0, 1, 0, 0], sizes = [17, 1, 16, 24], strides = [1, 1, 1, 1]} : vector<17x2x16x24xbf16> to vector<17x1x16x24xbf16>
    %46 = vector.shape_cast %45 : vector<17x1x16x24xbf16> to vector<17x16x24xbf16>
    %47 = vector.extract_strided_slice %44 {offsets = [0, 0, 0], sizes = [16, 16, 24], strides = [1, 1, 1]} : vector<17x16x24xbf16> to vector<16x16x24xbf16>
    %48 = vector.extract_strided_slice %46 {offsets = [0, 0, 0], sizes = [16, 16, 24], strides = [1, 1, 1]} : vector<17x16x24xbf16> to vector<16x16x24xbf16>
    %49 = vector.extract_strided_slice %44 {offsets = [1, 0, 0], sizes = [16, 16, 24], strides = [1, 1, 1]} : vector<17x16x24xbf16> to vector<16x16x24xbf16>
    %50 = vector.extract_strided_slice %46 {offsets = [1, 0, 0], sizes = [16, 16, 24], strides = [1, 1, 1]} : vector<17x16x24xbf16> to vector<16x16x24xbf16>
    %51 = tpu.concatenate %47, %48, %49, %50 in 2 : vector<16x16x24xbf16>, vector<16x16x24xbf16>, vector<16x16x24xbf16>, vector<16x16x24xbf16> -> vector<16x16x96xbf16>
    %52 = vector.shape_cast %51 : vector<16x16x96xbf16> to vector<256x96xbf16>
    %c0_73 = arith.constant 0 : index
    %c0_74 = arith.constant 0 : index
    %53 = vector.load %arg2[%c0_73, %c0_74] : memref<96x8xbf16, #tpu.memory_space<vmem>>, vector<96x8xbf16>
    %cst_75 = arith.constant dense<0.000000e+00> : vector<256x8xf32>
    %54 = tpu.matmul %52, %53, %cst_75 {dimension_numbers = #tpu.dot_dimension_numbers<[1], [0], [0], [1], [0, 0, 1, 1], [], []>} : vector<256x96xbf16>, vector<96x8xbf16>, vector<256x8xf32> -> vector<256x8xf32>
    %c0_76 = arith.constant 0 : index
    %c0_77 = arith.constant 0 : index
    %55 = vector.load %arg3[%c0_76, %c0_77] : memref<1x8xf32, #tpu.memory_space<vmem>>, vector<1x8xf32>
    %56 = vector.broadcast %55 : vector<1x8xf32> to vector<256x8xf32>
    %57 = arith.addf %54, %56 : vector<256x8xf32>
    %58 = vector.shape_cast %57 : vector<256x8xf32> to vector<16x16x8xf32>
    %c1_78 = arith.constant 1 : index
    %c8_79 = arith.constant 8 : index
    %c0_80 = arith.constant 0 : index
    %59 = vector.load %arg14[%c1_78, %c8_79, %c0_80] : memref<18x32x8xf32, #tpu.memory_space<vmem>>, vector<16x16x8xf32>
    tpu.vector_store %arg14[%c1_78, %c8_79, %c0_80], %58 {strides = array<i32>} : memref<18x32x8xf32, #tpu.memory_space<vmem>>, vector<16x16x8xf32>,
    %c0_81 = arith.constant 0 : index
    %c7_82 = arith.constant 7 : index
    %c0_83 = arith.constant 0 : index
    %60 = tpu.strided_load %arg14[%c0_81, %c7_82, %c0_83] {strides = array<i32: 1, 2, 1>} : memref<18x32x8xf32, #tpu.memory_space<vmem>>, vector<18x8x8xf32>
    %61 = arith.truncf %60 : vector<18x8x8xf32> to vector<18x8x8xbf16>
    %c0_84 = arith.constant 0 : index
    %c8_85 = arith.constant 8 : index
    %c0_86 = arith.constant 0 : index
    %62 = tpu.strided_load %arg14[%c0_84, %c8_85, %c0_86] {strides = array<i32: 1, 2, 1>} : memref<18x32x8xf32, #tpu.memory_space<vmem>>, vector<18x8x8xf32>
    %63 = arith.truncf %62 : vector<18x8x8xf32> to vector<18x8x8xbf16>
    %c0_87 = arith.constant 0 : index
    %c9_88 = arith.constant 9 : index
    %c0_89 = arith.constant 0 : index
    %64 = tpu.strided_load %arg14[%c0_87, %c9_88, %c0_89] {strides = array<i32: 1, 2, 1>} : memref<18x32x8xf32, #tpu.memory_space<vmem>>, vector<18x8x8xf32>
    %65 = arith.truncf %64 : vector<18x8x8xf32> to vector<18x8x8xbf16>
    %c0_90 = arith.constant 0 : index
    %c10_91 = arith.constant 10 : index
    %c0_92 = arith.constant 0 : index
    %66 = tpu.strided_load %arg14[%c0_90, %c10_91, %c0_92] {strides = array<i32: 1, 2, 1>} : memref<18x32x8xf32, #tpu.memory_space<vmem>>, vector<18x8x8xf32>
    %67 = arith.truncf %66 : vector<18x8x8xf32> to vector<18x8x8xbf16>
    %68 = tpu.concatenate %61, %63, %65, %67 in 2 : vector<18x8x8xbf16>, vector<18x8x8xbf16>, vector<18x8x8xbf16>, vector<18x8x8xbf16> -> vector<18x8x32xbf16>
    %69 = vector.shape_cast %68 : vector<18x8x32xbf16> to vector<9x2x8x32xbf16>
    %70 = vector.extract_strided_slice %69 {offsets = [0, 0, 0, 0], sizes = [9, 1, 8, 32], strides = [1, 1, 1, 1]} : vector<9x2x8x32xbf16> to vector<9x1x8x32xbf16>
    %71 = vector.shape_cast %70 : vector<9x1x8x32xbf16> to vector<9x8x32xbf16>
    %72 = vector.extract_strided_slice %69 {offsets = [0, 1, 0, 0], sizes = [9, 1, 8, 32], strides = [1, 1, 1, 1]} : vector<9x2x8x32xbf16> to vector<9x1x8x32xbf16>
    %73 = vector.shape_cast %72 : vector<9x1x8x32xbf16> to vector<9x8x32xbf16>
    %74 = vector.extract_strided_slice %71 {offsets = [0, 0, 0], sizes = [8, 8, 32], strides = [1, 1, 1]} : vector<9x8x32xbf16> to vector<8x8x32xbf16>
    %75 = vector.extract_strided_slice %73 {offsets = [0, 0, 0], sizes = [8, 8, 32], strides = [1, 1, 1]} : vector<9x8x32xbf16> to vector<8x8x32xbf16>
    %76 = vector.extract_strided_slice %71 {offsets = [1, 0, 0], sizes = [8, 8, 32], strides = [1, 1, 1]} : vector<9x8x32xbf16> to vector<8x8x32xbf16>
    %77 = vector.extract_strided_slice %73 {offsets = [1, 0, 0], sizes = [8, 8, 32], strides = [1, 1, 1]} : vector<9x8x32xbf16> to vector<8x8x32xbf16>
    %78 = tpu.concatenate %74, %75, %76, %77 in 2 : vector<8x8x32xbf16>, vector<8x8x32xbf16>, vector<8x8x32xbf16>, vector<8x8x32xbf16> -> vector<8x8x128xbf16>
    %79 = vector.shape_cast %78 : vector<8x8x128xbf16> to vector<64x128xbf16>
    %c0_93 = arith.constant 0 : index
    %c0_94 = arith.constant 0 : index
    %80 = vector.load %arg4[%c0_93, %c0_94] : memref<128x16xbf16, #tpu.memory_space<vmem>>, vector<128x16xbf16>
    %cst_95 = arith.constant dense<0.000000e+00> : vector<64x16xf32>
    %81 = tpu.matmul %79, %80, %cst_95 {dimension_numbers = #tpu.dot_dimension_numbers<[1], [0], [0], [1], [0, 0, 1, 1], [], []>} : vector<64x128xbf16>, vector<128x16xbf16>, vector<64x16xf32> -> vector<64x16xf32>
    %c0_96 = arith.constant 0 : index
    %c0_97 = arith.constant 0 : index
    %82 = vector.load %arg5[%c0_96, %c0_97] : memref<1x16xf32, #tpu.memory_space<vmem>>, vector<1x16xf32>
    %83 = vector.broadcast %82 : vector<1x16xf32> to vector<64x16xf32>
    %84 = arith.addf %81, %83 : vector<64x16xf32>
    %85 = vector.shape_cast %84 : vector<64x16xf32> to vector<8x8x16xf32>
    %cst_98 = arith.constant dense<0.000000e+00> : vector<16xf32>
    %86 = vector.multi_reduction <add>, %85, %cst_98 [0, 1] : vector<8x8x16xf32> to vector<16xf32>
    %87 = vector.shape_cast %86 : vector<16xf32> to vector<1x1x16xf32>
    %cst_99 = arith.constant 6.400000e+01 : f32
    %88 = vector.broadcast %cst_99 : f32 to vector<1x1x16xf32>
    %89 = arith.divf %87, %88 : vector<1x1x16xf32>
    %90 = vector.broadcast %89 : vector<1x1x16xf32> to vector<8x8x16xf32>
    %91 = arith.subf %85, %90 : vector<8x8x16xf32>
    %92 = arith.mulf %91, %91 : vector<8x8x16xf32>
    %cst_100 = arith.constant dense<0.000000e+00> : vector<16xf32>
    %93 = vector.multi_reduction <add>, %92, %cst_100 [0, 1] : vector<8x8x16xf32> to vector<16xf32>
    %94 = vector.shape_cast %93 : vector<16xf32> to vector<1x1x16xf32>
    %cst_101 = arith.constant 6.400000e+01 : f32
    %95 = vector.broadcast %cst_101 : f32 to vector<1x1x16xf32>
    %96 = arith.divf %94, %95 : vector<1x1x16xf32>
    %97 = vector.broadcast %89 : vector<1x1x16xf32> to vector<8x8x16xf32>
    %98 = arith.subf %85, %97 : vector<8x8x16xf32>
    %cst_102 = arith.constant 9.99999974E-6 : f32
    %99 = vector.broadcast %cst_102 : f32 to vector<1x1x16xf32>
    %100 = arith.addf %96, %99 : vector<1x1x16xf32>
    %101 = math.rsqrt %100 : vector<1x1x16xf32>
    %102 = vector.broadcast %101 : vector<1x1x16xf32> to vector<8x8x16xf32>
    %103 = arith.mulf %98, %102 : vector<8x8x16xf32>
    %cst_103 = arith.constant 0.000000e+00 : f32
    %104 = vector.broadcast %cst_103 : f32 to vector<8x8x16xf32>
    %105 = arith.cmpf ogt, %103, %104 : vector<8x8x16xf32>
    %cst_104 = arith.constant 2.000000e-01 : f32
    %106 = vector.broadcast %cst_104 : f32 to vector<8x8x16xf32>
    %107 = arith.mulf %106, %103 : vector<8x8x16xf32>
    %108 = arith.select %105, %103, %107 : vector<8x8x16xi1>, vector<8x8x16xf32>
    %c1_105 = arith.constant 1 : index
    %c8_106 = arith.constant 8 : index
    %c0_107 = arith.constant 0 : index
    %109 = vector.load %arg15[%c1_105, %c8_106, %c0_107] : memref<10x32x16xf32, #tpu.memory_space<vmem>>, vector<8x8x16xf32>
    tpu.vector_store %arg15[%c1_105, %c8_106, %c0_107], %108 {strides = array<i32>} : memref<10x32x16xf32, #tpu.memory_space<vmem>>, vector<8x8x16xf32>,
    %c0_108 = arith.constant 0 : index
    %c7_109 = arith.constant 7 : index
    %c0_110 = arith.constant 0 : index
    %110 = tpu.strided_load %arg15[%c0_108, %c7_109, %c0_110] {strides = array<i32: 1, 2, 1>} : memref<10x32x16xf32, #tpu.memory_space<vmem>>, vector<10x8x16xf32>
    %111 = arith.truncf %110 : vector<10x8x16xf32> to vector<10x8x16xbf16>
    %c0_111 = arith.constant 0 : index
    %c8_112 = arith.constant 8 : index
    %c0_113 = arith.constant 0 : index
    %112 = tpu.strided_load %arg15[%c0_111, %c8_112, %c0_113] {strides = array<i32: 1, 2, 1>} : memref<10x32x16xf32, #tpu.memory_space<vmem>>, vector<10x8x16xf32>
    %113 = arith.truncf %112 : vector<10x8x16xf32> to vector<10x8x16xbf16>
    %c0_114 = arith.constant 0 : index
    %c9_115 = arith.constant 9 : index
    %c0_116 = arith.constant 0 : index
    %114 = tpu.strided_load %arg15[%c0_114, %c9_115, %c0_116] {strides = array<i32: 1, 2, 1>} : memref<10x32x16xf32, #tpu.memory_space<vmem>>, vector<10x8x16xf32>
    %115 = arith.truncf %114 : vector<10x8x16xf32> to vector<10x8x16xbf16>
    %c0_117 = arith.constant 0 : index
    %c10_118 = arith.constant 10 : index
    %c0_119 = arith.constant 0 : index
    %116 = tpu.strided_load %arg15[%c0_117, %c10_118, %c0_119] {strides = array<i32: 1, 2, 1>} : memref<10x32x16xf32, #tpu.memory_space<vmem>>, vector<10x8x16xf32>
    %117 = arith.truncf %116 : vector<10x8x16xf32> to vector<10x8x16xbf16>
    %118 = tpu.concatenate %111, %113, %115, %117 in 2 : vector<10x8x16xbf16>, vector<10x8x16xbf16>, vector<10x8x16xbf16>, vector<10x8x16xbf16> -> vector<10x8x64xbf16>
    %119 = vector.shape_cast %118 : vector<10x8x64xbf16> to vector<5x2x8x64xbf16>
    %120 = vector.extract_strided_slice %119 {offsets = [0, 0, 0, 0], sizes = [5, 1, 8, 64], strides = [1, 1, 1, 1]} : vector<5x2x8x64xbf16> to vector<5x1x8x64xbf16>
    %121 = vector.shape_cast %120 : vector<5x1x8x64xbf16> to vector<5x8x64xbf16>
    %122 = vector.extract_strided_slice %119 {offsets = [0, 1, 0, 0], sizes = [5, 1, 8, 64], strides = [1, 1, 1, 1]} : vector<5x2x8x64xbf16> to vector<5x1x8x64xbf16>
    %123 = vector.shape_cast %122 : vector<5x1x8x64xbf16> to vector<5x8x64xbf16>
    %124 = vector.extract_strided_slice %121 {offsets = [0, 0, 0], sizes = [4, 8, 64], strides = [1, 1, 1]} : vector<5x8x64xbf16> to vector<4x8x64xbf16>
    %125 = vector.extract_strided_slice %123 {offsets = [0, 0, 0], sizes = [4, 8, 64], strides = [1, 1, 1]} : vector<5x8x64xbf16> to vector<4x8x64xbf16>
    %126 = vector.extract_strided_slice %121 {offsets = [1, 0, 0], sizes = [4, 8, 64], strides = [1, 1, 1]} : vector<5x8x64xbf16> to vector<4x8x64xbf16>
    %127 = vector.extract_strided_slice %123 {offsets = [1, 0, 0], sizes = [4, 8, 64], strides = [1, 1, 1]} : vector<5x8x64xbf16> to vector<4x8x64xbf16>
    %128 = tpu.concatenate %124, %125, %126, %127 in 2 : vector<4x8x64xbf16>, vector<4x8x64xbf16>, vector<4x8x64xbf16>, vector<4x8x64xbf16> -> vector<4x8x256xbf16>
    %129 = vector.shape_cast %128 : vector<4x8x256xbf16> to vector<32x256xbf16>
    %c0_120 = arith.constant 0 : index
    %c0_121 = arith.constant 0 : index
    %130 = vector.load %arg6[%c0_120, %c0_121] : memref<256x32xbf16, #tpu.memory_space<vmem>>, vector<256x32xbf16>
    %cst_122 = arith.constant dense<0.000000e+00> : vector<32x32xf32>
    %131 = tpu.matmul %129, %130, %cst_122 {dimension_numbers = #tpu.dot_dimension_numbers<[1], [0], [0], [1], [0, 0, 1, 1], [], []>} : vector<32x256xbf16>, vector<256x32xbf16>, vector<32x32xf32> -> vector<32x32xf32>
    %c0_123 = arith.constant 0 : index
    %c0_124 = arith.constant 0 : index
    %132 = vector.load %arg7[%c0_123, %c0_124] : memref<1x32xf32, #tpu.memory_space<vmem>>, vector<1x32xf32>
    %133 = vector.broadcast %132 : vector<1x32xf32> to vector<32x32xf32>
    %134 = arith.addf %131, %133 : vector<32x32xf32>
    %135 = vector.shape_cast %134 : vector<32x32xf32> to vector<4x8x32xf32>
    %136 = vector.extract_strided_slice %135 {offsets = [0, 0, 0], sizes = [4, 4, 32], strides = [1, 1, 1]} : vector<4x8x32xf32> to vector<4x4x32xf32>
    %cst_125 = arith.constant dense<0.000000e+00> : vector<32xf32>
    %137 = vector.multi_reduction <add>, %136, %cst_125 [0, 1] : vector<4x4x32xf32> to vector<32xf32>
    %138 = vector.shape_cast %137 : vector<32xf32> to vector<1x1x32xf32>
    %cst_126 = arith.constant 1.600000e+01 : f32
    %139 = vector.broadcast %cst_126 : f32 to vector<1x1x32xf32>
    %140 = arith.divf %138, %139 : vector<1x1x32xf32>
    %141 = vector.broadcast %140 : vector<1x1x32xf32> to vector<4x4x32xf32>
    %142 = arith.subf %136, %141 : vector<4x4x32xf32>
    %143 = arith.mulf %142, %142 : vector<4x4x32xf32>
    %cst_127 = arith.constant dense<0.000000e+00> : vector<32xf32>
    %144 = vector.multi_reduction <add>, %143, %cst_127 [0, 1] : vector<4x4x32xf32> to vector<32xf32>
    %145 = vector.shape_cast %144 : vector<32xf32> to vector<1x1x32xf32>
    %cst_128 = arith.constant 1.600000e+01 : f32
    %146 = vector.broadcast %cst_128 : f32 to vector<1x1x32xf32>
    %147 = arith.divf %145, %146 : vector<1x1x32xf32>
    %148 = vector.broadcast %140 : vector<1x1x32xf32> to vector<4x4x32xf32>
    %149 = arith.subf %136, %148 : vector<4x4x32xf32>
    %cst_129 = arith.constant 9.99999974E-6 : f32
    %150 = vector.broadcast %cst_129 : f32 to vector<1x1x32xf32>
    %151 = arith.addf %147, %150 : vector<1x1x32xf32>
    %152 = math.rsqrt %151 : vector<1x1x32xf32>
    %153 = vector.broadcast %152 : vector<1x1x32xf32> to vector<4x4x32xf32>
    %154 = arith.mulf %149, %153 : vector<4x4x32xf32>
    %cst_130 = arith.constant 0.000000e+00 : f32
    %155 = vector.broadcast %cst_130 : f32 to vector<4x4x32xf32>
    %156 = arith.cmpf ogt, %154, %155 : vector<4x4x32xf32>
    %cst_131 = arith.constant 2.000000e-01 : f32
    %157 = vector.broadcast %cst_131 : f32 to vector<4x4x32xf32>
    %158 = arith.mulf %157, %154 : vector<4x4x32xf32>
    %159 = arith.select %156, %154, %158 : vector<4x4x32xi1>, vector<4x4x32xf32>
    %160 = arith.truncf %159 : vector<4x4x32xf32> to vector<4x4x32xbf16>
    %c1_132 = arith.constant 1 : index
    %c8_133 = arith.constant 8 : index
    %c0_134 = arith.constant 0 : index
    %161 = vector.load %arg16[%c1_132, %c8_133, %c0_134] : memref<6x24x32xbf16, #tpu.memory_space<vmem>>, vector<4x4x32xbf16>
    tpu.vector_store %arg16[%c1_132, %c8_133, %c0_134], %160 {strides = array<i32>} : memref<6x24x32xbf16, #tpu.memory_space<vmem>>, vector<4x4x32xbf16>,
    %c0_135 = arith.constant 0 : index
    %c7_136 = arith.constant 7 : index
    %c0_137 = arith.constant 0 : index
    %162 = vector.load %arg16[%c0_135, %c7_136, %c0_137] : memref<6x24x32xbf16, #tpu.memory_space<vmem>>, vector<6x8x32xbf16>
    %c0_138 = arith.constant 0 : index
    %c8_139 = arith.constant 8 : index
    %c0_140 = arith.constant 0 : index
    %163 = vector.load %arg16[%c0_138, %c8_139, %c0_140] : memref<6x24x32xbf16, #tpu.memory_space<vmem>>, vector<6x8x32xbf16>
    %c0_141 = arith.constant 0 : index
    %c9_142 = arith.constant 9 : index
    %c0_143 = arith.constant 0 : index
    %164 = vector.load %arg16[%c0_141, %c9_142, %c0_143] : memref<6x24x32xbf16, #tpu.memory_space<vmem>>, vector<6x8x32xbf16>
    %c0_144 = arith.constant 0 : index
    %c10_145 = arith.constant 10 : index
    %c0_146 = arith.constant 0 : index
    %165 = vector.load %arg16[%c0_144, %c10_145, %c0_146] : memref<6x24x32xbf16, #tpu.memory_space<vmem>>, vector<6x8x32xbf16>
    %166 = tpu.concatenate %162, %163, %164, %165 in 2 : vector<6x8x32xbf16>, vector<6x8x32xbf16>, vector<6x8x32xbf16>, vector<6x8x32xbf16> -> vector<6x8x128xbf16>
    %167 = vector.extract_strided_slice %166 {offsets = [0, 0, 0], sizes = [3, 8, 128], strides = [1, 1, 1]} : vector<6x8x128xbf16> to vector<3x8x128xbf16>
    %168 = vector.extract_strided_slice %166 {offsets = [1, 0, 0], sizes = [3, 8, 128], strides = [1, 1, 1]} : vector<6x8x128xbf16> to vector<3x8x128xbf16>
    %169 = vector.extract_strided_slice %166 {offsets = [2, 0, 0], sizes = [3, 8, 128], strides = [1, 1, 1]} : vector<6x8x128xbf16> to vector<3x8x128xbf16>
    %170 = vector.extract_strided_slice %166 {offsets = [3, 0, 0], sizes = [3, 8, 128], strides = [1, 1, 1]} : vector<6x8x128xbf16> to vector<3x8x128xbf16>
    %171 = tpu.concatenate %167, %168, %169, %170 in 2 : vector<3x8x128xbf16>, vector<3x8x128xbf16>, vector<3x8x128xbf16>, vector<3x8x128xbf16> -> vector<3x8x512xbf16>
    %172 = vector.shape_cast %171 : vector<3x8x512xbf16> to vector<24x512xbf16>
    %c0_147 = arith.constant 0 : index
    %c0_148 = arith.constant 0 : index
    %173 = vector.load %arg8[%c0_147, %c0_148] : memref<512x64xbf16, #tpu.memory_space<vmem>>, vector<512x64xbf16>
    %cst_149 = arith.constant dense<0.000000e+00> : vector<24x64xf32>
    %174 = tpu.matmul %172, %173, %cst_149 {dimension_numbers = #tpu.dot_dimension_numbers<[1], [0], [0], [1], [0, 0, 1, 1], [], []>} : vector<24x512xbf16>, vector<512x64xbf16>, vector<24x64xf32> -> vector<24x64xf32>
    %c0_150 = arith.constant 0 : index
    %c0_151 = arith.constant 0 : index
    %175 = vector.load %arg9[%c0_150, %c0_151] : memref<1x64xf32, #tpu.memory_space<vmem>>, vector<1x64xf32>
    %176 = vector.broadcast %175 : vector<1x64xf32> to vector<24x64xf32>
    %177 = arith.addf %174, %176 : vector<24x64xf32>
    %178 = vector.shape_cast %177 : vector<24x64xf32> to vector<3x8x64xf32>
    %179 = vector.extract_strided_slice %178 {offsets = [0, 0, 0], sizes = [3, 3, 64], strides = [1, 1, 1]} : vector<3x8x64xf32> to vector<3x3x64xf32>
    %cst_152 = arith.constant dense<0.000000e+00> : vector<64xf32>
    %180 = vector.multi_reduction <add>, %179, %cst_152 [0, 1] : vector<3x3x64xf32> to vector<64xf32>
    %181 = vector.shape_cast %180 : vector<64xf32> to vector<1x1x64xf32>
    %cst_153 = arith.constant 9.000000e+00 : f32
    %182 = vector.broadcast %cst_153 : f32 to vector<1x1x64xf32>
    %183 = arith.divf %181, %182 : vector<1x1x64xf32>
    %184 = vector.broadcast %183 : vector<1x1x64xf32> to vector<3x3x64xf32>
    %185 = arith.subf %179, %184 : vector<3x3x64xf32>
    %186 = arith.mulf %185, %185 : vector<3x3x64xf32>
    %cst_154 = arith.constant dense<0.000000e+00> : vector<64xf32>
    %187 = vector.multi_reduction <add>, %186, %cst_154 [0, 1] : vector<3x3x64xf32> to vector<64xf32>
    %188 = vector.shape_cast %187 : vector<64xf32> to vector<1x1x64xf32>
    %cst_155 = arith.constant 9.000000e+00 : f32
    %189 = vector.broadcast %cst_155 : f32 to vector<1x1x64xf32>
    %190 = arith.divf %188, %189 : vector<1x1x64xf32>
    %191 = vector.broadcast %183 : vector<1x1x64xf32> to vector<3x3x64xf32>
    %192 = arith.subf %179, %191 : vector<3x3x64xf32>
    %cst_156 = arith.constant 9.99999974E-6 : f32
    %193 = vector.broadcast %cst_156 : f32 to vector<1x1x64xf32>
    %194 = arith.addf %190, %193 : vector<1x1x64xf32>
    %195 = math.rsqrt %194 : vector<1x1x64xf32>
    %196 = vector.broadcast %195 : vector<1x1x64xf32> to vector<3x3x64xf32>
    %197 = arith.mulf %192, %196 : vector<3x3x64xf32>
    %cst_157 = arith.constant 0.000000e+00 : f32
    %198 = vector.broadcast %cst_157 : f32 to vector<3x3x64xf32>
    %199 = arith.cmpf ogt, %197, %198 : vector<3x3x64xf32>
    %cst_158 = arith.constant 2.000000e-01 : f32
    %200 = vector.broadcast %cst_158 : f32 to vector<3x3x64xf32>
    %201 = arith.mulf %200, %197 : vector<3x3x64xf32>
    %202 = arith.select %199, %197, %201 : vector<3x3x64xi1>, vector<3x3x64xf32>
    %203 = arith.truncf %202 : vector<3x3x64xf32> to vector<3x3x64xbf16>
    %c1_159 = arith.constant 1 : index
    %c8_160 = arith.constant 8 : index
    %c0_161 = arith.constant 0 : index
    %204 = vector.load %arg17[%c1_159, %c8_160, %c0_161] : memref<5x24x64xbf16, #tpu.memory_space<vmem>>, vector<3x3x64xbf16>
    tpu.vector_store %arg17[%c1_159, %c8_160, %c0_161], %203 {strides = array<i32>} : memref<5x24x64xbf16, #tpu.memory_space<vmem>>, vector<3x3x64xbf16>,
    %c0_162 = arith.constant 0 : index
    %c7_163 = arith.constant 7 : index
    %c0_164 = arith.constant 0 : index
    %205 = vector.load %arg17[%c0_162, %c7_163, %c0_164] : memref<5x24x64xbf16, #tpu.memory_space<vmem>>, vector<5x8x64xbf16>
    %c0_165 = arith.constant 0 : index
    %c8_166 = arith.constant 8 : index
    %c0_167 = arith.constant 0 : index
    %206 = vector.load %arg17[%c0_165, %c8_166, %c0_167] : memref<5x24x64xbf16, #tpu.memory_space<vmem>>, vector<5x8x64xbf16>
    %c0_168 = arith.constant 0 : index
    %c9_169 = arith.constant 9 : index
    %c0_170 = arith.constant 0 : index
    %207 = vector.load %arg17[%c0_168, %c9_169, %c0_170] : memref<5x24x64xbf16, #tpu.memory_space<vmem>>, vector<5x8x64xbf16>
    %c0_171 = arith.constant 0 : index
    %c10_172 = arith.constant 10 : index
    %c0_173 = arith.constant 0 : index
    %208 = vector.load %arg17[%c0_171, %c10_172, %c0_173] : memref<5x24x64xbf16, #tpu.memory_space<vmem>>, vector<5x8x64xbf16>
    %209 = tpu.concatenate %205, %206, %207, %208 in 2 : vector<5x8x64xbf16>, vector<5x8x64xbf16>, vector<5x8x64xbf16>, vector<5x8x64xbf16> -> vector<5x8x256xbf16>
    %210 = vector.extract_strided_slice %209 {offsets = [0, 0, 0], sizes = [2, 8, 256], strides = [1, 1, 1]} : vector<5x8x256xbf16> to vector<2x8x256xbf16>
    %211 = vector.extract_strided_slice %209 {offsets = [1, 0, 0], sizes = [2, 8, 256], strides = [1, 1, 1]} : vector<5x8x256xbf16> to vector<2x8x256xbf16>
    %212 = vector.extract_strided_slice %209 {offsets = [2, 0, 0], sizes = [2, 8, 256], strides = [1, 1, 1]} : vector<5x8x256xbf16> to vector<2x8x256xbf16>
    %213 = vector.extract_strided_slice %209 {offsets = [3, 0, 0], sizes = [2, 8, 256], strides = [1, 1, 1]} : vector<5x8x256xbf16> to vector<2x8x256xbf16>
    %214 = tpu.concatenate %210, %211, %212, %213 in 2 : vector<2x8x256xbf16>, vector<2x8x256xbf16>, vector<2x8x256xbf16>, vector<2x8x256xbf16> -> vector<2x8x1024xbf16>
    %215 = vector.shape_cast %214 : vector<2x8x1024xbf16> to vector<16x1024xbf16>
    %c0_174 = arith.constant 0 : index
    %c0_175 = arith.constant 0 : index
    %216 = vector.load %arg10[%c0_174, %c0_175] : memref<1024x8xbf16, #tpu.memory_space<vmem>>, vector<1024x8xbf16>
    %cst_176 = arith.constant dense<0.000000e+00> : vector<16x8xf32>
    %217 = tpu.matmul %215, %216, %cst_176 {dimension_numbers = #tpu.dot_dimension_numbers<[1], [0], [0], [1], [0, 0, 1, 1], [], []>} : vector<16x1024xbf16>, vector<1024x8xbf16>, vector<16x8xf32> -> vector<16x8xf32>
    %c0_177 = arith.constant 0 : index
    %c0_178 = arith.constant 0 : index
    %218 = vector.load %arg11[%c0_177, %c0_178] : memref<1x8xf32, #tpu.memory_space<vmem>>, vector<1x8xf32>
    %219 = vector.broadcast %218 : vector<1x8xf32> to vector<16x8xf32>
    %220 = arith.addf %217, %219 : vector<16x8xf32>
    %221 = vector.shape_cast %220 : vector<16x8xf32> to vector<2x8x8xf32>
    %222 = vector.extract_strided_slice %221 {offsets = [0, 0, 0], sizes = [2, 2, 1], strides = [1, 1, 1]} : vector<2x8x8xf32> to vector<2x2x1xf32>
    %cst_179 = arith.constant 0.000000e+00 : f32
    %223 = vector.broadcast %cst_179 : f32 to vector<2x2x1xf32>
    %224 = arith.cmpf ogt, %222, %223 : vector<2x2x1xf32>
    %cst_180 = arith.constant 2.000000e-01 : f32
    %225 = vector.broadcast %cst_180 : f32 to vector<2x2x1xf32>
    %226 = arith.mulf %225, %222 : vector<2x2x1xf32>
    %227 = arith.select %224, %222, %226 : vector<2x2x1xi1>, vector<2x2x1xf32>
    %cst_181 = arith.constant 0.000000e+00 : f32
    %228 = vector.broadcast %cst_181 : f32 to vector<2x2x1xf32>
    %229 = arith.subf %228, %227 : vector<2x2x1xf32>
    %230 = math.exp %229 : vector<2x2x1xf32>
    %cst_182 = arith.constant 1.000000e+00 : f32
    %231 = vector.broadcast %cst_182 : f32 to vector<2x2x1xf32>
    %232 = arith.addf %231, %230 : vector<2x2x1xf32>
    %cst_183 = arith.constant 1.000000e+00 : f32
    %233 = vector.broadcast %cst_183 : f32 to vector<2x2x1xf32>
    %234 = arith.divf %233, %232 : vector<2x2x1xf32>
    %c0_184 = arith.constant 0 : index
    %c0_185 = arith.constant 0 : index
    %c0_186 = arith.constant 0 : index
    %c0_187 = arith.constant 0 : index
    %235 = vector.load %arg12[%c0_184, %c0_185, %c0_186, %c0_187] : memref<1x2x2x1xf32, #tpu.memory_space<vmem>>, vector<1x2x2x1xf32>
    %236 = vector.shape_cast %235 : vector<1x2x2x1xf32> to vector<2x2x1xf32>
    %237 = vector.shape_cast %234 : vector<2x2x1xf32> to vector<1x2x2x1xf32>
    tpu.vector_store %arg12[%c0_184, %c0_185, %c0_186, %c0_187], %237 {strides = array<i32>} : memref<1x2x2x1xf32, #tpu.memory_space<vmem>>, vector<1x2x2x1xf32>,
    return
  }
  func.func @transform_0(%arg0: i32) -> (i32, i32, i32, i32) {
    %c0_i32 = arith.constant 0 : i32
    %c0_i32_0 = arith.constant 0 : i32
    %c0_i32_1 = arith.constant 0 : i32
    %c0_i32_2 = arith.constant 0 : i32
    return %arg0, %c0_i32, %c0_i32_0, %c0_i32_1 : i32, i32, i32, i32
  }
  func.func @transform_1(%arg0: i32) -> (i32, i32) {
    %c0_i32 = arith.constant 0 : i32
    %c0_i32_0 = arith.constant 0 : i32
    %c0_i32_1 = arith.constant 0 : i32
    return %c0_i32, %c0_i32_0 : i32, i32
  }
  func.func @transform_2(%arg0: i32) -> (i32, i32) {
    %c0_i32 = arith.constant 0 : i32
    %c0_i32_0 = arith.constant 0 : i32
    %c0_i32_1 = arith.constant 0 : i32
    return %c0_i32, %c0_i32_0 : i32, i32
  }
  func.func @transform_3(%arg0: i32) -> (i32, i32) {
    %c0_i32 = arith.constant 0 : i32
    %c0_i32_0 = arith.constant 0 : i32
    %c0_i32_1 = arith.constant 0 : i32
    return %c0_i32, %c0_i32_0 : i32, i32
  }
  func.func @transform_4(%arg0: i32) -> (i32, i32) {
    %c0_i32 = arith.constant 0 : i32
    %c0_i32_0 = arith.constant 0 : i32
    %c0_i32_1 = arith.constant 0 : i32
    return %c0_i32, %c0_i32_0 : i32, i32
  }
  func.func @transform_5(%arg0: i32) -> (i32, i32) {
    %c0_i32 = arith.constant 0 : i32
    %c0_i32_0 = arith.constant 0 : i32
    %c0_i32_1 = arith.constant 0 : i32
    return %c0_i32, %c0_i32_0 : i32, i32
  }
  func.func @transform_6(%arg0: i32) -> (i32, i32) {
    %c0_i32 = arith.constant 0 : i32
    %c0_i32_0 = arith.constant 0 : i32
    %c0_i32_1 = arith.constant 0 : i32
    return %c0_i32, %c0_i32_0 : i32, i32
  }
  func.func @transform_7(%arg0: i32) -> (i32, i32) {
    %c0_i32 = arith.constant 0 : i32
    %c0_i32_0 = arith.constant 0 : i32
    %c0_i32_1 = arith.constant 0 : i32
    return %c0_i32, %c0_i32_0 : i32, i32
  }
  func.func @transform_8(%arg0: i32) -> (i32, i32) {
    %c0_i32 = arith.constant 0 : i32
    %c0_i32_0 = arith.constant 0 : i32
    %c0_i32_1 = arith.constant 0 : i32
    return %c0_i32, %c0_i32_0 : i32, i32
  }
  func.func @transform_9(%arg0: i32) -> (i32, i32) {
    %c0_i32 = arith.constant 0 : i32
    %c0_i32_0 = arith.constant 0 : i32
    %c0_i32_1 = arith.constant 0 : i32
    return %c0_i32, %c0_i32_0 : i32, i32
  }
  func.func @transform_10(%arg0: i32) -> (i32, i32) {
    %c0_i32 = arith.constant 0 : i32
    %c0_i32_0 = arith.constant 0 : i32
    %c0_i32_1 = arith.constant 0 : i32
    return %c0_i32, %c0_i32_0 : i32, i32
  }
  func.func @transform_11(%arg0: i32) -> (i32, i32, i32, i32) {
    %c0_i32 = arith.constant 0 : i32
    %c0_i32_0 = arith.constant 0 : i32
    %c0_i32_1 = arith.constant 0 : i32
    %c0_i32_2 = arith.constant 0 : i32
    return %arg0, %c0_i32, %c0_i32_0, %c0_i32_1 : i32, i32, i32, i32
  }
}

</mosaic_0001>

<bundles_post_ra>
// kernel: discriminator_forward.1
= control target key start
LH: loop header
LB: loop body
LE: loop exit
PB: predicated region body
PF: predicated region fallthrough
CT: control target
= control target key end

     0   :  { %s6817_s17 = smov 0   ;;  %s9027_s0 = inlined_call_operand.vmem [shape: f32[2,32,32,6], index: 0, kind: input, shape index: {}]   ;;  %s9028_s1 = inlined_call_operand.vmem [shape: bf16[96,8], index: 1, kind: input, shape index: {}]   ;;  %s9029_s2 = inlined_call_operand.vmem [shape: f32[1,8], index: 2, kind: input, shape index: {}]   ;;  %s9030_s3 = inlined_call_operand.vmem [shape: bf16[128,16], index: 3, kind: input, shape index: {}]   ;;  %s9031_s4 = inlined_call_operand.vmem [shape: f32[1,16], index: 4, kind: input, shape index: {}]   ;;  %s9032_s5 = inlined_call_operand.vmem [shape: bf16[256,32], index: 5, kind: input, shape index: {}]   ;;  %s9033_s6 = inlined_call_operand.vmem [shape: f32[1,32], index: 6, kind: input, shape index: {}]   ;;  %s9034_s7 = inlined_call_operand.vmem [shape: bf16[512,64], index: 7, kind: input, shape index: {}]   ;;  %s9035_s8 = inlined_call_operand.vmem [shape: f32[1,64], index: 8, kind: input, shape index: {}]   ;;  %s9036_s9 = inlined_call_operand.vmem [shape: bf16[1024,8], index: 9, kind: input, shape index: {}]   ;;  %s9037_s10 = inlined_call_operand.vmem [shape: f32[1,8], index: 10, kind: input, shape index: {}]   ;;  %s9038_s11 = inlined_call_operand.vmem [shape: f32[2,2,2,1], index: 11, kind: output, shape index: {}]  }
   0x1 LB: > { %s6014_s18 = sadd.s32 4294967295, %s6742_s17   ;;  %p6018_p0 = scmp.ge.s32.totalorder %s6742_s17, 1  ;;  %s6742_s17 = sphi %s6817_s17, %s21_s17  }
   0x2   : > { %p337_p1 = scmp.lt.s32.totalorder %s6742_s17, 3 }
   0x4   : > { %p338_p2 = pnand %p6018_p0, %p337_p1 }
   0x5   : > { %p6827_p3 = scmp.lt.s32.totalorder (!%p338_p2), %s6014_s18, 1  ;;  %vm388_vm0 = vcmask (!%p338_p2), 48128   ;;  %vm402_vm1 = vcmask (!%p338_p2), 40960   ;;  %v6744_v0 = vmov (!%p338_p2), 0.0   ;;  %s6745_s24 = smov (!%p338_p2), 6   ;;  %vm1987_vm2 = vcmask (!%p338_p2), 97280  }
   0x6   : > { %341 = sbr.rel (%p338_p2) target bundleno = 2700 (0xa8c), region = 64  ;;  %438 = vst.msk [vmem:[#allocation2 + $0x58] sm:$0x1] (!%p338_p2), %vm402_vm1, %v6744_v0  ;;  %404 = vst.msk [vmem:[#allocation2 + $0x37] sm:$0x1] (!%p338_p2), %vm402_vm1, %v6744_v0  ;;  %s6746_s25 = smov (!%p338_p2), 12  }
   0x7   : > { %389 = vst.msk [vmem:[#allocation2] sm:$0xff] (!%p338_p2), %vm388_vm0, %v6744_v0  ;;  %390 = vst.msk [vmem:[#allocation2 + $0x8] sm:$0xff] (!%p338_p2), %vm388_vm0, %v6744_v0  ;;  %s6747_s26 = smov (!%p338_p2), 18   ;;  %vm2056_vm3 = vcmask (!%p338_p2), 146432   ;;  %s6748_s22 = smov (!%p338_p2), 24   ;;  %vm471_vm4 = vcmask (!%p338_p2), 64512  }
   0x8   : > { %391 = vst.msk [vmem:[#allocation2 + $0x10] sm:$0xff] (!%p338_p2), %vm388_vm0, %v6744_v0  ;;  %392 = vst.msk [vmem:[#allocation2 + $0x18] sm:$0xff] (!%p338_p2), %vm388_vm0, %v6744_v0  ;;  %vm2254_vm5 = vcmask (!%p338_p2), 195584   ;;  %vm2287_vm6 = vcmask (!%p338_p2), 392192   ;;  %vm2320_vm7 = vcmask (!%p338_p2), 588800   ;;  %vm2408_vm8 = vcmask (!%p338_p2), 785408  }
   0x9   : > { %393 = vst.msk [vmem:[#allocation2 + $0x20] sm:$0xff] (!%p338_p2), %vm388_vm0, %v6744_v0  ;;  %394 = vst.msk [vmem:[#allocation2 + $0x28] sm:$0xff] (!%p338_p2), %vm388_vm0, %v6744_v0  ;;  %vm481_vm9 = vcmask (!%p338_p2), 57344   ;;  %vm518_vm10 = vcmask (!%p338_p2), 130048   ;;  %s6753_s29 = smov (!%p338_p2), 64   ;;  %s6754_s30 = smov (!%p338_p2), 32  }
   0xa   : > { %396 = vst.msk [vmem:[#allocation2 + $0x630] sm:$0xff] (!%p338_p2), %vm388_vm0, %v6744_v0  ;;  %397 = vst.msk [vmem:[#allocation2 + $0x638] sm:$0xff] (!%p338_p2), %vm388_vm0, %v6744_v0  ;;  %s6755_s16 = smov (!%p338_p2), 96   ;;  %vm3204_vm11 = vcmask (!%p338_p2), 261120   ;;  %vm3221_vm12 = vcmask (!%p338_p2), 523264   ;;  %vm528_vm13 = vcmask (!%p338_p2), 122880  }
   0xb   : > { %398 = vst.msk [vmem:[#allocation2 + $0x640] sm:$0xff] (!%p338_p2), %vm388_vm0, %v6744_v0  ;;  %399 = vst.msk [vmem:[#allocation2 + $0x648] sm:$0xff] (!%p338_p2), %vm388_vm0, %v6744_v0 }
   0xc   : > { %400 = vst.msk [vmem:[#allocation2 + $0x650] sm:$0xff] (!%p338_p2), %vm388_vm0, %v6744_v0  ;;  %401 = vst.msk [vmem:[#allocation2 + $0x658] sm:$0xff] (!%p338_p2), %vm388_vm0, %v6744_v0 }
   0xd   : > { %405 = vst.msk [vmem:[#allocation2 + $0x67] sm:$0x1] %vm402_vm1, %v6744_v0  ;;  %406 = vst.msk [vmem:[#allocation2 + $0x97] sm:$0x1] %vm402_vm1, %v6744_v0  ;;  %s9051_s18 = smov (!%p6827_p3, %s6014_s18), 1 }
   0xe   : > { %407 = vst.msk [vmem:[#allocation2 + $0xc7] sm:$0x1] %vm402_vm1, %v6744_v0  ;;  %408 = vst.msk [vmem:[#allocation2 + $0xf7] sm:$0x1] %vm402_vm1, %v6744_v0  ;;  %s6270_s20 = sshll.u32 %s9051_s18, 10 }
   0xf   : > { %409 = vst.msk [vmem:[#allocation2 + $0x127] sm:$0x1] %vm402_vm1, %v6744_v0  ;;  %410 = vst.msk [vmem:[#allocation2 + $0x157] sm:$0x1] %vm402_vm1, %v6744_v0  ;;  %s7001_s23 = scalar_lea.vmem %s9027_s0, %s6270_s20 }
  0x10   : > { %411 = vst.msk [vmem:[#allocation2 + $0x187] sm:$0x1] %vm402_vm1, %v6744_v0  ;;  %412 = vst.msk [vmem:[#allocation2 + $0x1b7] sm:$0x1] %vm402_vm1, %v6744_v0  ;;  %v650_v1 = vld [vmem:[%s7001_s23 + $0x40] sm:$0xff]  ;;  %v651_v2 = vld [vmem:[%s7001_s23 + $0x48] sm:$0xff] }
  0x11   : > { %413 = vst.msk [vmem:[#allocation2 + $0x1e7] sm:$0x1] %vm402_vm1, %v6744_v0  ;;  %414 = vst.msk [vmem:[#allocation2 + $0x217] sm:$0x1] %vm402_vm1, %v6744_v0  ;;  %v652_v3 = vld [vmem:[%s7001_s23 + $0x50] sm:$0xff]  ;;  %v653_v4 = vld [vmem:[%s7001_s23 + $0x58] sm:$0xff] }
  0x12   : > { %415 = vst.msk [vmem:[#allocation2 + $0x247] sm:$0x1] %vm402_vm1, %v6744_v0  ;;  %416 = vst.msk [vmem:[#allocation2 + $0x277] sm:$0x1] %vm402_vm1, %v6744_v0  ;;  %v642_v5 = vld [vmem:[%s7001_s23] sm:$0xff]  ;;  %v643_v6 = vld [vmem:[%s7001_s23 + $0x8] sm:$0xff] }
  0x13   : > { %417 = vst.msk [vmem:[#allocation2 + $0x2a7] sm:$0x1] %vm402_vm1, %v6744_v0  ;;  %418 = vst.msk [vmem:[#allocation2 + $0x2d7] sm:$0x1] %vm402_vm1, %v6744_v0  ;;  %v644_v7 = vld [vmem:[%s7001_s23 + $0x10] sm:$0xff]  ;;  %v645_v8 = vld [vmem:[%s7001_s23 + $0x18] sm:$0xff] }
  0x14   : > { %419 = vst.msk [vmem:[#allocation2 + $0x307] sm:$0x1] %vm402_vm1, %v6744_v0  ;;  %420 = vst.msk [vmem:[#allocation2 + $0x337] sm:$0x1] %vm402_vm1, %v6744_v0  ;;  %v646_v9 = vld [vmem:[%s7001_s23 + $0x20] sm:$0xff]  ;;  %v647_v10 = vld [vmem:[%s7001_s23 + $0x28] sm:$0xff] }
  0x15   : > { %421 = vst.msk [vmem:[#allocation2 + $0x367] sm:$0x1] %vm402_vm1, %v6744_v0  ;;  %422 = vst.msk [vmem:[#allocation2 + $0x397] sm:$0x1] %vm402_vm1, %v6744_v0  ;;  %v648_v11 = vld [vmem:[%s7001_s23 + $0x30] sm:$0xff]  ;;  %v649_v12 = vld [vmem:[%s7001_s23 + $0x38] sm:$0xff] }
  0x16   : > { %423 = vst.msk [vmem:[#allocation2 + $0x3c7] sm:$0x1] %vm402_vm1, %v6744_v0  ;;  %424 = vst.msk [vmem:[#allocation2 + $0x3f7] sm:$0x1] %vm402_vm1, %v6744_v0  ;;  %v654_v13 = vld [vmem:[%s7001_s23 + $0x60] sm:$0xff]  ;;  %v655_v14 = vld [vmem:[%s7001_s23 + $0x68] sm:$0xff] }
  0x17   : > { %425 = vst.msk [vmem:[#allocation2 + $0x427] sm:$0x1] %vm402_vm1, %v6744_v0  ;;  %426 = vst.msk [vmem:[#allocation2 + $0x457] sm:$0x1] %vm402_vm1, %v6744_v0  ;;  %v656_v15 = vld [vmem:[%s7001_s23 + $0x70] sm:$0xff]  ;;  %v657_v16 = vld [vmem:[%s7001_s23 + $0x78] sm:$0xff] }
  0x18   : > { %427 = vst.msk [vmem:[#allocation2 + $0x487] sm:$0x1] %vm402_vm1, %v6744_v0  ;;  %428 = vst.msk [vmem:[#allocation2 + $0x4b7] sm:$0x1] %vm402_vm1, %v6744_v0  ;;  %v658_v17 = vld [vmem:[%s7001_s23 + $0x80] sm:$0xff]  ;;  %v659_v18 = vld [vmem:[%s7001_s23 + $0x88] sm:$0xff] }
  0x19   : > { %429 = vst.msk [vmem:[#allocation2 + $0x4e7] sm:$0x1] %vm402_vm1, %v6744_v0  ;;  %430 = vst.msk [vmem:[#allocation2 + $0x517] sm:$0x1] %vm402_vm1, %v6744_v0  ;;  %v660_v19 = vld [vmem:[%s7001_s23 + $0x90] sm:$0xff]  ;;  %v661_v20 = vld [vmem:[%s7001_s23 + $0x98] sm:$0xff] }
  0x1a   : > { %431 = vst.msk [vmem:[#allocation2 + $0x547] sm:$0x1] %vm402_vm1, %v6744_v0  ;;  %432 = vst.msk [vmem:[#allocation2 + $0x577] sm:$0x1] %vm402_vm1, %v6744_v0  ;;  %v662_v21 = vld [vmem:[%s7001_s23 + $0xa0] sm:$0xff]  ;;  %v663_v22 = vld [vmem:[%s7001_s23 + $0xa8] sm:$0xff] }
  0x1b   : > { %433 = vst.msk [vmem:[#allocation2 + $0x5a7] sm:$0x1] %vm402_vm1, %v6744_v0  ;;  %434 = vst.msk [vmem:[#allocation2 + $0x5d7] sm:$0x1] %vm402_vm1, %v6744_v0  ;;  %v664_v23 = vld [vmem:[%s7001_s23 + $0xb0] sm:$0xff]  ;;  %v665_v24 = vld [vmem:[%s7001_s23 + $0xb8] sm:$0xff] }
  0x1c   : > { %435 = vst.msk [vmem:[#allocation2 + $0x607] sm:$0x1] %vm402_vm1, %v6744_v0  ;;  %439 = vst.msk [vmem:[#allocation2 + $0x88] sm:$0x1] %vm402_vm1, %v6744_v0  ;;  %v670_v47 = vld [vmem:[%s7001_s23 + $0xe0] sm:$0xff]  ;;  %v671_v50 = vld [vmem:[%s7001_s23 + $0xe8] sm:$0xff] }
  0x1d   : > { %440 = vst.msk [vmem:[#allocation2 + $0xb8] sm:$0x1] %vm402_vm1, %v6744_v0  ;;  %441 = vst.msk [vmem:[#allocation2 + $0xe8] sm:$0x1] %vm402_vm1, %v6744_v0  ;;  %v672_v51 = vld [vmem:[%s7001_s23 + $0xf0] sm:$0xff]  ;;  %v673_v52 = vld [vmem:[%s7001_s23 + $0xf8] sm:$0xff] }
  0x1e   : > { %442 = vst.msk [vmem:[#allocation2 + $0x118] sm:$0x1] %vm402_vm1, %v6744_v0  ;;  %443 = vst.msk [vmem:[#allocation2 + $0x148] sm:$0x1] %vm402_vm1, %v6744_v0  ;;  %v666_v54 = vld [vmem:[%s7001_s23 + $0xc0] sm:$0xff]  ;;  %v667_v55 = vld [vmem:[%s7001_s23 + $0xc8] sm:$0xff] }
  0x1f   : > { %444 = vst.msk [vmem:[#allocation2 + $0x178] sm:$0x1] %vm402_vm1, %v6744_v0  ;;  %445 = vst.msk [vmem:[#allocation2 + $0x1a8] sm:$0x1] %vm402_vm1, %v6744_v0  ;;  %v668_v56 = vld [vmem:[%s7001_s23 + $0xd0] sm:$0xff]  ;;  %v669_v60 = vld [vmem:[%s7001_s23 + $0xd8] sm:$0xff] }
  0x20   : > { %446 = vst.msk [vmem:[#allocation2 + $0x1d8] sm:$0x1] %vm402_vm1, %v6744_v0  ;;  %447 = vst.msk [vmem:[#allocation2 + $0x208] sm:$0x1] %vm402_vm1, %v6744_v0  ;;  %v674_v61 = vld [vmem:[%s7001_s23 + $0x100] sm:$0xff]  ;;  %v675_v62 = vld [vmem:[%s7001_s23 + $0x108] sm:$0xff] }
  0x21   : > { %448 = vst.msk [vmem:[#allocation2 + $0x238] sm:$0x1] %vm402_vm1, %v6744_v0  ;;  %449 = vst.msk [vmem:[#allocation2 + $0x268] sm:$0x1] %vm402_vm1, %v6744_v0  ;;  %v676_v63 = vld [vmem:[%s7001_s23 + $0x110] sm:$0xff] }
  0x22   : > { %450 = vst.msk [vmem:[#allocation2 + $0x298] sm:$0x1] %vm402_vm1, %v6744_v0  ;;  %451 = vst.msk [vmem:[#allocation2 + $0x2c8] sm:$0x1] %vm402_vm1, %v6744_v0 }
  0x23   : > { %452 = vst.msk [vmem:[#allocation2 + $0x2f8] sm:$0x1] %vm402_vm1, %v6744_v0  ;;  %453 = vst.msk [vmem:[#allocation2 + $0x328] sm:$0x1] %vm402_vm1, %v6744_v0 }
  0x24   : > { %454 = vst.msk [vmem:[#allocation2 + $0x358] sm:$0x1] %vm402_vm1, %v6744_v0  ;;  %455 = vst.msk [vmem:[#allocation2 + $0x388] sm:$0x1] %vm402_vm1, %v6744_v0 }
  0x25   : > { %456 = vst.msk [vmem:[#allocation2 + $0x3b8] sm:$0x1] %vm402_vm1, %v6744_v0  ;;  %457 = vst.msk [vmem:[#allocation2 + $0x3e8] sm:$0x1] %vm402_vm1, %v6744_v0 }
  0x26   : > { %458 = vst.msk [vmem:[#allocation2 + $0x418] sm:$0x1] %vm402_vm1, %v6744_v0  ;;  %459 = vst.msk [vmem:[#allocation2 + $0x448] sm:$0x1] %vm402_vm1, %v6744_v0 }
  0x27   : > { %460 = vst.msk [vmem:[#allocation2 + $0x478] sm:$0x1] %vm402_vm1, %v6744_v0  ;;  %461 = vst.msk [vmem:[#allocation2 + $0x4a8] sm:$0x1] %vm402_vm1, %v6744_v0 }
  0x28   : > { %462 = vst.msk [vmem:[#allocation2 + $0x4d8] sm:$0x1] %vm402_vm1, %v6744_v0  ;;  %463 = vst.msk [vmem:[#allocation2 + $0x508] sm:$0x1] %vm402_vm1, %v6744_v0 }
  0x29   : > { %464 = vst.msk [vmem:[#allocation2 + $0x538] sm:$0x1] %vm402_vm1, %v6744_v0  ;;  %465 = vst.msk [vmem:[#allocation2 + $0x568] sm:$0x1] %vm402_vm1, %v6744_v0 }
  0x2a   : > { %466 = vst.msk [vmem:[#allocation2 + $0x598] sm:$0x1] %vm402_vm1, %v6744_v0  ;;  %467 = vst.msk [vmem:[#allocation2 + $0x5c8] sm:$0x1] %vm402_vm1, %v6744_v0 }
  0x2b   : > { %468 = vst.msk [vmem:[#allocation2 + $0x5f8] sm:$0x1] %vm402_vm1, %v6744_v0  ;;  %469 = vst.msk [vmem:[#allocation2 + $0x628] sm:$0x1] %vm402_vm1, %v6744_v0 }
  0x2c   : > { %403 = vst.msk [vmem:[#allocation2 + $0x7] sm:$0x1] %vm402_vm1, %v6744_v0  ;;  %436 = vst.msk [vmem:[#allocation2 + $0x637] sm:$0x1] %vm402_vm1, %v6744_v0 }
  0x2d   : > { %437 = vst.msk [vmem:[#allocation2 + $0x28] sm:$0x1] %vm402_vm1, %v6744_v0  ;;  %470 = vst.msk [vmem:[#allocation2 + $0x658] sm:$0x1] %vm402_vm1, %v6744_v0 }
  0x2e   : > { %779 = vst.msk [vmem:[#allocation2 + $0x98] sm:$0xff] %vm388_vm0, %v650_v1  ;;  %780 = vst.msk [vmem:[#allocation2 + $0xa0] sm:$0xff] %vm388_vm0, %v651_v2 }
  0x2f   : > { %781 = vst.msk [vmem:[#allocation2 + $0xa8] sm:$0xff] %vm388_vm0, %v652_v3  ;;  %782 = vst.msk [vmem:[#allocation2 + $0xb0] sm:$0xff] %vm388_vm0, %v653_v4  ;;  %v677_v3 = vld [vmem:[%s7001_s23 + $0x118] sm:$0xff] }
  0x30   : > { %771 = vst.msk [vmem:[#allocation2 + $0x38] sm:$0xff] %vm388_vm0, %v642_v5  ;;  %772 = vst.msk [vmem:[#allocation2 + $0x40] sm:$0xff] %vm388_vm0, %v643_v6 }
  0x31   : > { %773 = vst.msk [vmem:[#allocation2 + $0x48] sm:$0xff] %vm388_vm0, %v644_v7  ;;  %774 = vst.msk [vmem:[#allocation2 + $0x50] sm:$0xff] %vm388_vm0, %v645_v8  ;;  %v678_v7 = vld [vmem:[%s7001_s23 + $0x120] sm:$0xff]  ;;  %v679_v8 = vld [vmem:[%s7001_s23 + $0x128] sm:$0xff] }
  0x32   : > { %775 = vst.msk [vmem:[#allocation2 + $0x68] sm:$0xff] %vm388_vm0, %v646_v9  ;;  %776 = vst.msk [vmem:[#allocation2 + $0x70] sm:$0xff] %vm388_vm0, %v647_v10  ;;  %v680_v9 = vld [vmem:[%s7001_s23 + $0x130] sm:$0xff] }
  0x33   : > { %777 = vst.msk [vmem:[#allocation2 + $0x78] sm:$0xff] %vm388_vm0, %v648_v11  ;;  %778 = vst.msk [vmem:[#allocation2 + $0x80] sm:$0xff] %vm388_vm0, %v649_v12  ;;  %v681_v11 = vld [vmem:[%s7001_s23 + $0x138] sm:$0xff]  ;;  %v686_v12 = vld [vmem:[%s7001_s23 + $0x160] sm:$0xff] }
  0x34   : > { %783 = vst.msk [vmem:[#allocation2 + $0xc8] sm:$0xff] %vm388_vm0, %v654_v13  ;;  %784 = vst.msk [vmem:[#allocation2 + $0xd0] sm:$0xff] %vm388_vm0, %v655_v14  ;;  %v687_v13 = vld [vmem:[%s7001_s23 + $0x168] sm:$0xff]  ;;  %v688_v14 = vld [vmem:[%s7001_s23 + $0x170] sm:$0xff] }
  0x35   : > { %785 = vst.msk [vmem:[#allocation2 + $0xd8] sm:$0xff] %vm388_vm0, %v656_v15  ;;  %786 = vst.msk [vmem:[#allocation2 + $0xe0] sm:$0xff] %vm388_vm0, %v657_v16  ;;  %v1082_v25 = vld [vmem:[#allocation2 + $0x98] ss:$2 sm:$0xff]  ;;  %v1252_v45 = vld [vmem:[#allocation2 + $0x99] ss:$2 sm:$0xff] }
  0x36   : > { %787 = vst.msk [vmem:[#allocation2 + $0xf8] sm:$0xff] %vm388_vm0, %v658_v17  ;;  %788 = vst.msk [vmem:[#allocation2 + $0x100] sm:$0xff] %vm388_vm0, %v659_v18  ;;  %v1084_v26 = vld [vmem:[#allocation2 + $0xa8] ss:$2 sm:$0xff]  ;;  %v1254_v46 = vld [vmem:[#allocation2 + $0xa9] ss:$2 sm:$0xff] }
  0x37   : > { %789 = vst.msk [vmem:[#allocation2 + $0x108] sm:$0xff] %vm388_vm0, %v660_v19  ;;  %790 = vst.msk [vmem:[#allocation2 + $0x110] sm:$0xff] %vm388_vm0, %v661_v20  ;;  %v1074_v27 = vld [vmem:[#allocation2 + $0x38] ss:$2 sm:$0xff]  ;;  %v1244_v28 = vld [vmem:[#allocation2 + $0x39] ss:$2 sm:$0xff]  ;;  %v1208_v29 = vpack.c.bf16 %v1084_v26, %v1082_v25  ;;  %v1378_v57 = vpack.c.bf16 %v1254_v46, %v1252_v45 }
  0x38   : > { %791 = vst.msk [vmem:[#allocation2 + $0x128] sm:$0xff] %vm388_vm0, %v662_v21  ;;  %792 = vst.msk [vmem:[#allocation2 + $0x130] sm:$0xff] %vm388_vm0, %v663_v22  ;;  %v1076_v30 = vld [vmem:[#allocation2 + $0x48] ss:$2 sm:$0xff]  ;;  %v1246_v31 = vld [vmem:[#allocation2 + $0x49] ss:$2 sm:$0xff] }
  0x39   : > { %793 = vst.msk [vmem:[#allocation2 + $0x138] sm:$0xff] %vm388_vm0, %v664_v23  ;;  %794 = vst.msk [vmem:[#allocation2 + $0x140] sm:$0xff] %vm388_vm0, %v665_v24  ;;  %v1206_v32 = vpack.c.bf16 %v1076_v30, %v1074_v27  ;;  %v1078_v33 = vld [vmem:[#allocation2 + $0x68] ss:$2 sm:$0xff]  ;;  %1619 = vrot.lane.b32.xlu1 %v1208_v29, %s6745_s24  ;;  %v1376_v35 = vpack.c.bf16 %v1246_v31, %v1244_v28  ;;  %v1248_v37 = vld [vmem:[#allocation2 + $0x69] ss:$2 sm:$0xff] }
  0x3a   : > { %v1080_v34 = vld [vmem:[#allocation2 + $0x78] ss:$2 sm:$0xff]  ;;  %v1250_v38 = vld [vmem:[#allocation2 + $0x79] ss:$2 sm:$0xff]  ;;  %799 = vst.msk [vmem:[#allocation2 + $0x188] sm:$0xff] %vm388_vm0, %v670_v47  ;;  %800 = vst.msk [vmem:[#allocation2 + $0x190] sm:$0xff] %vm388_vm0, %v671_v50 }
  0x3b   : > { %1615 = vrot.lane.b32.xlu0 %v1206_v32, %s6745_s24  ;;  %v1207_v36 = vpack.c.bf16 %v1080_v34, %v1078_v33  ;;  %v1086_v39 = vld [vmem:[#allocation2 + $0xc8] ss:$2 sm:$0xff]  ;;  %v1377_v41 = vpack.c.bf16 %v1250_v38, %v1248_v37  ;;  %v1256_v48 = vld [vmem:[#allocation2 + $0xc9] ss:$2 sm:$0xff]  ;;  %801 = vst.msk [vmem:[#allocation2 + $0x198] sm:$0xff] %vm388_vm0, %v672_v51  ;;  %802 = vst.msk [vmem:[#allocation2 + $0x1a0] sm:$0xff] %vm388_vm0, %v673_v52 }
  0x3c   : > { %v1088_v40 = vld [vmem:[#allocation2 + $0xd8] ss:$2 sm:$0xff]  ;;  %v1258_v49 = vld [vmem:[#allocation2 + $0xd9] ss:$2 sm:$0xff]  ;;  %795 = vst.msk [vmem:[#allocation2 + $0x158] sm:$0xff] %vm388_vm0, %v666_v54  ;;  %796 = vst.msk [vmem:[#allocation2 + $0x160] sm:$0xff] %vm388_vm0, %v667_v55 }
  0x3d   : > { %1717 = vrot.lane.b32.xlu1 %v1376_v35, %s6746_s25  ;;  %v1209_v42 = vpack.c.bf16 %v1088_v40, %v1086_v39  ;;  %v1414_v43 = vld [vmem:[#allocation2 + $0x3a] ss:$2 sm:$0xff]  ;;  %v1416_v44 = vld [vmem:[#allocation2 + $0x4a] ss:$2 sm:$0xff]  ;;  %797 = vst.msk [vmem:[#allocation2 + $0x168] sm:$0xff] %vm388_vm0, %v668_v56  ;;  %798 = vst.msk [vmem:[#allocation2 + $0x170] sm:$0xff] %vm388_vm0, %v669_v60  ;;  %v1379_v4 = vpack.c.bf16 %v1258_v49, %v1256_v48 }
  0x3e   : > { %v1546_v53 = vpack.c.bf16 %v1416_v44, %v1414_v43  ;;  %v1090_v58 = vld [vmem:[#allocation2 + $0xf8] ss:$2 sm:$0xff]  ;;  %v1092_v59 = vld [vmem:[#allocation2 + $0x108] ss:$2 sm:$0xff]  ;;  %803 = vst.msk [vmem:[#allocation2 + $0x1b8] sm:$0xff] %vm388_vm0, %v674_v61  ;;  %804 = vst.msk [vmem:[#allocation2 + $0x1c0] sm:$0xff] %vm388_vm0, %v675_v62 }
  0x3f   : > { %1617 = vrot.lane.b32.xlu0 %v1207_v36, %s6745_s24  ;;  %v1422_v1 = vld [vmem:[#allocation2 + $0x9a] ss:$2 sm:$0xff]  ;;  %v1424_v2 = vld [vmem:[#allocation2 + $0xaa] ss:$2 sm:$0xff]  ;;  %805 = vst.msk [vmem:[#allocation2 + $0x1c8] sm:$0xff] %vm388_vm0, %v676_v63  ;;  %806 = vst.msk [vmem:[#allocation2 + $0x1d0] sm:$0xff] %vm388_vm0, %v677_v3  ;;  %v1210_v10 = vpack.c.bf16 %v1092_v59, %v1090_v58 }
  0x40   : > { %v1418_v5 = vld [vmem:[#allocation2 + $0x6a] ss:$2 sm:$0xff]  ;;  %v1420_v6 = vld [vmem:[#allocation2 + $0x7a] ss:$2 sm:$0xff]  ;;  %807 = vst.msk [vmem:[#allocation2 + $0x1e8] sm:$0xff] %vm388_vm0, %v678_v7  ;;  %808 = vst.msk [vmem:[#allocation2 + $0x1f0] sm:$0xff] %vm388_vm0, %v679_v8  ;;  %v1548_v17 = vpack.c.bf16 %v1424_v2, %v1422_v1 }
  0x41   : > { %1719 = vrot.lane.b32.xlu1 %v1377_v41, %s6746_s25  ;;  %809 = vst.msk [vmem:[#allocation2 + $0x1f8] sm:$0xff] %vm388_vm0, %v680_v9  ;;  %810 = vst.msk [vmem:[#allocation2 + $0x200] sm:$0xff] %vm388_vm0, %v681_v11  ;;  %v689_v15 = vld [vmem:[%s7001_s23 + $0x178] sm:$0xff]  ;;  %v682_v16 = vld [vmem:[%s7001_s23 + $0x140] sm:$0xff]  ;;  %v1547_v18 = vpack.c.bf16 %v1420_v6, %v1418_v5 }
  0x42   : > { %815 = vst.msk [vmem:[#allocation2 + $0x248] sm:$0xff] %vm388_vm0, %v686_v12  ;;  %816 = vst.msk [vmem:[#allocation2 + $0x250] sm:$0xff] %vm388_vm0, %v687_v13  ;;  %v1426_v19 = vld [vmem:[#allocation2 + $0xca] ss:$2 sm:$0xff]  ;;  %v1428_v20 = vld [vmem:[#allocation2 + $0xda] ss:$2 sm:$0xff] }
  0x43   : > { %1621 = vrot.lane.b32.xlu0 %v1209_v42, %s6745_s24  ;;  %817 = vst.msk [vmem:[#allocation2 + $0x258] sm:$0xff] %vm388_vm0, %v688_v14  ;;  %818 = vst.msk [vmem:[#allocation2 + $0x260] sm:$0xff] %vm388_vm0, %v689_v15  ;;  %v1260_v21 = vld [vmem:[#allocation2 + $0xf9] ss:$2 sm:$0xff]  ;;  %v1262_v22 = vld [vmem:[#allocation2 + $0x109] ss:$2 sm:$0xff]  ;;  %v1549_v23 = vpack.c.bf16 %v1428_v20, %v1426_v19 }
  0x44   : > { %811 = vst.msk [vmem:[#allocation2 + $0x218] sm:$0xff] %vm388_vm0, %v682_v16  ;;  %v1380_v24 = vpack.c.bf16 %v1262_v22, %v1260_v21  ;;  %v1094_v25 = vld [vmem:[#allocation2 + $0x128] ss:$2 sm:$0xff]  ;;  %v1096_v26 = vld [vmem:[#allocation2 + $0x138] ss:$2 sm:$0xff] }
  0x45   : > { %1819 = vrot.lane.b32.xlu1 %v1546_v53, %s6747_s26  ;;  %v1430_v27 = vld [vmem:[#allocation2 + $0xfa] ss:$2 sm:$0xff]  ;;  %v1432_v28 = vld [vmem:[#allocation2 + $0x10a] ss:$2 sm:$0xff]  ;;  %v1211_v32 = vpack.c.bf16 %v1096_v26, %v1094_v25  ;;  %v1268_v42 = vld [vmem:[#allocation2 + $0x159] ss:$2 sm:$0xff] }
  0x46   : > { %v683_v29 = vld [vmem:[%s7001_s23 + $0x148] sm:$0xff]  ;;  %v684_v30 = vld [vmem:[%s7001_s23 + $0x150] sm:$0xff]  ;;  %v685_v31 = vld [vmem:[%s7001_s23 + $0x158] sm:$0xff]  ;;  %v1550_v36 = vpack.c.bf16 %v1432_v28, %v1430_v27  ;;  %472 = vst.msk [vmem:[#allocation3] sm:$0xff] %vm471_vm4, %v6744_v0 }
  0x47   : > { %1721 = vrot.lane.b32.xlu0 %v1378_v57, %s6746_s25  ;;  %812 = vst.msk [vmem:[#allocation2 + $0x220] sm:$0xff] %vm388_vm0, %v683_v29  ;;  %813 = vst.msk [vmem:[#allocation2 + $0x228] sm:$0xff] %vm388_vm0, %v684_v30  ;;  %v1102_v33 = vld [vmem:[#allocation2 + $0x188] ss:$2 sm:$0xff]  ;;  %v1104_v34 = vld [vmem:[#allocation2 + $0x198] ss:$2 sm:$0xff] }
  0x48   : > { %814 = vst.msk [vmem:[#allocation2 + $0x230] sm:$0xff] %vm388_vm0, %v685_v31  ;;  %v690_v35 = vld [vmem:[%s7001_s23 + $0x180] sm:$0xff]  ;;  %v691_v37 = vld [vmem:[%s7001_s23 + $0x188] sm:$0xff]  ;;  %v692_v38 = vld [vmem:[%s7001_s23 + $0x190] sm:$0xff]  ;;  %v1213_v46 = vpack.c.bf16 %v1104_v34, %v1102_v33 }
  0x49   : > { %1723 = vrot.lane.b32.xlu1 %v1379_v4, %s6746_s25  ;;  %v693_v39 = vld [vmem:[%s7001_s23 + $0x198] sm:$0xff]  ;;  %819 = vst.msk [vmem:[#allocation2 + $0x278] sm:$0xff] %vm388_vm0, %v690_v35  ;;  %v1100_v41 = vld [vmem:[#allocation2 + $0x168] ss:$2 sm:$0xff]  ;;  %820 = vst.msk [vmem:[#allocation2 + $0x280] sm:$0xff] %vm388_vm0, %v691_v37 }
  0x4a   : > { %v1098_v40 = vld [vmem:[#allocation2 + $0x158] ss:$2 sm:$0xff]  ;;  %821 = vst.msk [vmem:[#allocation2 + $0x288] sm:$0xff] %vm388_vm0, %v692_v38  ;;  %822 = vst.msk [vmem:[#allocation2 + $0x290] sm:$0xff] %vm388_vm0, %v693_v39  ;;  %v1270_v43 = vld [vmem:[#allocation2 + $0x169] ss:$2 sm:$0xff] }
  0x4b   : > { %1623 = vrot.lane.b32.xlu0 %v1210_v10, %s6745_s24  ;;  %v694_v44 = vld [vmem:[%s7001_s23 + $0x1a0] sm:$0xff]  ;;  %v695_v45 = vld [vmem:[%s7001_s23 + $0x1a8] sm:$0xff]  ;;  %v696_v47 = vld [vmem:[%s7001_s23 + $0x1b0] sm:$0xff]  ;;  %v1212_v50 = vpack.c.bf16 %v1100_v41, %v1098_v40  ;;  %v1382_v56 = vpack.c.bf16 %v1270_v43, %v1268_v42  ;;  %473 = vst.msk [vmem:[#allocation3 + $0x8] sm:$0xff] %vm471_vm4, %v6744_v0 }
  0x4c   : > { %v697_v48 = vld [vmem:[%s7001_s23 + $0x1b8] sm:$0xff]  ;;  %823 = vst.msk [vmem:[#allocation2 + $0x2a8] sm:$0xff] %vm388_vm0, %v694_v44  ;;  %824 = vst.msk [vmem:[#allocation2 + $0x2b0] sm:$0xff] %vm388_vm0, %v695_v45  ;;  %v702_v49 = vld [vmem:[%s7001_s23 + $0x1e0] sm:$0xff] }
  0x4d   : > { %1823 = vrot.lane.b32.xlu1 %v1548_v17, %s6747_s26  ;;  %825 = vst.msk [vmem:[#allocation2 + $0x2b8] sm:$0xff] %vm388_vm0, %v696_v47  ;;  %826 = vst.msk [vmem:[#allocation2 + $0x2c0] sm:$0xff] %vm388_vm0, %v697_v48  ;;  %v703_v51 = vld [vmem:[%s7001_s23 + $0x1e8] sm:$0xff]  ;;  %v704_v52 = vld [vmem:[%s7001_s23 + $0x1f0] sm:$0xff] }
  0x4e   : > { %v705_v53 = vld [vmem:[%s7001_s23 + $0x1f8] sm:$0xff]  ;;  %831 = vst.msk [vmem:[#allocation2 + $0x308] sm:$0xff] %vm388_vm0, %v702_v49  ;;  %v1264_v54 = vld [vmem:[#allocation2 + $0x129] ss:$2 sm:$0xff]  ;;  %832 = vst.msk [vmem:[#allocation2 + $0x310] sm:$0xff] %vm388_vm0, %v703_v51 }
  0x4f   : > { %1821 = vrot.lane.b32.xlu0 %v1547_v18, %s6747_s26  ;;  %v1266_v55 = vld [vmem:[#allocation2 + $0x139] ss:$2 sm:$0xff]  ;;  %833 = vst.msk [vmem:[#allocation2 + $0x318] sm:$0xff] %vm388_vm0, %v704_v52  ;;  %834 = vst.msk [vmem:[#allocation2 + $0x320] sm:$0xff] %vm388_vm0, %v705_v53  ;;  %v699_v58 = vld [vmem:[%s7001_s23 + $0x1c8] sm:$0xff] }
  0x50   : > { %v698_v57 = vld [vmem:[%s7001_s23 + $0x1c0] sm:$0xff]  ;;  %v700_v59 = vld [vmem:[%s7001_s23 + $0x1d0] sm:$0xff]  ;;  %v1381_v60 = vpack.c.bf16 %v1266_v55, %v1264_v54  ;;  %828 = vst.msk [vmem:[#allocation2 + $0x2e0] sm:$0xff] %vm388_vm0, %v699_v58  ;;  %v701_v2 = vld [vmem:[%s7001_s23 + $0x1d8] sm:$0xff] }
  0x51   : > { %1825 = vrot.lane.b32.xlu1 %v1549_v23, %s6747_s26  ;;  %v1272_v61 = vld [vmem:[#allocation2 + $0x189] ss:$2 sm:$0xff]  ;;  %v1274_v62 = vld [vmem:[#allocation2 + $0x199] ss:$2 sm:$0xff]  ;;  %827 = vst.msk [vmem:[#allocation2 + $0x2d8] sm:$0xff] %vm388_vm0, %v698_v57  ;;  %829 = vst.msk [vmem:[#allocation2 + $0x2e8] sm:$0xff] %vm388_vm0, %v700_v59 }
  0x52   : > { %v1106_v63 = vld [vmem:[#allocation2 + $0x1b8] ss:$2 sm:$0xff]  ;;  %v1108_v1 = vld [vmem:[#allocation2 + $0x1c8] ss:$2 sm:$0xff]  ;;  %v1383_v3 = vpack.c.bf16 %v1274_v62, %v1272_v61  ;;  %830 = vst.msk [vmem:[#allocation2 + $0x2f0] sm:$0xff] %vm388_vm0, %v701_v2 }
  0x53   : > { %1725 = vrot.lane.b32.xlu0 %v1380_v24, %s6746_s25  ;;  %v706_v4 = vld [vmem:[%s7001_s23 + $0x200] sm:$0xff]  ;;  %v1214_v5 = vpack.c.bf16 %v1108_v1, %v1106_v63  ;;  %v1440_v7 = vld [vmem:[#allocation2 + $0x16a] ss:$2 sm:$0xff]  ;;  %v1278_v18 = vld [vmem:[#allocation2 + $0x1c9] ss:$2 sm:$0xff]  ;;  %474 = vst.msk [vmem:[#allocation3 + $0x10] sm:$0xff] %vm471_vm4, %v6744_v0 }
  0x54   : > { %v1438_v6 = vld [vmem:[#allocation2 + $0x15a] ss:$2 sm:$0xff]  ;;  %v1434_v8 = vld [vmem:[#allocation2 + $0x12a] ss:$2 sm:$0xff]  ;;  %835 = vst.msk [vmem:[#allocation2 + $0x338] sm:$0xff] %vm388_vm0, %v706_v4 }
  0x55   : > { %1625 = vrot.lane.b32.xlu1 %v1211_v32, %s6745_s24  ;;  %v1436_v9 = vld [vmem:[#allocation2 + $0x13a] ss:$2 sm:$0xff]  ;;  %v708_v11 = vld [vmem:[%s7001_s23 + $0x210] sm:$0xff]  ;;  %v1552_v13 = vpack.c.bf16 %v1440_v7, %v1438_v6  ;;  %v1276_v17 = vld [vmem:[#allocation2 + $0x1b9] ss:$2 sm:$0xff]  ;;  %475 = vst.msk [vmem:[#allocation3 + $0x18] sm:$0xff] %vm471_vm4, %v6744_v0 }
  0x56   : > { %v707_v10 = vld [vmem:[%s7001_s23 + $0x208] sm:$0xff]  ;;  %v709_v12 = vld [vmem:[%s7001_s23 + $0x218] sm:$0xff]  ;;  %837 = vst.msk [vmem:[#allocation2 + $0x348] sm:$0xff] %vm388_vm0, %v708_v11  ;;  %v1551_v16 = vpack.c.bf16 %v1436_v9, %v1434_v8  ;;  %v710_v19 = vld [vmem:[%s7001_s23 + $0x220] sm:$0xff]  ;;  %v1384_v29 = vpack.c.bf16 %v1278_v18, %v1276_v17 }
  0x57   : > { %1827 = vrot.lane.b32.xlu0 %v1550_v36, %s6747_s26  ;;  %836 = vst.msk [vmem:[#allocation2 + $0x340] sm:$0xff] %vm388_vm0, %v707_v10  ;;  %v1442_v14 = vld [vmem:[#allocation2 + $0x18a] ss:$2 sm:$0xff]  ;;  %v1444_v15 = vld [vmem:[#allocation2 + $0x19a] ss:$2 sm:$0xff]  ;;  %838 = vst.msk [vmem:[#allocation2 + $0x350] sm:$0xff] %vm388_vm0, %v709_v12 }
  0x58   : > { %v711_v20 = vld [vmem:[%s7001_s23 + $0x228] sm:$0xff]  ;;  %v712_v21 = vld [vmem:[%s7001_s23 + $0x230] sm:$0xff]  ;;  %v713_v22 = vld [vmem:[%s7001_s23 + $0x238] sm:$0xff]  ;;  %839 = vst.msk [vmem:[#allocation2 + $0x368] sm:$0xff] %vm388_vm0, %v710_v19  ;;  %v1553_v25 = vpack.c.bf16 %v1444_v15, %v1442_v14 }
  0x59   : > { %1629 = vrot.lane.b32.xlu1 %v1213_v46, %s6745_s24  ;;  %v1110_v23 = vld [vmem:[#allocation2 + $0x1e8] ss:$2 sm:$0xff]  ;;  %v1112_v24 = vld [vmem:[#allocation2 + $0x1f8] ss:$2 sm:$0xff]  ;;  %840 = vst.msk [vmem:[#allocation2 + $0x370] sm:$0xff] %vm388_vm0, %v711_v20  ;;  %841 = vst.msk [vmem:[#allocation2 + $0x378] sm:$0xff] %vm388_vm0, %v712_v21 }
  0x5a   : > { %842 = vst.msk [vmem:[#allocation2 + $0x380] sm:$0xff] %vm388_vm0, %v713_v22  ;;  %v718_v26 = vld [vmem:[%s7001_s23 + $0x260] sm:$0xff]  ;;  %v719_v27 = vld [vmem:[%s7001_s23 + $0x268] sm:$0xff]  ;;  %v720_v28 = vld [vmem:[%s7001_s23 + $0x270] sm:$0xff]  ;;  %v1215_v37 = vpack.c.bf16 %v1112_v24, %v1110_v23 }
  0x5b   : > { %1627 = vrot.lane.b32.xlu0 %v1212_v50, %s6745_s24  ;;  %v721_v30 = vld [vmem:[%s7001_s23 + $0x278] sm:$0xff]  ;;  %847 = vst.msk [vmem:[#allocation2 + $0x3c8] sm:$0xff] %vm388_vm0, %v718_v26  ;;  %848 = vst.msk [vmem:[#allocation2 + $0x3d0] sm:$0xff] %vm388_vm0, %v719_v27  ;;  %v714_v31 = vld [vmem:[%s7001_s23 + $0x240] sm:$0xff] }
  0x5c   : > { %849 = vst.msk [vmem:[#allocation2 + $0x3d8] sm:$0xff] %vm388_vm0, %v720_v28  ;;  %v715_v32 = vld [vmem:[%s7001_s23 + $0x248] sm:$0xff]  ;;  %850 = vst.msk [vmem:[#allocation2 + $0x3e0] sm:$0xff] %vm388_vm0, %v721_v30  ;;  %v1120_v36 = vld [vmem:[#allocation2 + $0x258] ss:$2 sm:$0xff] }
  0x5d   : > { %1729 = vrot.lane.b32.xlu1 %v1382_v56, %s6746_s25  ;;  %v1446_v33 = vld [vmem:[#allocation2 + $0x1ba] ss:$2 sm:$0xff]  ;;  %v1448_v34 = vld [vmem:[#allocation2 + $0x1ca] ss:$2 sm:$0xff]  ;;  %843 = vst.msk [vmem:[#allocation2 + $0x398] sm:$0xff] %vm388_vm0, %v714_v31  ;;  %844 = vst.msk [vmem:[#allocation2 + $0x3a0] sm:$0xff] %vm388_vm0, %v715_v32 }
  0x5e   : > { %v1118_v35 = vld [vmem:[#allocation2 + $0x248] ss:$2 sm:$0xff]  ;;  %v717_v39 = vld [vmem:[%s7001_s23 + $0x258] sm:$0xff]  ;;  %v722_v40 = vld [vmem:[%s7001_s23 + $0x280] sm:$0xff]  ;;  %v1554_v41 = vpack.c.bf16 %v1448_v34, %v1446_v33  ;;  %477 = vst.msk [vmem:[#allocation3 + $0x220] sm:$0xff] %vm471_vm4, %v6744_v0 }
  0x5f   : > { %1727 = vrot.lane.b32.xlu0 %v1381_v60, %s6746_s25  ;;  %v716_v38 = vld [vmem:[%s7001_s23 + $0x250] sm:$0xff]  ;;  %846 = vst.msk [vmem:[#allocation2 + $0x3b0] sm:$0xff] %vm388_vm0, %v717_v39  ;;  %v723_v42 = vld [vmem:[%s7001_s23 + $0x288] sm:$0xff]  ;;  %v725_v44 = vld [vmem:[%s7001_s23 + $0x298] sm:$0xff]  ;;  %v1217_v47 = vpack.c.bf16 %v1120_v36, %v1118_v35 }
  0x60   : > { %845 = vst.msk [vmem:[#allocation2 + $0x3a8] sm:$0xff] %vm388_vm0, %v716_v38  ;;  %v724_v43 = vld [vmem:[%s7001_s23 + $0x290] sm:$0xff]  ;;  %851 = vst.msk [vmem:[#allocation2 + $0x3f8] sm:$0xff] %vm388_vm0, %v722_v40  ;;  %v1114_v45 = vld [vmem:[#allocation2 + $0x218] ss:$2 sm:$0xff] }
  0x61   : > { %1731 = vrot.lane.b32.xlu1 %v1383_v3, %s6746_s25  ;;  %v1116_v46 = vld [vmem:[#allocation2 + $0x228] ss:$2 sm:$0xff]  ;;  %852 = vst.msk [vmem:[#allocation2 + $0x400] sm:$0xff] %vm388_vm0, %v723_v42  ;;  %853 = vst.msk [vmem:[#allocation2 + $0x408] sm:$0xff] %vm388_vm0, %v724_v43  ;;  %v1284_v49 = vld [vmem:[#allocation2 + $0x219] ss:$2 sm:$0xff] }
  0x62   : > { %854 = vst.msk [vmem:[#allocation2 + $0x410] sm:$0xff] %vm388_vm0, %v725_v44  ;;  %v1216_v48 = vpack.c.bf16 %v1116_v46, %v1114_v45  ;;  %v1286_v50 = vld [vmem:[#allocation2 + $0x229] ss:$2 sm:$0xff]  ;;  %v1282_v52 = vld [vmem:[#allocation2 + $0x1f9] ss:$2 sm:$0xff] }
  0x63   : > { %1631 = vrot.lane.b32.xlu0 %v1214_v5, %s6745_s24  ;;  %v1280_v51 = vld [vmem:[#allocation2 + $0x1e9] ss:$2 sm:$0xff]  ;;  %v1386_v53 = vpack.c.bf16 %v1286_v50, %v1284_v49  ;;  %v1290_v56 = vld [vmem:[#allocation2 + $0x259] ss:$2 sm:$0xff]  ;;  %v1122_v57 = vld [vmem:[#allocation2 + $0x278] ss:$2 sm:$0xff] }
  0x64   : > { %v1385_v54 = vpack.c.bf16 %v1282_v52, %v1280_v51  ;;  %v1288_v55 = vld [vmem:[#allocation2 + $0x249] ss:$2 sm:$0xff]  ;;  %v1124_v58 = vld [vmem:[#allocation2 + $0x288] ss:$2 sm:$0xff]  ;;  %v726_v62 = vld [vmem:[%s7001_s23 + $0x2a0] sm:$0xff]  ;;  %478 = vst.msk [vmem:[#allocation3 + $0x228] sm:$0xff] %vm471_vm4, %v6744_v0 }
  0x65   : > { %1831 = vrot.lane.b32.xlu1 %v1552_v13, %s6747_s26  ;;  %v1387_v59 = vpack.c.bf16 %v1290_v56, %v1288_v55  ;;  %v1450_v60 = vld [vmem:[#allocation2 + $0x1ea] ss:$2 sm:$0xff]  ;;  %v1452_v61 = vld [vmem:[#allocation2 + $0x1fa] ss:$2 sm:$0xff]  ;;  %v1218_v2 = vpack.c.bf16 %v1124_v58, %v1122_v57  ;;  %855 = vst.msk [vmem:[#allocation2 + $0x428] sm:$0xff] %vm388_vm0, %v726_v62 }
  0x66   : > { %v727_v63 = vld [vmem:[%s7001_s23 + $0x2a8] sm:$0xff]  ;;  %v728_v1 = vld [vmem:[%s7001_s23 + $0x2b0] sm:$0xff]  ;;  %v729_v5 = vld [vmem:[%s7001_s23 + $0x2b8] sm:$0xff]  ;;  %v1555_v17 = vpack.c.bf16 %v1452_v61, %v1450_v60  ;;  %479 = vst.msk [vmem:[#allocation3 + $0x230] sm:$0xff] %vm471_vm4, %v6744_v0 }
  0x67   : > { %1829 = vrot.lane.b32.xlu0 %v1551_v16, %s6747_s26  ;;  %v1454_v3 = vld [vmem:[#allocation2 + $0x21a] ss:$2 sm:$0xff]  ;;  %v1456_v4 = vld [vmem:[#allocation2 + $0x22a] ss:$2 sm:$0xff]  ;;  %856 = vst.msk [vmem:[#allocation2 + $0x430] sm:$0xff] %vm388_vm0, %v727_v63  ;;  %857 = vst.msk [vmem:[#allocation2 + $0x438] sm:$0xff] %vm388_vm0, %v728_v1 }
  0x68   : > { %858 = vst.msk [vmem:[#allocation2 + $0x440] sm:$0xff] %vm388_vm0, %v729_v5  ;;  %v734_v6 = vld [vmem:[%s7001_s23 + $0x2e0] sm:$0xff]  ;;  %v735_v7 = vld [vmem:[%s7001_s23 + $0x2e8] sm:$0xff]  ;;  %v736_v8 = vld [vmem:[%s7001_s23 + $0x2f0] sm:$0xff]  ;;  %v1556_v13 = vpack.c.bf16 %v1456_v4, %v1454_v3 }
  0x69   : > { %1833 = vrot.lane.b32.xlu1 %v1553_v25, %s6747_s26  ;;  %v1458_v9 = vld [vmem:[#allocation2 + $0x24a] ss:$2 sm:$0xff]  ;;  %863 = vst.msk [vmem:[#allocation2 + $0x488] sm:$0xff] %vm388_vm0, %v734_v6  ;;  %864 = vst.msk [vmem:[#allocation2 + $0x490] sm:$0xff] %vm388_vm0, %v735_v7  ;;  %v730_v11 = vld [vmem:[%s7001_s23 + $0x2c0] sm:$0xff] }
  0x6a   : > { %v737_v10 = vld [vmem:[%s7001_s23 + $0x2f8] sm:$0xff]  ;;  %865 = vst.msk [vmem:[#allocation2 + $0x498] sm:$0xff] %vm388_vm0, %v736_v8  ;;  %v731_v12 = vld [vmem:[%s7001_s23 + $0x2c8] sm:$0xff]  ;;  %v732_v15 = vld [vmem:[%s7001_s23 + $0x2d0] sm:$0xff] }
  0x6b   : > { %1733 = vrot.lane.b32.xlu0 %v1384_v29, %s6746_s25  ;;  %v1460_v14 = vld [vmem:[#allocation2 + $0x25a] ss:$2 sm:$0xff]  ;;  %866 = vst.msk [vmem:[#allocation2 + $0x4a0] sm:$0xff] %vm388_vm0, %v737_v10  ;;  %859 = vst.msk [vmem:[#allocation2 + $0x458] sm:$0xff] %vm388_vm0, %v730_v11  ;;  %v1292_v18 = vld [vmem:[#allocation2 + $0x279] ss:$2 sm:$0xff] }
  0x6c   : > { %v733_v16 = vld [vmem:[%s7001_s23 + $0x2d8] sm:$0xff]  ;;  %860 = vst.msk [vmem:[#allocation2 + $0x460] sm:$0xff] %vm388_vm0, %v731_v12  ;;  %861 = vst.msk [vmem:[#allocation2 + $0x468] sm:$0xff] %vm388_vm0, %v732_v15  ;;  %v738_v19 = vld [vmem:[%s7001_s23 + $0x300] sm:$0xff]  ;;  %v1557_v24 = vpack.c.bf16 %v1460_v14, %v1458_v9 }
  0x6d   : > { %1633 = vrot.lane.b32.xlu1 %v1215_v37, %s6745_s24  ;;  %862 = vst.msk [vmem:[#allocation2 + $0x470] sm:$0xff] %vm388_vm0, %v733_v16  ;;  %v739_v20 = vld [vmem:[%s7001_s23 + $0x308] sm:$0xff]  ;;  %v740_v22 = vld [vmem:[%s7001_s23 + $0x310] sm:$0xff]  ;;  %v741_v23 = vld [vmem:[%s7001_s23 + $0x318] sm:$0xff] }
  0x6e   : > { %v1294_v21 = vld [vmem:[#allocation2 + $0x289] ss:$2 sm:$0xff]  ;;  %867 = vst.msk [vmem:[#allocation2 + $0x4b8] sm:$0xff] %vm388_vm0, %v738_v19  ;;  %868 = vst.msk [vmem:[#allocation2 + $0x4c0] sm:$0xff] %vm388_vm0, %v739_v20  ;;  %v1126_v26 = vld [vmem:[#allocation2 + $0x2a8] ss:$2 sm:$0xff] }
  0x6f   : > { %1835 = vrot.lane.b32.xlu0 %v1554_v41, %s6747_s26  ;;  %869 = vst.msk [vmem:[#allocation2 + $0x4c8] sm:$0xff] %vm388_vm0, %v740_v22  ;;  %870 = vst.msk [vmem:[#allocation2 + $0x4d0] sm:$0xff] %vm388_vm0, %v741_v23  ;;  %v1388_v25 = vpack.c.bf16 %v1294_v21, %v1292_v18  ;;  %v1128_v27 = vld [vmem:[#allocation2 + $0x2b8] ss:$2 sm:$0xff]  ;;  %v1134_v32 = vld [vmem:[#allocation2 + $0x308] ss:$2 sm:$0xff] }
  0x70   : > { %v1462_v28 = vld [vmem:[#allocation2 + $0x27a] ss:$2 sm:$0xff]  ;;  %v1464_v29 = vld [vmem:[#allocation2 + $0x28a] ss:$2 sm:$0xff]  ;;  %v1219_v30 = vpack.c.bf16 %v1128_v27, %v1126_v26  ;;  %v1296_v37 = vld [vmem:[#allocation2 + $0x2a9] ss:$2 sm:$0xff] }
  0x71   : > { %1637 = vrot.lane.b32.xlu1 %v1217_v47, %s6745_s24  ;;  %v1558_v31 = vpack.c.bf16 %v1464_v29, %v1462_v28  ;;  %v1136_v33 = vld [vmem:[#allocation2 + $0x318] ss:$2 sm:$0xff]  ;;  %v1132_v35 = vld [vmem:[#allocation2 + $0x2e8] ss:$2 sm:$0xff]  ;;  %v1298_v38 = vld [vmem:[#allocation2 + $0x2b9] ss:$2 sm:$0xff] }
  0x72   : > { %v1130_v34 = vld [vmem:[#allocation2 + $0x2d8] ss:$2 sm:$0xff]  ;;  %v1221_v36 = vpack.c.bf16 %v1136_v33, %v1134_v32  ;;  %v743_v40 = vld [vmem:[%s7001_s23 + $0x328] sm:$0xff]  ;;  %v744_v41 = vld [vmem:[%s7001_s23 + $0x330] sm:$0xff]  ;;  %v1389_v57 = vpack.c.bf16 %v1298_v38, %v1296_v37  ;;  %480 = vst.msk [vmem:[#allocation3 + $0x238] sm:$0xff] %vm471_vm4, %v6744_v0 }
  0x73   : > { %1635 = vrot.lane.b32.xlu0 %v1216_v48, %s6745_s24  ;;  %v742_v39 = vld [vmem:[%s7001_s23 + $0x320] sm:$0xff]  ;;  %v1220_v42 = vpack.c.bf16 %v1132_v35, %v1130_v34  ;;  %v1302_v44 = vld [vmem:[#allocation2 + $0x2e9] ss:$2 sm:$0xff]  ;;  %v745_v45 = vld [vmem:[%s7001_s23 + $0x338] sm:$0xff]  ;;  %872 = vst.msk [vmem:[#allocation2 + $0x4f0] sm:$0xff] %vm388_vm0, %v743_v40 }
  0x74   : > { %v1300_v43 = vld [vmem:[#allocation2 + $0x2d9] ss:$2 sm:$0xff]  ;;  %871 = vst.msk [vmem:[#allocation2 + $0x4e8] sm:$0xff] %vm388_vm0, %v742_v39  ;;  %873 = vst.msk [vmem:[#allocation2 + $0x4f8] sm:$0xff] %vm388_vm0, %v744_v41  ;;  %v751_v47 = vld [vmem:[%s7001_s23 + $0x368] sm:$0xff] }
  0x75   : > { %1737 = vrot.lane.b32.xlu1 %v1386_v53, %s6746_s25  ;;  %874 = vst.msk [vmem:[#allocation2 + $0x500] sm:$0xff] %vm388_vm0, %v745_v45  ;;  %v750_v46 = vld [vmem:[%s7001_s23 + $0x360] sm:$0xff]  ;;  %v752_v48 = vld [vmem:[%s7001_s23 + $0x370] sm:$0xff]  ;;  %v753_v50 = vld [vmem:[%s7001_s23 + $0x378] sm:$0xff]  ;;  %v1390_v53 = vpack.c.bf16 %v1302_v44, %v1300_v43 }
  0x76   : > { %v1304_v49 = vld [vmem:[#allocation2 + $0x309] ss:$2 sm:$0xff]  ;;  %879 = vst.msk [vmem:[#allocation2 + $0x548] sm:$0xff] %vm388_vm0, %v750_v46  ;;  %880 = vst.msk [vmem:[#allocation2 + $0x550] sm:$0xff] %vm388_vm0, %v751_v47  ;;  %v746_v51 = vld [vmem:[%s7001_s23 + $0x340] sm:$0xff] }
  0x77   : > { %1735 = vrot.lane.b32.xlu0 %v1385_v54, %s6746_s25  ;;  %881 = vst.msk [vmem:[#allocation2 + $0x558] sm:$0xff] %vm388_vm0, %v752_v48  ;;  %v747_v52 = vld [vmem:[%s7001_s23 + $0x348] sm:$0xff]  ;;  %v1306_v54 = vld [vmem:[#allocation2 + $0x319] ss:$2 sm:$0xff]  ;;  %882 = vst.msk [vmem:[#allocation2 + $0x560] sm:$0xff] %vm388_vm0, %v753_v50 }
  0x78   : > { %v748_v55 = vld [vmem:[%s7001_s23 + $0x350] sm:$0xff]  ;;  %v749_v56 = vld [vmem:[%s7001_s23 + $0x358] sm:$0xff]  ;;  %875 = vst.msk [vmem:[#allocation2 + $0x518] sm:$0xff] %vm388_vm0, %v746_v51  ;;  %876 = vst.msk [vmem:[#allocation2 + $0x520] sm:$0xff] %vm388_vm0, %v747_v52  ;;  %v1391_v1 = vpack.c.bf16 %v1306_v54, %v1304_v49 }
  0x79   : > { %1739 = vrot.lane.b32.xlu1 %v1387_v59, %s6746_s25  ;;  %v1138_v58 = vld [vmem:[#allocation2 + $0x338] ss:$2 sm:$0xff]  ;;  %877 = vst.msk [vmem:[#allocation2 + $0x528] sm:$0xff] %vm388_vm0, %v748_v55  ;;  %878 = vst.msk [vmem:[#allocation2 + $0x530] sm:$0xff] %vm388_vm0, %v749_v56  ;;  %v755_v60 = vld [vmem:[%s7001_s23 + $0x388] sm:$0xff] }
  0x7a   : > { %v754_v59 = vld [vmem:[%s7001_s23 + $0x380] sm:$0xff]  ;;  %v1140_v61 = vld [vmem:[#allocation2 + $0x348] ss:$2 sm:$0xff]  ;;  %v757_v63 = vld [vmem:[%s7001_s23 + $0x398] sm:$0xff]  ;;  %884 = vst.msk [vmem:[#allocation2 + $0x580] sm:$0xff] %vm388_vm0, %v755_v60 }
  0x7b   : > { %1639 = vrot.lane.b32.xlu0 %v1218_v2, %s6745_s24  ;;  %v756_v62 = vld [vmem:[%s7001_s23 + $0x390] sm:$0xff]  ;;  %883 = vst.msk [vmem:[#allocation2 + $0x578] sm:$0xff] %vm388_vm0, %v754_v59  ;;  %886 = vst.msk [vmem:[#allocation2 + $0x590] sm:$0xff] %vm388_vm0, %v757_v63  ;;  %v1222_v2 = vpack.c.bf16 %v1140_v61, %v1138_v58  ;;  %v1470_v3 = vld [vmem:[#allocation2 + $0x2da] ss:$2 sm:$0xff] }
  0x7c   : > { %885 = vst.msk [vmem:[#allocation2 + $0x588] sm:$0xff] %vm388_vm0, %v756_v62  ;;  %v1472_v4 = vld [vmem:[#allocation2 + $0x2ea] ss:$2 sm:$0xff]  ;;  %v1468_v6 = vld [vmem:[#allocation2 + $0x2ba] ss:$2 sm:$0xff] }
  0x7d   : > { %1839 = vrot.lane.b32.xlu1 %v1556_v13, %s6747_s26  ;;  %v1466_v5 = vld [vmem:[#allocation2 + $0x2aa] ss:$2 sm:$0xff]  ;;  %v1560_v7 = vpack.c.bf16 %v1472_v4, %v1470_v3  ;;  %v1476_v10 = vld [vmem:[#allocation2 + $0x31a] ss:$2 sm:$0xff]  ;;  %v1308_v11 = vld [vmem:[#allocation2 + $0x339] ss:$2 sm:$0xff] }
  0x7e   : > { %v1559_v8 = vpack.c.bf16 %v1468_v6, %v1466_v5  ;;  %v1474_v9 = vld [vmem:[#allocation2 + $0x30a] ss:$2 sm:$0xff]  ;;  %v1310_v12 = vld [vmem:[#allocation2 + $0x349] ss:$2 sm:$0xff]  ;;  %v758_v14 = vld [vmem:[%s7001_s23 + $0x3a0] sm:$0xff]  ;;  %519 = vst.msk [vmem:[#allocation4] sm:$0xff] %vm518_vm10, %v6744_v0 }
  0x7f   : > { %1837 = vrot.lane.b32.xlu0 %v1555_v17, %s6747_s26  ;;  %v1561_v13 = vpack.c.bf16 %v1476_v10, %v1474_v9  ;;  %v759_v15 = vld [vmem:[%s7001_s23 + $0x3a8] sm:$0xff]  ;;  %v760_v16 = vld [vmem:[%s7001_s23 + $0x3b0] sm:$0xff]  ;;  %v1392_v17 = vpack.c.bf16 %v1310_v12, %v1308_v11  ;;  %v1144_v19 = vld [vmem:[#allocation2 + $0x378] ss:$2 sm:$0xff]  ;;  %887 = vst.msk [vmem:[#allocation2 + $0x5a8] sm:$0xff] %vm388_vm0, %v758_v14 }
  0x80   : > { %v1142_v18 = vld [vmem:[#allocation2 + $0x368] ss:$2 sm:$0xff]  ;;  %v761_v20 = vld [vmem:[%s7001_s23 + $0x3b8] sm:$0xff]  ;;  %888 = vst.msk [vmem:[#allocation2 + $0x5b0] sm:$0xff] %vm388_vm0, %v759_v15  ;;  %889 = vst.msk [vmem:[#allocation2 + $0x5b8] sm:$0xff] %vm388_vm0, %v760_v16 }
  0x81   : > { %1841 = vrot.lane.b32.xlu1 %v1557_v24, %s6747_s26  ;;  %v1478_v21 = vld [vmem:[#allocation2 + $0x33a] ss:$2 sm:$0xff]  ;;  %v1480_v22 = vld [vmem:[#allocation2 + $0x34a] ss:$2 sm:$0xff]  ;;  %890 = vst.msk [vmem:[#allocation2 + $0x5c0] sm:$0xff] %vm388_vm0, %v761_v20  ;;  %v1223_v27 = vpack.c.bf16 %v1144_v19, %v1142_v18 }
  0x82   : > { %v762_v23 = vld [vmem:[%s7001_s23 + $0x3c0] sm:$0xff]  ;;  %v763_v24 = vld [vmem:[%s7001_s23 + $0x3c8] sm:$0xff]  ;;  %v765_v26 = vld [vmem:[%s7001_s23 + $0x3d8] sm:$0xff]  ;;  %502 = vst.msk [vmem:[#allocation3 + $0x58] sm:$0x1] %vm481_vm9, %v6744_v0 }
  0x83   : > { %1741 = vrot.lane.b32.xlu0 %v1388_v25, %s6746_s25  ;;  %v764_v25 = vld [vmem:[%s7001_s23 + $0x3d0] sm:$0xff]  ;;  %891 = vst.msk [vmem:[#allocation2 + $0x5d8] sm:$0xff] %vm388_vm0, %v762_v23  ;;  %v1152_v29 = vld [vmem:[#allocation2 + $0x3d8] ss:$2 sm:$0xff]  ;;  %892 = vst.msk [vmem:[#allocation2 + $0x5e0] sm:$0xff] %vm388_vm0, %v763_v24 }
  0x84   : > { %v1150_v28 = vld [vmem:[#allocation2 + $0x3c8] ss:$2 sm:$0xff]  ;;  %893 = vst.msk [vmem:[#allocation2 + $0x5e8] sm:$0xff] %vm388_vm0, %v764_v25  ;;  %894 = vst.msk [vmem:[#allocation2 + $0x5f0] sm:$0xff] %vm388_vm0, %v765_v26  ;;  %v769_v34 = vld [vmem:[%s7001_s23 + $0x3f8] sm:$0xff] }
  0x85   : > { %1641 = vrot.lane.b32.xlu1 %v1219_v30, %s6745_s24  ;;  %v766_v30 = vld [vmem:[%s7001_s23 + $0x3e0] sm:$0xff]  ;;  %v767_v32 = vld [vmem:[%s7001_s23 + $0x3e8] sm:$0xff]  ;;  %v768_v33 = vld [vmem:[%s7001_s23 + $0x3f0] sm:$0xff]  ;;  %898 = vst.msk [vmem:[#allocation2 + $0x620] sm:$0xff] %vm388_vm0, %v769_v34  ;;  %v1225_v37 = vpack.c.bf16 %v1152_v29, %v1150_v28  ;;  %s6749_s23 = smov 48  }
  0x86   : > { %895 = vst.msk [vmem:[#allocation2 + $0x608] sm:$0xff] %vm388_vm0, %v766_v30  ;;  %v1146_v35 = vld [vmem:[#allocation2 + $0x398] ss:$2 sm:$0xff]  ;;  %896 = vst.msk [vmem:[#allocation2 + $0x610] sm:$0xff] %vm388_vm0, %v767_v32  ;;  %v1316_v39 = vld [vmem:[#allocation2 + $0x399] ss:$2 sm:$0xff] }
  0x87   : > { %1843 = vrot.lane.b32.xlu0 %v1558_v31, %s6747_s26  ;;  %v1562_v31 = vpack.c.bf16 %v1480_v22, %v1478_v21  ;;  %897 = vst.msk [vmem:[#allocation2 + $0x618] sm:$0xff] %vm388_vm0, %v768_v33  ;;  %v1318_v40 = vld [vmem:[#allocation2 + $0x3a9] ss:$2 sm:$0xff]  ;;  %v1322_v46 = vld [vmem:[#allocation2 + $0x3d9] ss:$2 sm:$0xff] }
  0x88   : > { %v1312_v41 = vld [vmem:[#allocation2 + $0x369] ss:$2 sm:$0xff]  ;;  %v1394_v43 = vpack.c.bf16 %v1318_v40, %v1316_v39  ;;  %v1154_v47 = vld [vmem:[#allocation2 + $0x3f8] ss:$2 sm:$0xff]  ;;  %v1156_v48 = vld [vmem:[#allocation2 + $0x408] ss:$2 sm:$0xff] }
  0x89   : > { %1645 = vrot.lane.b32.xlu1 %v1221_v36, %s6745_s24  ;;  %v1148_v36 = vld [vmem:[#allocation2 + $0x3a8] ss:$2 sm:$0xff]  ;;  %v1320_v45 = vld [vmem:[#allocation2 + $0x3c9] ss:$2 sm:$0xff]  ;;  %v1226_v50 = vpack.c.bf16 %v1156_v48, %v1154_v47  ;;  %v1324_v60 = vld [vmem:[#allocation2 + $0x3f9] ss:$2 sm:$0xff] }
  0x8a   : > { %v1224_v38 = vpack.c.bf16 %v1148_v36, %v1146_v35  ;;  %v1395_v49 = vpack.c.bf16 %v1322_v46, %v1320_v45  ;;  %v1486_v51 = vld [vmem:[#allocation2 + $0x39a] ss:$2 sm:$0xff]  ;;  %v1488_v52 = vld [vmem:[#allocation2 + $0x3aa] ss:$2 sm:$0xff]  ;;  %v1326_v61 = vld [vmem:[#allocation2 + $0x409] ss:$2 sm:$0xff] }
  0x8b   : > { %1643 = vrot.lane.b32.xlu0 %v1220_v42, %s6745_s24  ;;  %v1314_v42 = vld [vmem:[#allocation2 + $0x379] ss:$2 sm:$0xff]  ;;  %v1484_v54 = vld [vmem:[#allocation2 + $0x37a] ss:$2 sm:$0xff]  ;;  %v1564_v55 = vpack.c.bf16 %v1488_v52, %v1486_v51  ;;  %v1496_v4 = vld [vmem:[#allocation2 + $0x40a] ss:$2 sm:$0xff]  ;;  %v1396_v5 = vpack.c.bf16 %v1326_v61, %v1324_v60 }
  0x8c   : > { %v1393_v44 = vpack.c.bf16 %v1314_v42, %v1312_v41  ;;  %v1492_v58 = vld [vmem:[#allocation2 + $0x3da] ss:$2 sm:$0xff]  ;;  %v1332_v16 = vld [vmem:[#allocation2 + $0x459] ss:$2 sm:$0xff]  ;;  %v1328_v19 = vld [vmem:[#allocation2 + $0x429] ss:$2 sm:$0xff] }
  0x8d   : > { %1745 = vrot.lane.b32.xlu1 %v1390_v53, %s6746_s25  ;;  %v1482_v53 = vld [vmem:[#allocation2 + $0x36a] ss:$2 sm:$0xff]  ;;  %v1494_v3 = vld [vmem:[#allocation2 + $0x3fa] ss:$2 sm:$0xff]  ;;  %v1330_v20 = vld [vmem:[#allocation2 + $0x439] ss:$2 sm:$0xff] }
  0x8e   : > { %v1563_v56 = vpack.c.bf16 %v1484_v54, %v1482_v53  ;;  %v1158_v63 = vld [vmem:[#allocation2 + $0x428] ss:$2 sm:$0xff]  ;;  %v1168_v9 = vld [vmem:[#allocation2 + $0x498] ss:$2 sm:$0xff]  ;;  %v1566_v11 = vpack.c.bf16 %v1496_v4, %v1494_v3  ;;  %v1336_v24 = vld [vmem:[#allocation2 + $0x489] ss:$2 sm:$0xff]  ;;  %v1397_v29 = vpack.c.bf16 %v1330_v20, %v1328_v19 }
  0x8f   : > { %1743 = vrot.lane.b32.xlu0 %v1389_v57, %s6746_s25  ;;  %v1490_v57 = vld [vmem:[#allocation2 + $0x3ca] ss:$2 sm:$0xff]  ;;  %v1338_v25 = vld [vmem:[#allocation2 + $0x499] ss:$2 sm:$0xff]  ;;  %v1500_v34 = vld [vmem:[#allocation2 + $0x43a] ss:$2 sm:$0xff] }
  0x90   : > { %v1162_v12 = vld [vmem:[#allocation2 + $0x458] ss:$2 sm:$0xff]  ;;  %v1172_v28 = vld [vmem:[#allocation2 + $0x4c8] ss:$2 sm:$0xff]  ;;  %v1399_v32 = vpack.c.bf16 %v1338_v25, %v1336_v24  ;;  %v1342_v46 = vld [vmem:[#allocation2 + $0x4c9] ss:$2 sm:$0xff] }
  0x91   : > { %1747 = vrot.lane.b32.xlu1 %v1391_v1, %s6746_s25  ;;  %v1160_v1 = vld [vmem:[#allocation2 + $0x438] ss:$2 sm:$0xff]  ;;  %v1174_v48 = vld [vmem:[#allocation2 + $0x4e8] ss:$2 sm:$0xff]  ;;  %v1348_v3 = vld [vmem:[#allocation2 + $0x519] ss:$2 sm:$0xff] }
  0x92   : > { %v1227_v10 = vpack.c.bf16 %v1160_v1, %v1158_v63  ;;  %v1498_v33 = vld [vmem:[#allocation2 + $0x42a] ss:$2 sm:$0xff]  ;;  %v1502_v36 = vld [vmem:[#allocation2 + $0x45a] ss:$2 sm:$0xff]  ;;  %v1350_v4 = vld [vmem:[#allocation2 + $0x529] ss:$2 sm:$0xff] }
  0x93   : > { %1647 = vrot.lane.b32.xlu0 %v1222_v2, %s6745_s24  ;;  %v1565_v2 = vpack.c.bf16 %v1492_v58, %v1490_v57  ;;  %v1567_v41 = vpack.c.bf16 %v1500_v34, %v1498_v33  ;;  %v1506_v42 = vld [vmem:[#allocation2 + $0x48a] ss:$2 sm:$0xff]  ;;  %v1510_v51 = vld [vmem:[#allocation2 + $0x4ba] ss:$2 sm:$0xff]  ;;  %482 = vst.msk [vmem:[#allocation3 + $0x7] sm:$0x1] %vm481_vm9, %v6744_v0 }
  0x94   : > { %v1512_v52 = vld [vmem:[#allocation2 + $0x4ca] ss:$2 sm:$0xff]  ;;  %483 = vst.msk [vmem:[#allocation3 + $0x27] sm:$0x1] %vm481_vm9, %v6744_v0  ;;  %484 = vst.msk [vmem:[#allocation3 + $0x47] sm:$0x1] %vm481_vm9, %v6744_v0 }
  0x95   : > { %1847 = vrot.lane.b32.xlu1 %v1560_v7, %s6747_s26  ;;  %v1184_v57 = vld [vmem:[#allocation2 + $0x558] ss:$2 sm:$0xff]  ;;  %v1570_v60 = vpack.c.bf16 %v1512_v52, %v1510_v51  ;;  %v1180_v63 = vld [vmem:[#allocation2 + $0x528] ss:$2 sm:$0xff]  ;;  %485 = vst.msk [vmem:[#allocation3 + $0x67] sm:$0x1] %vm481_vm9, %v6744_v0 }
  0x96   : > { %v1178_v61 = vld [vmem:[#allocation2 + $0x518] ss:$2 sm:$0xff]  ;;  %v1188_v19 = vld [vmem:[#allocation2 + $0x588] ss:$2 sm:$0xff]  ;;  %486 = vst.msk [vmem:[#allocation3 + $0x87] sm:$0x1] %vm481_vm9, %v6744_v0 }
  0x97   : > { %1845 = vrot.lane.b32.xlu0 %v1559_v8, %s6747_s26  ;;  %v1166_v8 = vld [vmem:[#allocation2 + $0x488] ss:$2 sm:$0xff]  ;;  %v1192_v52 = vld [vmem:[#allocation2 + $0x5b8] ss:$2 sm:$0xff]  ;;  %487 = vst.msk [vmem:[#allocation3 + $0xa7] sm:$0x1] %vm481_vm9, %v6744_v0 }
  0x98   : > { %v1229_v18 = vpack.c.bf16 %v1168_v9, %v1166_v8  ;;  %v1344_v8 = vld [vmem:[#allocation2 + $0x4e9] ss:$2 sm:$0xff]  ;;  %v1346_v9 = vld [vmem:[#allocation2 + $0x4f9] ss:$2 sm:$0xff]  ;;  %v1190_v51 = vld [vmem:[#allocation2 + $0x5a8] ss:$2 sm:$0xff] }
  0x99   : > { %1849 = vrot.lane.b32.xlu1 %v1561_v13, %s6747_s26  ;;  %v1164_v13 = vld [vmem:[#allocation2 + $0x468] ss:$2 sm:$0xff]  ;;  %v1401_v20 = vpack.c.bf16 %v1346_v9, %v1344_v8  ;;  %v1360_v8 = vld [vmem:[#allocation2 + $0x5a9] ss:$2 sm:$0xff]  ;;  %v1362_v9 = vld [vmem:[#allocation2 + $0x5b9] ss:$2 sm:$0xff] }
  0x9a   : > { %v1228_v21 = vpack.c.bf16 %v1164_v13, %v1162_v12  ;;  %v1352_v13 = vld [vmem:[#allocation2 + $0x549] ss:$2 sm:$0xff]  ;;  %488 = vst.msk [vmem:[#allocation3 + $0xc7] sm:$0x1] %vm481_vm9, %v6744_v0  ;;  %489 = vst.msk [vmem:[#allocation3 + $0xe7] sm:$0x1] %vm481_vm9, %v6744_v0 }
  0x9b   : > { %1749 = vrot.lane.b32.xlu0 %v1392_v17, %s6746_s25  ;;  %v1334_v17 = vld [vmem:[#allocation2 + $0x469] ss:$2 sm:$0xff]  ;;  %490 = vst.msk [vmem:[#allocation3 + $0x107] sm:$0x1] %vm481_vm9, %v6744_v0  ;;  %491 = vst.msk [vmem:[#allocation3 + $0x127] sm:$0x1] %vm481_vm9, %v6744_v0 }
  0x9c   : > { %v1398_v26 = vpack.c.bf16 %v1334_v17, %v1332_v16  ;;  %v1354_v16 = vld [vmem:[#allocation2 + $0x559] ss:$2 sm:$0xff]  ;;  %v1402_v17 = vpack.c.bf16 %v1350_v4, %v1348_v3  ;;  %492 = vst.msk [vmem:[#allocation3 + $0x147] sm:$0x1] %vm481_vm9, %v6744_v0  ;;  %493 = vst.msk [vmem:[#allocation3 + $0x167] sm:$0x1] %vm481_vm9, %v6744_v0 }
  0x9d   : > { %1649 = vrot.lane.b32.xlu1 %v1223_v27, %s6745_s24  ;;  %v1170_v27 = vld [vmem:[#allocation2 + $0x4b8] ss:$2 sm:$0xff]  ;;  %v1403_v25 = vpack.c.bf16 %v1354_v16, %v1352_v13  ;;  %v1198_v13 = vld [vmem:[#allocation2 + $0x608] ss:$2 sm:$0xff]  ;;  %494 = vst.msk [vmem:[#allocation3 + $0x187] sm:$0x1] %vm481_vm9, %v6744_v0 }
  0x9e   : > { %v1230_v35 = vpack.c.bf16 %v1172_v28, %v1170_v27  ;;  %v1516_v27 = vld [vmem:[#allocation2 + $0x4fa] ss:$2 sm:$0xff]  ;;  %495 = vst.msk [vmem:[#allocation3 + $0x1a7] sm:$0x1] %vm481_vm9, %v6744_v0  ;;  %496 = vst.msk [vmem:[#allocation3 + $0x1c7] sm:$0x1] %vm481_vm9, %v6744_v0 }
  0x9f   : > { %1851 = vrot.lane.b32.xlu0 %v1562_v31, %s6747_s26  ;;  %v1200_v16 = vld [vmem:[#allocation2 + $0x618] ss:$2 sm:$0xff]  ;;  %497 = vst.msk [vmem:[#allocation3 + $0x1e7] sm:$0x1] %vm481_vm9, %v6744_v0  ;;  %498 = vst.msk [vmem:[#allocation3 + $0x207] sm:$0x1] %vm481_vm9, %v6744_v0 }
  0xa0   : > { %499 = vst.msk [vmem:[#allocation3 + $0x227] sm:$0x1] %vm481_vm9, %v6744_v0  ;;  %500 = vst.msk [vmem:[#allocation3 + $0x18] sm:$0x1] %vm481_vm9, %v6744_v0 }
  0xa1   : > { %1653 = vrot.lane.b32.xlu1 %v1225_v37, %s6745_s24  ;;  %v1504_v37 = vld [vmem:[#allocation2 + $0x46a] ss:$2 sm:$0xff]  ;;  %501 = vst.msk [vmem:[#allocation3 + $0x38] sm:$0x1] %vm481_vm9, %v6744_v0  ;;  %503 = vst.msk [vmem:[#allocation3 + $0x78] sm:$0x1] %vm481_vm9, %v6744_v0 }
  0xa2   : > { %v1568_v40 = vpack.c.bf16 %v1504_v37, %v1502_v36  ;;  %v1522_v37 = vld [vmem:[#allocation2 + $0x54a] ss:$2 sm:$0xff]  ;;  %504 = vst.msk [vmem:[#allocation3 + $0x98] sm:$0x1] %vm481_vm9, %v6744_v0  ;;  %505 = vst.msk [vmem:[#allocation3 + $0xb8] sm:$0x1] %vm481_vm9, %v6744_v0 }
  0xa3   : > { %1651 = vrot.lane.b32.xlu0 %v1224_v38, %s6745_s24  ;;  %506 = vst.msk [vmem:[#allocation3 + $0xd8] sm:$0x1] %vm481_vm9, %v6744_v0  ;;  %507 = vst.msk [vmem:[#allocation3 + $0xf8] sm:$0x1] %vm481_vm9, %v6744_v0 }
  0xa4   : > { %508 = vst.msk [vmem:[#allocation3 + $0x118] sm:$0x1] %vm481_vm9, %v6744_v0  ;;  %509 = vst.msk [vmem:[#allocation3 + $0x138] sm:$0x1] %vm481_vm9, %v6744_v0 }
  0xa5   : > { %1753 = vrot.lane.b32.xlu1 %v1394_v43, %s6746_s25  ;;  %v1508_v43 = vld [vmem:[#allocation2 + $0x49a] ss:$2 sm:$0xff]  ;;  %510 = vst.msk [vmem:[#allocation3 + $0x158] sm:$0x1] %vm481_vm9, %v6744_v0  ;;  %511 = vst.msk [vmem:[#allocation3 + $0x178] sm:$0x1] %vm481_vm9, %v6744_v0 }
  0xa6   : > { %512 = vst.msk [vmem:[#allocation3 + $0x198] sm:$0x1] %vm481_vm9, %v6744_v0  ;;  %513 = vst.msk [vmem:[#allocation3 + $0x1b8] sm:$0x1] %vm481_vm9, %v6744_v0 }
  0xa7   : > { %1751 = vrot.lane.b32.xlu0 %v1393_v44, %s6746_s25  ;;  %v1340_v44 = vld [vmem:[#allocation2 + $0x4b9] ss:$2 sm:$0xff]  ;;  %514 = vst.msk [vmem:[#allocation3 + $0x1d8] sm:$0x1] %vm481_vm9, %v6744_v0  ;;  %515 = vst.msk [vmem:[#allocation3 + $0x1f8] sm:$0x1] %vm481_vm9, %v6744_v0 }
  0xa8   : > { %v1400_v53 = vpack.c.bf16 %v1342_v46, %v1340_v44  ;;  %516 = vst.msk [vmem:[#allocation3 + $0x218] sm:$0x1] %vm481_vm9, %v6744_v0  ;;  %517 = vst.msk [vmem:[#allocation3 + $0x238] sm:$0x1] %vm481_vm9, %v6744_v0  ;;  %vm579_vm9 = vsmask.f32 2304 }
  0xa9   : > { %1755 = vrot.lane.b32.xlu1 %v1395_v49, %s6746_s25  ;;  %v1176_v49 = vld [vmem:[#allocation2 + $0x4f8] ss:$2 sm:$0xff]  ;;  %520 = vst.msk [vmem:[#allocation4 + $0x8] sm:$0xff] %vm518_vm10, %v6744_v0  ;;  %521 = vst.msk [vmem:[#allocation4 + $0x10] sm:$0xff] %vm518_vm10, %v6744_v0 }
  0xaa   : > { %v1231_v58 = vpack.c.bf16 %v1176_v49, %v1174_v48  ;;  %v1526_v48 = vld [vmem:[#allocation2 + $0x57a] ss:$2 sm:$0xff]  ;;  %v1528_v49 = vld [vmem:[#allocation2 + $0x58a] ss:$2 sm:$0xff]  ;;  %522 = vst.msk [vmem:[#allocation4 + $0x18] sm:$0xff] %vm518_vm10, %v6744_v0  ;;  %524 = vst.msk [vmem:[#allocation4 + $0x120] sm:$0xff] %vm518_vm10, %v6744_v0 }
  0xab   : > { %1655 = vrot.lane.b32.xlu0 %v1226_v50, %s6745_s24  ;;  %v7317_v59 = vpop.permute.xlu1 %1619  ;;  %v1569_v50 = vpack.c.bf16 %v1508_v43, %v1506_v42  ;;  %v1358_v43 = vld [vmem:[#allocation2 + $0x589] ss:$2 sm:$0xff]  ;;  %v1574_v3 = vpack.c.bf16 %v1528_v49, %v1526_v48  ;;  %525 = vst.msk [vmem:[#allocation4 + $0x128] sm:$0xff] %vm518_vm10, %v6744_v0  ;;  %526 = vst.msk [vmem:[#allocation4 + $0x130] sm:$0xff] %vm518_vm10, %v6744_v0 }
  0xac   : > { %v6568_v48 = vld [vmem:[%s9028_s1 + $0x8] sm:$0xff]   ;;  %527 = vst.msk [vmem:[#allocation4 + $0x138] sm:$0xff] %vm518_vm10, %v6744_v0 }
  0xad   : > { %v7319_v62 = vpop.permute.xlu0 %1615  ;;  %1855 = vrot.lane.b32.xlu1 %v1564_v55, %s6747_s26  ;;  %548 = vst.msk [vmem:[#allocation4 + $0x130] sm:$0x1] %vm528_vm13, %v6744_v0  ;;  %529 = vst.msk [vmem:[#allocation4 + $0x7] sm:$0x1] %vm528_vm13, %v6744_v0 }
  0xae   : > { %530 = vst.msk [vmem:[#allocation4 + $0x27] sm:$0x1] %vm528_vm13, %v6744_v0  ;;  %531 = vst.msk [vmem:[#allocation4 + $0x47] sm:$0x1] %vm528_vm13, %v6744_v0 }
  0xaf   : > { %1853 = vrot.lane.b32.xlu0 %v1563_v56, %s6747_s26  ;;  %v7323_v6 = vpop.permute.xlu1 %1717  ;;  %v1182_v56 = vld [vmem:[#allocation2 + $0x548] ss:$2 sm:$0xff]  ;;  %532 = vst.msk [vmem:[#allocation4 + $0x67] sm:$0x1] %vm528_vm13, %v6744_v0  ;;  %533 = vst.msk [vmem:[#allocation4 + $0x87] sm:$0x1] %vm528_vm13, %v6744_v0 }
  0xb0   : > { %534 = vst.msk [vmem:[#allocation4 + $0xa7] sm:$0x1] %vm528_vm13, %v6744_v0  ;;  %535 = vst.msk [vmem:[#allocation4 + $0xc7] sm:$0x1] %vm528_vm13, %v6744_v0 }
  0xb1   : > { %v7325_v7 = vpop.permute.xlu0 %1617  ;;  %1857 = vrot.lane.b32.xlu1 %v1565_v2, %s6747_s26  ;;  %536 = vst.msk [vmem:[#allocation4 + $0xe7] sm:$0x1] %vm528_vm13, %v6744_v0  ;;  %537 = vst.msk [vmem:[#allocation4 + $0x107] sm:$0x1] %vm528_vm13, %v6744_v0 }
  0xb2   : > { %538 = vst.msk [vmem:[#allocation4 + $0x127] sm:$0x1] %vm528_vm13, %v6744_v0  ;;  %539 = vst.msk [vmem:[#allocation4 + $0x10] sm:$0x1] %vm528_vm13, %v6744_v0 }
  0xb3   : > { %1757 = vrot.lane.b32.xlu0 %v1396_v5, %s6746_s25  ;;  %v7329_v14 = vpop.permute.xlu1 %1719  ;;  %v1233_v5 = vpack.c.bf16 %v1184_v57, %v1182_v56  ;;  %v1070_v57 = vld [vmem:[#allocation2 + $0x8] ss:$2 sm:$0xff]  ;;  %540 = vst.msk [vmem:[#allocation4 + $0x30] sm:$0x1] %vm528_vm13, %v6744_v0  ;;  %541 = vst.msk [vmem:[#allocation4 + $0x50] sm:$0x1] %vm528_vm13, %v6744_v0 }
  0xb4   : > { %542 = vst.msk [vmem:[#allocation4 + $0x70] sm:$0x1] %vm528_vm13, %v6744_v0  ;;  %543 = vst.msk [vmem:[#allocation4 + $0x90] sm:$0x1] %vm528_vm13, %v6744_v0 }
  0xb5   : > { %v7331_v15 = vpop.permute.xlu0 %1621  ;;  %1657 = vrot.lane.b32.xlu1 %v1227_v10, %s6745_s24  ;;  %v1232_v10 = vpack.c.bf16 %v1180_v63, %v1178_v61  ;;  %v1194_v61 = vld [vmem:[#allocation2 + $0x5d8] ss:$2 sm:$0xff]  ;;  %v1196_v63 = vld [vmem:[#allocation2 + $0x5e8] ss:$2 sm:$0xff]  ;;  %544 = vst.msk [vmem:[#allocation4 + $0xb0] sm:$0x1] %vm528_vm13, %v6744_v0 }
  0xb6   : > { %545 = vst.msk [vmem:[#allocation4 + $0xd0] sm:$0x1] %vm528_vm13, %v6744_v0  ;;  %546 = vst.msk [vmem:[#allocation4 + $0xf0] sm:$0x1] %vm528_vm13, %v6744_v0 }
  0xb7   : > { %1859 = vrot.lane.b32.xlu0 %v1566_v11, %s6747_s26  ;;  %v7335_v22 = vpop.permute.xlu1 %1819  ;;  %547 = vst.msk [vmem:[#allocation4 + $0x110] sm:$0x1] %vm528_vm13, %v6744_v0  ;;  %vm557_vm13 = vcmask 257027  }
  0xb9   : > { %v7337_v23 = vpop.permute.xlu0 %1721  ;;  %1661 = vrot.lane.b32.xlu1 %v1229_v18, %s6745_s24  ;;  %v1186_v18 = vld [vmem:[#allocation2 + $0x578] ss:$2 sm:$0xff] }
  0xba   : > { %v1234_v28 = vpack.c.bf16 %v1188_v19, %v1186_v18 }
  0xbb   : > { %1659 = vrot.lane.b32.xlu0 %v1228_v21, %s6745_s24  ;;  %v7341_v30 = vpop.permute.xlu1 %1723 }
  0xbd   : > { %v7343_v31 = vpop.permute.xlu0 %1623  ;;  %1761 = vrot.lane.b32.xlu1 %v1398_v26, %s6746_s25  ;;  %v1514_v26 = vld [vmem:[#allocation2 + $0x4ea] ss:$2 sm:$0xff] }
  0xbe   : > { %v1571_v36 = vpack.c.bf16 %v1516_v27, %v1514_v26  ;;  %v1405_v26 = vpack.c.bf16 %v1362_v9, %v1360_v8  ;;  %v1364_v27 = vld [vmem:[#allocation2 + $0x5d9] ss:$2 sm:$0xff] }
  0xbf   : > { %1759 = vrot.lane.b32.xlu0 %v1397_v29, %s6746_s25  ;;  %v7347_v38 = vpop.permute.xlu1 %1823  ;;  %v1518_v29 = vld [vmem:[#allocation2 + $0x51a] ss:$2 sm:$0xff] }
  0xc1   : > { %v7349_v39 = vpop.permute.xlu0 %1821  ;;  %1763 = vrot.lane.b32.xlu1 %v1399_v32, %s6746_s25  ;;  %v1520_v32 = vld [vmem:[#allocation2 + $0x52a] ss:$2 sm:$0xff] }
  0xc3   : > { %1663 = vrot.lane.b32.xlu0 %v1230_v35, %s6745_s24  ;;  %v7353_v45 = vpop.permute.xlu1 %1825  ;;  %v1572_v35 = vpack.c.bf16 %v1520_v32, %v1518_v29  ;;  %v6567_v29 = vld [vmem:[%s9028_s1] sm:$0xff]   ;;  %v1237_v32 = vpack.c.bf16 %v1200_v16, %v1198_v13 }
  0xc4   : > { %6478 = vmatprep.subr.bf16.mxu0 %v6567_v29  ;;  %v1412_v13 = vld [vmem:[#allocation2 + $0x1a] ss:$2 sm:$0xff] }
  0xc5   : > { %v7355_v47 = vpop.permute.xlu0 %1725  ;;  %1863 = vrot.lane.b32.xlu1 %v1568_v40, %s6747_s26  ;;  %v1524_v40 = vld [vmem:[#allocation2 + $0x55a] ss:$2 sm:$0xff]  ;;  %6479 = vmatpush3.bf16.msra.mxu0 %v6567_v29 }
  0xc6   : > { %v1573_v46 = vpack.c.bf16 %v1524_v40, %v1522_v37  ;;  %v1368_v37 = vld [vmem:[#allocation2 + $0x609] ss:$2 sm:$0xff]  ;;  %v1370_v40 = vld [vmem:[#allocation2 + $0x619] ss:$2 sm:$0xff]  ;;  %6480 = vmatprep.subr.bf16.mxu0 %v6568_v48  ;;  %v1542_v29 = vld [vmem:[#allocation2 + $0x63a] ss:$2 sm:$0xff] }
  0xc7   : > { %1861 = vrot.lane.b32.xlu0 %v1567_v41, %s6747_s26  ;;  %v7359_v54 = vpop.permute.xlu1 %1625  ;;  %v1356_v41 = vld [vmem:[#allocation2 + $0x579] ss:$2 sm:$0xff] }
  0xc9   : > { %v7361_v55 = vpop.permute.xlu0 %1827  ;;  %1865 = vrot.lane.b32.xlu1 %v1569_v50, %s6747_s26  ;;  %v1404_v50 = vpack.c.bf16 %v1358_v43, %v1356_v41  ;;  %v1240_v43 = vld [vmem:[#allocation2 + $0x9] ss:$2 sm:$0xff]  ;;  %6481 = vmatpush3.bf16.msra.mxu0 %v6568_v48 }
  0xca   : > { %v906_v48 = vld [vmem:[#allocation2 + $0x47] ss:$2 sm:$0xff] }
  0xcb   : > { %1765 = vrot.lane.b32.xlu0 %v1400_v53, %s6746_s25  ;;  %v7365_v1 = vpop.permute.xlu1 %1629 }
  0xcd   : > { %v7367_v2 = vpop.permute.xlu0 %1627  ;;  %1665 = vrot.lane.b32.xlu1 %v1231_v58, %s6745_s24  ;;  %v1072_v58 = vld [vmem:[#allocation2 + $0x18] ss:$2 sm:$0xff] }
  0xcf   : > { %1867 = vrot.lane.b32.xlu0 %v1570_v60, %s6747_s26  ;;  %v7371_v11 = vpop.permute.xlu1 %1729  ;;  %v1235_v60 = vpack.c.bf16 %v1192_v52, %v1190_v51  ;;  %v1534_v52 = vld [vmem:[#allocation2 + $0x5da] ss:$2 sm:$0xff] }
  0xd1   : > { %v7373_v12 = vpop.permute.xlu0 %1727  ;;  %1669 = vrot.lane.b32.xlu1 %v1233_v5, %s6745_s24 }
  0xd3   : > { %1667 = vrot.lane.b32.xlu0 %v1232_v10, %s6745_s24  ;;  %v7377_v21 = vpop.permute.xlu1 %1731  ;;  %v1205_v10 = vpack.c.bf16 %v1072_v58, %v1070_v57  ;;  %v1536_v57 = vld [vmem:[#allocation2 + $0x5ea] ss:$2 sm:$0xff]  ;;  %v1407_v58 = vpack.c.bf16 %v1370_v40, %v1368_v37  ;;  %v914_v37 = vld [vmem:[#allocation2 + $0xa7] ss:$2 sm:$0xff]  ;;  %v912_v40 = vld [vmem:[#allocation2 + $0x97] ss:$2 sm:$0xff] }
  0xd4   : > { %v1576_v16 = vpack.c.bf16 %v1536_v57, %v1534_v52  ;;  %v1540_v57 = vld [vmem:[#allocation2 + $0x61a] ss:$2 sm:$0xff] }
  0xd5   : > { %v7379_v24 = vpop.permute.xlu0 %1631  ;;  %1769 = vrot.lane.b32.xlu1 %v1402_v17, %s6746_s25  ;;  %v1236_v17 = vpack.c.bf16 %v1196_v63, %v1194_v61  ;;  %v1532_v61 = vld [vmem:[#allocation2 + $0x5ba] ss:$2 sm:$0xff]  ;;  %v6569_v63 = vld [vmem:[%s9028_s1 + $0x10] sm:$0xff]  }
  0xd6   : > { %6482 = vmatprep.subr.bf16.mxu0 %v6569_v63 }
  0xd7   : > { %1767 = vrot.lane.b32.xlu0 %v1401_v20, %s6746_s25  ;;  %v7383_v33 = vpop.permute.xlu1 %1831  ;;  %v1202_v20 = vld [vmem:[#allocation2 + $0x638] ss:$2 sm:$0xff]  ;;  %6483 = vmatpush3.bf16.msra.mxu0 %v6569_v63  ;;  %v918_v63 = vld [vmem:[#allocation2 + $0xd7] ss:$2 sm:$0xff] }
  0xd9   : > { %v7385_v34 = vpop.permute.xlu0 %1829  ;;  %1771 = vrot.lane.b32.xlu1 %v1403_v25, %s6746_s25  ;;  %v1204_v25 = vld [vmem:[#allocation2 + $0x648] ss:$2 sm:$0xff] }
  0xda   : > { %v1238_v41 = vpack.c.bf16 %v1204_v25, %v1202_v20  ;;  %v6570_v20 = vld [vmem:[%s9028_s1 + $0x18] sm:$0xff]  }
  0xdb   : > { %1671 = vrot.lane.b32.xlu0 %v1234_v28, %s6745_s24  ;;  %v7389_v42 = vpop.permute.xlu1 %1833  ;;  %v1366_v28 = vld [vmem:[#allocation2 + $0x5e9] ss:$2 sm:$0xff]  ;;  %6484 = vmatprep.subr.bf16.mxu0 %v6570_v20 }
  0xdc   : > { %v1406_v49 = vpack.c.bf16 %v1366_v28, %v1364_v27  ;;  %6485 = vmatpush3.bf16.msra.mxu0 %v6570_v20 }
  0xdd   : > { %v7391_v44 = vpop.permute.xlu0 %1733  ;;  %1871 = vrot.lane.b32.xlu1 %v1572_v35, %s6747_s26 }
  0xdf   : > { %1869 = vrot.lane.b32.xlu0 %v1571_v36, %s6747_s26  ;;  %v7395_v53 = vpop.permute.xlu1 %1633 }
  0xe1   : > { %v7397_v56 = vpop.permute.xlu0 %1835  ;;  %1873 = vrot.lane.b32.xlu1 %v1573_v46, %s6747_s26  ;;  %v1242_v46 = vld [vmem:[#allocation2 + $0x19] ss:$2 sm:$0xff] }
  0xe3   : > { %1773 = vrot.lane.b32.xlu0 %v1404_v50, %s6746_s25  ;;  %v7401_v4 = vpop.permute.xlu1 %1637 }
  0xe5   : > { %v7403_v5 = vpop.permute.xlu0 %1635  ;;  %1673 = vrot.lane.b32.xlu1 %v1235_v60, %s6745_s24  ;;  %v1530_v60 = vld [vmem:[#allocation2 + $0x5aa] ss:$2 sm:$0xff] }
  0xe6   : > { %v1575_v25 = vpack.c.bf16 %v1532_v61, %v1530_v60  ;;  %v916_v61 = vld [vmem:[#allocation2 + $0xc7] ss:$2 sm:$0xff] }
  0xe7   : > { %1875 = vrot.lane.b32.xlu0 %v1574_v3, %s6747_s26  ;;  %v7407_v18 = vpop.permute.xlu1 %1737  ;;  %v1375_v3 = vpack.c.bf16 %v1242_v46, %v1240_v43  ;;  %v1538_v43 = vld [vmem:[#allocation2 + $0x60a] ss:$2 sm:$0xff]  ;;  %v6571_v46 = vld [vmem:[%s9028_s1 + $0x20] sm:$0xff]  }
  0xe8   : > { %6486 = vmatprep.subr.bf16.mxu0 %v6571_v46  ;;  %v1577_v20 = vpack.c.bf16 %v1540_v57, %v1538_v43 }
  0xe9   : > { %v7409_v19 = vpop.permute.xlu0 %1735  ;;  %1613 = vrot.lane.b32.xlu1 %v1205_v10, %s6745_s24  ;;  %v1410_v10 = vld [vmem:[#allocation2 + $0xa] ss:$2 sm:$0xff]  ;;  %6487 = vmatpush3.bf16.msra.mxu0 %v6571_v46 }
  0xeb   : > { %1675 = vrot.lane.b32.xlu0 %v1236_v17, %s6745_s24  ;;  %v7416_v35 = vpop.permute.xlu1 %1739  ;;  %v1372_v17 = vld [vmem:[#allocation2 + $0x639] ss:$2 sm:$0xff] }
  0xed   : > { %v7418_v36 = vpop.permute.xlu0 %1639  ;;  %1775 = vrot.lane.b32.xlu1 %v1405_v26, %s6746_s25  ;;  %v1374_v26 = vld [vmem:[#allocation2 + $0x649] ss:$2 sm:$0xff] }
  0xee   : > { %v1408_v52 = vpack.c.bf16 %v1374_v26, %v1372_v17  ;;  %v910_v17 = vld [vmem:[#allocation2 + $0x77] ss:$2 sm:$0xff] }
  0xef   : > { %1677 = vrot.lane.b32.xlu0 %v1237_v32, %s6745_s24  ;;  %v7425_v50 = vpop.permute.xlu1 %1839  ;;  %v1544_v32 = vld [vmem:[#allocation2 + $0x64a] ss:$2 sm:$0xff] }
  0xf1   : > { %v7427_v51 = vpop.permute.xlu0 %1837  ;;  %1679 = vrot.lane.b32.xlu1 %v1238_v41, %s6745_s24  ;;  %v1545_v41 = vpack.c.bf16 %v1412_v13, %v1410_v10  ;;  %v6572_v10 = vld [vmem:[%s9028_s1 + $0x28] sm:$0xff]   ;;  %v1038_v13 = vpack.c.bf16 %v914_v37, %v912_v40  ;;  %v1039_v37 = vpack.c.bf16 %v918_v63, %v916_v61  ;;  %v928_v61 = vld [vmem:[#allocation2 + $0x157] ss:$2 sm:$0xff]  ;;  %s6750_s24 = smov 72  }
  0xf2   : > { %6488 = vmatprep.subr.bf16.mxu0 %v6572_v10  ;;  %v930_v63 = vld [vmem:[#allocation2 + $0x167] ss:$2 sm:$0xff] }
  0xf3   : > { %1777 = vrot.lane.b32.xlu0 %v1406_v49, %s6746_s25  ;;  %v7434_v8 = vpop.permute.xlu1 %1841  ;;  %v904_v49 = vld [vmem:[#allocation2 + $0x37] ss:$2 sm:$0xff]  ;;  %6489 = vmatpush3.bf16.msra.mxu0 %v6572_v10 }
  0xf5   : > { %v7436_v9 = vpop.permute.xlu0 %1741  ;;  %1779 = vrot.lane.b32.xlu1 %v1407_v58, %s6746_s25 }
  0xf7   : > { %1715 = vrot.lane.b32.xlu0 %v1375_v3, %s6746_s25  ;;  %v7443_v27 = vpop.permute.xlu1 %1641  ;;  %v1578_v3 = vpack.c.bf16 %v1544_v32, %v1542_v29  ;;  %v922_v29 = vld [vmem:[#allocation2 + $0x107] ss:$2 sm:$0xff]  ;;  %v1896_v32 = vsel %vm388_vm0, %v1038_v13, %v7317_v59 }
  0xf9   : > { %v7445_v28 = vpop.permute.xlu0 %1843  ;;  %1879 = vrot.lane.b32.xlu1 %v1576_v16, %s6747_s26  ;;  %v908_v16 = vld [vmem:[#allocation2 + $0x67] ss:$2 sm:$0xff] }
  0xfa   : > { %v1037_v43 = vpack.c.bf16 %v910_v17, %v908_v16  ;;  %v934_v17 = vld [vmem:[#allocation2 + $0x197] ss:$2 sm:$0xff] }
  0xfb   : > { %1877 = vrot.lane.b32.xlu0 %v1575_v25, %s6747_s26  ;;  %v7452_v58 = vpop.permute.xlu1 %1645  ;;  %v1036_v25 = vpack.c.bf16 %v906_v48, %v904_v49  ;;  %v1995_v48 = vsel %vm1987_vm2, %v1896_v32, %v7337_v23 }
  0xfc   : > { %v2064_v57 = vsel %vm2056_vm3, %v1995_v48, %v7347_v38 }
  0xfd   : > { %v7454_v60 = vpop.permute.xlu0 %1643  ;;  %1817 = vrot.lane.b32.xlu1 %v1545_v41, %s6747_s26  ;;  %v920_v41 = vld [vmem:[#allocation2 + $0xf7] ss:$2 sm:$0xff]  ;;  %v1890_v40 = vsel %vm388_vm0, %v1036_v25, %v7319_v62  ;;  %v1899_v62 = vsel %vm388_vm0, %v1039_v37, %v7331_v15 }
  0xfe   : > { %v1040_v23 = vpack.c.bf16 %v922_v29, %v920_v41  ;;  %v1997_v38 = vsel %vm1987_vm2, %v1899_v62, %v7341_v30  ;;  %v1042_v30 = vpack.c.bf16 %v930_v63, %v928_v61  ;;  %v926_v25 = vld [vmem:[#allocation2 + $0x137] ss:$2 sm:$0xff] }
  0xff   : > { %1781 = vrot.lane.b32.xlu0 %v1408_v52, %s6746_s25  ;;  %v7461_v26 = vpop.permute.xlu1 %1745  ;;  %v1991_v52 = vsel %vm1987_vm2, %v1890_v40, %v7323_v6  ;;  %v1893_v6 = vsel %vm388_vm0, %v1037_v43, %v7325_v7  ;;  %v7497_v13 = vsel %vm2056_vm3, %v1997_v38, %v7353_v45  ;;  %v932_v45 = vld [vmem:[#allocation2 + $0x187] ss:$2 sm:$0xff]  ;;  %v936_v40 = vld [vmem:[#allocation2 + $0x1b7] ss:$2 sm:$0xff]  ;;  %s6751_s25 = smov 16  }
 0x100   : > { %v2060_v59 = vsel %vm2056_vm3, %v1991_v52, %v7335_v22  ;;  %v1993_v22 = vsel %vm1987_vm2, %v1893_v6, %v7329_v14  ;;  %v1902_v7 = vsel %vm388_vm0, %v1040_v23, %v7343_v31  ;;  %v1043_v31 = vpack.c.bf16 %v934_v17, %v932_v45  ;;  %v938_v43 = vld [vmem:[#allocation2 + $0x1c7] ss:$2 sm:$0xff]  ;;  %v944_v62 = vld [vmem:[#allocation2 + $0x217] ss:$2 sm:$0xff] }
 0x101   : > { %v7463_v46 = vpop.permute.xlu0 %1743  ;;  %1883 = vrot.lane.b32.xlu1 %v1578_v3, %s6747_s26  ;;  %v7503_v16 = vsel %vm2056_vm3, %v1993_v22, %v7349_v39  ;;  %v1999_v14 = vsel %vm1987_vm2, %v1902_v7, %v7355_v47  ;;  %v924_v39 = vld [vmem:[#allocation2 + $0x127] ss:$2 sm:$0xff]  ;;  %v1908_v32 = vsel %vm388_vm0, %v1042_v30, %v7367_v2  ;;  %v950_v63 = vld [vmem:[#allocation2 + $0x257] ss:$2 sm:$0xff] }
 0x102   : > { %v2068_v41 = vsel %vm2056_vm3, %v1999_v14, %v7361_v55  ;;  %v1041_v47 = vpack.c.bf16 %v926_v25, %v924_v39  ;;  %v2003_v37 = vsel %vm1987_vm2, %v1908_v32, %v7371_v11  ;;  %v1911_v2 = vsel %vm388_vm0, %v1043_v31, %v7365_v1  ;;  %v946_v23 = vld [vmem:[#allocation2 + $0x227] ss:$2 sm:$0xff]  ;;  %v952_v39 = vld [vmem:[#allocation2 + $0x277] ss:$2 sm:$0xff] }
 0x103   : > { %1881 = vrot.lane.b32.xlu0 %v1577_v20, %s6747_s26  ;;  %v7473_v49 = vpop.permute.xlu1 %1747  ;;  %v2072_v55 = vsel %vm2056_vm3, %v2003_v37, %v7383_v33  ;;  %v940_v7 = vld [vmem:[#allocation2 + $0x1e7] ss:$2 sm:$0xff]  ;;  %v960_v37 = vld [vmem:[#allocation2 + $0x2d7] ss:$2 sm:$0xff]  ;;  %s6752_s26 = smov 8  }
 0x104   : > { %v1905_v11 = vsel %vm388_vm0, %v1041_v47, %v7359_v54  ;;  %v954_v25 = vld [vmem:[#allocation2 + $0x287] ss:$2 sm:$0xff] }
 0x105   : > { %v7479_v3 = vpop.permute.xlu0 %1647  ;;  %2143 = vrot.lane.b32.xlu1 %v2064_v57, %s6748_s22  ;;  %v2001_v33 = vsel %vm1987_vm2, %v1905_v11, %v7373_v12  ;;  %v1048_v32 = vpack.c.bf16 %v954_v25, %v952_v39  ;;  %v982_v39 = vld [vmem:[#allocation2 + $0x3d7] ss:$2 sm:$0xff] }
 0x106   : > { %v7551_v61 = vsel %vm2056_vm3, %v2001_v33, %v7385_v34  ;;  %v942_v34 = vld [vmem:[#allocation2 + $0x1f7] ss:$2 sm:$0xff] }
 0x107   : > { %2141 = vrot.lane.b32.xlu0 %v2060_v59, %s6748_s22  ;;  %v7491_v10 = vpop.permute.xlu1 %1847  ;;  %v1044_v59 = vpack.c.bf16 %v938_v43, %v936_v40  ;;  %v962_v40 = vld [vmem:[#allocation2 + $0x2e7] ss:$2 sm:$0xff] }
 0x109   : > { %v7499_v15 = vpop.permute.xlu0 %1845  ;;  %2191 = vrot.lane.b32.xlu1 %v7497_v13, %s6749_s23  ;;  %v1914_v54 = vsel %vm388_vm0, %v1044_v59, %v7379_v24  ;;  %v966_v59 = vld [vmem:[#allocation2 + $0x317] ss:$2 sm:$0xff] }
 0x10a   : > { %v2007_v12 = vsel %vm1987_vm2, %v1914_v54, %v7391_v44  ;;  %v1045_v44 = vpack.c.bf16 %v942_v34, %v940_v7 }
 0x10b   : > { %2189 = vrot.lane.b32.xlu0 %v7503_v16, %s6749_s23  ;;  %v7513_v20 = vpop.permute.xlu1 %1849  ;;  %v2076_v30 = vsel %vm2056_vm3, %v2007_v12, %v7397_v56  ;;  %v970_v12 = vld [vmem:[#allocation2 + $0x347] ss:$2 sm:$0xff] }
 0x10d   : > { %v7517_v29 = vpop.permute.xlu0 %1749  ;;  %2224 = vrot.lane.b32.xlu1 %v2068_v41, %s6750_s24 }
 0x10f   : > { %2222 = vrot.lane.b32.xlu0 %v2064_v57, %s6750_s24  ;;  %v7525_v48 = vpop.permute.xlu1 %1649  ;;  %v2005_v57 = vsel %vm1987_vm2, %v1911_v2, %v7377_v21  ;;  %v1046_v21 = vpack.c.bf16 %v946_v23, %v944_v62 }
 0x110   : > { %v7545_v38 = vsel %vm2056_vm3, %v2005_v57, %v7389_v42  ;;  %v948_v42 = vld [vmem:[#allocation2 + $0x247] ss:$2 sm:$0xff] }
 0x111   : > { %v7529_v52 = vpop.permute.xlu0 %1851  ;;  %2147 = vrot.lane.b32.xlu1 %v2072_v55, %s6748_s22  ;;  %v1047_v24 = vpack.c.bf16 %v950_v63, %v948_v42  ;;  %v1920_v45 = vsel %vm388_vm0, %v1046_v21, %v7403_v5  ;;  %v956_v57 = vld [vmem:[#allocation2 + $0x2a7] ss:$2 sm:$0xff]  ;;  %v968_v21 = vld [vmem:[#allocation2 + $0x337] ss:$2 sm:$0xff] }
 0x112   : > { %v2011_v17 = vsel %vm1987_vm2, %v1920_v45, %v7407_v18  ;;  %v1917_v18 = vsel %vm388_vm0, %v1045_v44, %v7395_v53  ;;  %v1926_v53 = vsel %vm388_vm0, %v1048_v32, %v7418_v36 }
 0x113   : > { %2145 = vrot.lane.b32.xlu0 %v2068_v41, %s6748_s22  ;;  %v7539_v6 = vpop.permute.xlu1 %1653  ;;  %v2080_v56 = vsel %vm2056_vm3, %v2011_v17, %v7425_v50  ;;  %v1923_v5 = vsel %vm388_vm0, %v1047_v24, %v7401_v4  ;;  %v2009_v50 = vsel %vm1987_vm2, %v1917_v18, %v7409_v19  ;;  %v2015_v19 = vsel %vm1987_vm2, %v1926_v53, %v7436_v9  ;;  %v978_v24 = vld [vmem:[#allocation2 + $0x3a7] ss:$2 sm:$0xff] }
 0x114   : > { %v2013_v47 = vsel %vm1987_vm2, %v1923_v5, %v7416_v35  ;;  %v7599_v2 = vsel %vm2056_vm3, %v2009_v50, %v7427_v51  ;;  %v1050_v35 = vpack.c.bf16 %v962_v40, %v960_v37  ;;  %v958_v51 = vld [vmem:[#allocation2 + $0x2b7] ss:$2 sm:$0xff]  ;;  %v2084_v62 = vsel %vm2056_vm3, %v2015_v19, %v7445_v28  ;;  %v986_v40 = vld [vmem:[#allocation2 + $0x407] ss:$2 sm:$0xff] }
 0x115   : > { %v7547_v1 = vpop.permute.xlu0 %1651  ;;  %2195 = vrot.lane.b32.xlu1 %v7545_v38, %s6749_s23  ;;  %v1049_v9 = vpack.c.bf16 %v958_v51, %v956_v57  ;;  %v974_v5 = vld [vmem:[#allocation2 + $0x377] ss:$2 sm:$0xff] }
 0x116   : > { %v1932_v33 = vsel %vm388_vm0, %v1050_v35, %v7454_v60  ;;  %v1052_v60 = vpack.c.bf16 %v970_v12, %v968_v21  ;;  %v984_v37 = vld [vmem:[#allocation2 + $0x3f7] ss:$2 sm:$0xff] }
 0x117   : > { %2193 = vrot.lane.b32.xlu0 %v7551_v61, %s6749_s23  ;;  %v7561_v22 = vpop.permute.xlu1 %1753  ;;  %v2019_v54 = vsel %vm1987_vm2, %v1932_v33, %v7461_v26  ;;  %v1929_v34 = vsel %vm388_vm0, %v1049_v9, %v7443_v27  ;;  %v1056_v19 = vpack.c.bf16 %v986_v40, %v984_v37  ;;  %v988_v9 = vld [vmem:[#allocation2 + $0x427] ss:$2 sm:$0xff]  ;;  %v1014_v40 = vld [vmem:[#allocation2 + $0x557] ss:$2 sm:$0xff] }
 0x118   : > { %v2088_v28 = vsel %vm2056_vm3, %v2019_v54, %v7491_v10  ;;  %v2017_v10 = vsel %vm1987_vm2, %v1929_v34, %v7463_v46  ;;  %v1938_v27 = vsel %vm388_vm0, %v1052_v60, %v7479_v3  ;;  %v990_v54 = vld [vmem:[#allocation2 + $0x437] ss:$2 sm:$0xff]  ;;  %v1012_v37 = vld [vmem:[#allocation2 + $0x547] ss:$2 sm:$0xff] }
 0x119   : > { %v7565_v14 = vpop.permute.xlu0 %1751  ;;  %2228 = vrot.lane.b32.xlu1 %v2076_v30, %s6750_s24  ;;  %v7643_v17 = vsel %vm2056_vm3, %v2017_v10, %v7499_v15  ;;  %v2023_v46 = vsel %vm1987_vm2, %v1938_v27, %v7517_v29  ;;  %v1000_v60 = vld [vmem:[#allocation2 + $0x4b7] ss:$2 sm:$0xff] }
 0x11a   : > { %v2092_v15 = vsel %vm2056_vm3, %v2023_v46, %v7529_v52 }
 0x11b   : > { %2226 = vrot.lane.b32.xlu0 %v2072_v55, %s6750_s24  ;;  %v7573_v41 = vpop.permute.xlu1 %1755  ;;  %v7593_v55 = vsel %vm2056_vm3, %v2013_v47, %v7434_v8  ;;  %v964_v8 = vld [vmem:[#allocation2 + $0x307] ss:$2 sm:$0xff] }
 0x11c   : > { %v1051_v36 = vpack.c.bf16 %v966_v59, %v964_v8  ;;  %v992_v8 = vld [vmem:[#allocation2 + $0x457] ss:$2 sm:$0xff]  ;;  %v994_v59 = vld [vmem:[#allocation2 + $0x467] ss:$2 sm:$0xff] }
 0x11d   : > { %v7577_v31 = vpop.permute.xlu0 %1655  ;;  %2151 = vrot.lane.b32.xlu1 %v2080_v56, %s6748_s22 }
 0x11e   : > { %v1935_v7 = vsel %vm388_vm0, %v1051_v36, %v7452_v58  ;;  %v998_v36 = vld [vmem:[#allocation2 + $0x497] ss:$2 sm:$0xff] }
 0x11f   : > { %2149 = vrot.lane.b32.xlu0 %v2076_v30, %s6748_s22  ;;  %v7587_v43 = vpop.permute.xlu1 %1855  ;;  %v2021_v26 = vsel %vm1987_vm2, %v1935_v7, %v7473_v49  ;;  %v976_v30 = vld [vmem:[#allocation2 + $0x397] ss:$2 sm:$0xff] }
 0x120   : > { %v7639_v44 = vsel %vm2056_vm3, %v2021_v26, %v7513_v20  ;;  %v1054_v49 = vpack.c.bf16 %v978_v24, %v976_v30  ;;  %v980_v20 = vld [vmem:[#allocation2 + $0x3c7] ss:$2 sm:$0xff] }
 0x121   : > { %v7595_v4 = vpop.permute.xlu0 %1853  ;;  %2199 = vrot.lane.b32.xlu1 %v7593_v55, %s6749_s23  ;;  %v1055_v18 = vpack.c.bf16 %v982_v39, %v980_v20 }
 0x122   : > { %v1944_v3 = vsel %vm388_vm0, %v1054_v49, %v7547_v1 }
 0x123   : > { %2197 = vrot.lane.b32.xlu0 %v7599_v2, %s6749_s23  ;;  %v7609_v11 = vpop.permute.xlu1 %1857  ;;  %v2027_v29 = vsel %vm1987_vm2, %v1944_v3, %v7561_v22  ;;  %v1947_v35 = vsel %vm388_vm0, %v1055_v18, %v7539_v6 }
 0x124   : > { %v2096_v53 = vsel %vm2056_vm3, %v2027_v29, %v7587_v43  ;;  %v2029_v22 = vsel %vm1987_vm2, %v1947_v35, %v7573_v41  ;;  %v1058_v41 = vpack.c.bf16 %v994_v59, %v992_v8  ;;  %v1016_v59 = vld [vmem:[#allocation2 + $0x577] ss:$2 sm:$0xff] }
 0x125   : > { %v7613_v23 = vpop.permute.xlu0 %1757  ;;  %2232 = vrot.lane.b32.xlu1 %v2084_v62, %s6750_s24  ;;  %v7675_v51 = vsel %vm2056_vm3, %v2029_v22, %v7609_v11  ;;  %v996_v11 = vld [vmem:[#allocation2 + $0x487] ss:$2 sm:$0xff] }
 0x126   : > { %v1059_v12 = vpack.c.bf16 %v998_v36, %v996_v11 }
 0x127   : > { %2230 = vrot.lane.b32.xlu0 %v2080_v56, %s6750_s24  ;;  %v7621_v42 = vpop.permute.xlu1 %1657  ;;  %v972_v56 = vld [vmem:[#allocation2 + $0x367] ss:$2 sm:$0xff] }
 0x128   : > { %v1053_v47 = vpack.c.bf16 %v974_v5, %v972_v56  ;;  %v1010_v56 = vld [vmem:[#allocation2 + $0x527] ss:$2 sm:$0xff] }
 0x129   : > { %v1860_v63 = vpop.permute.xlu0 %1859  ;;  %2155 = vrot.lane.b32.xlu1 %v2088_v28, %s6748_s22 }
 0x12a   : > { %v1941_v1 = vsel %vm388_vm0, %v1053_v47, %v7525_v48  ;;  %v1950_v48 = vsel %vm388_vm0, %v1056_v19, %v7577_v31 }
 0x12b   : > { %2153 = vrot.lane.b32.xlu0 %v2084_v62, %s6748_s22  ;;  %v7633_v45 = vpop.permute.xlu1 %1661  ;;  %v2025_v43 = vsel %vm1987_vm2, %v1941_v1, %v7565_v14  ;;  %v2031_v14 = vsel %vm1987_vm2, %v1950_v48, %v7613_v23  ;;  %v1002_v23 = vld [vmem:[#allocation2 + $0x4c7] ss:$2 sm:$0xff] }
 0x12c   : > { %v7679_v62 = vsel %vm2056_vm3, %v2025_v43, %v7595_v4  ;;  %v2100_v4 = vsel %vm2056_vm3, %v2031_v14, %v1860_v63  ;;  %v1959_v63 = vsel %vm388_vm0, %v1059_v12, %v7633_v45  ;;  %v1060_v24 = vpack.c.bf16 %v1002_v23, %v1000_v60 }
 0x12d   : > { %v1660_v58 = vpop.permute.xlu0 %1659  ;;  %2203 = vrot.lane.b32.xlu1 %v7639_v44, %s6749_s23 }
 0x12e   : > { %v1956_v31 = vsel %vm388_vm0, %v1058_v41, %v1660_v58 }
 0x12f   : > { %2201 = vrot.lane.b32.xlu0 %v7643_v17, %s6749_s23  ;;  %v1762_v25 = vpop.permute.xlu1 %1761 }
 0x130   : > { %v2035_v7 = vsel %vm1987_vm2, %v1956_v31, %v1762_v25  ;;  %v1008_v25 = vld [vmem:[#allocation2 + $0x517] ss:$2 sm:$0xff] }
 0x131   : > { %v1760_v32 = vpop.permute.xlu0 %1759  ;;  %2236 = vrot.lane.b32.xlu1 %v2092_v15, %s6750_s24  ;;  %v1062_v47 = vpack.c.bf16 %v1010_v56, %v1008_v25 }
 0x133   : > { %2234 = vrot.lane.b32.xlu0 %v2088_v28, %s6750_s24  ;;  %v1764_v50 = vpop.permute.xlu1 %1763  ;;  %v1057_v28 = vpack.c.bf16 %v990_v54, %v988_v9 }
 0x134   : > { %v2037_v58 = vsel %vm1987_vm2, %v1959_v63, %v1764_v50  ;;  %v1020_v63 = vld [vmem:[#allocation2 + $0x5a7] ss:$2 sm:$0xff] }
 0x135   : > { %v1664_v52 = vpop.permute.xlu0 %1663  ;;  %2159 = vrot.lane.b32.xlu1 %v2096_v53, %s6748_s22  ;;  %v1953_v10 = vsel %vm388_vm0, %v1057_v28, %v7621_v42 }
 0x136   : > { %v2033_v49 = vsel %vm1987_vm2, %v1953_v10, %v1760_v32  ;;  %v1962_v45 = vsel %vm388_vm0, %v1060_v24, %v1664_v52  ;;  %v1006_v32 = vld [vmem:[#allocation2 + $0x4f7] ss:$2 sm:$0xff]  ;;  %v1063_v52 = vpack.c.bf16 %v1014_v40, %v1012_v37 }
 0x137   : > { %2157 = vrot.lane.b32.xlu0 %v2092_v15, %s6748_s22  ;;  %v1864_v57 = vpop.permute.xlu1 %1863  ;;  %v1004_v15 = vld [vmem:[#allocation2 + $0x4e7] ss:$2 sm:$0xff]  ;;  %v1022_v24 = vld [vmem:[#allocation2 + $0x5b7] ss:$2 sm:$0xff] }
 0x138   : > { %v2104_v26 = vsel %vm2056_vm3, %v2035_v7, %v1864_v57  ;;  %v1061_v29 = vpack.c.bf16 %v1006_v32, %v1004_v15  ;;  %v1018_v57 = vld [vmem:[#allocation2 + $0x587] ss:$2 sm:$0xff]  ;;  %v1030_v32 = vld [vmem:[#allocation2 + $0x617] ss:$2 sm:$0xff] }
 0x139   : > { %v1862_v6 = vpop.permute.xlu0 %1861  ;;  %2207 = vrot.lane.b32.xlu1 %v7675_v51, %s6749_s23  ;;  %v1064_v11 = vpack.c.bf16 %v1018_v57, %v1016_v59  ;;  %v1028_v15 = vld [vmem:[#allocation2 + $0x607] ss:$2 sm:$0xff]  ;;  %v1032_v40 = vld [vmem:[#allocation2 + $0x637] ss:$2 sm:$0xff] }
 0x13a   : > { %v7707_v39 = vsel %vm2056_vm3, %v2033_v49, %v1862_v6  ;;  %v902_v59 = vld [vmem:[#allocation2 + $0x17] ss:$2 sm:$0xff] }
 0x13b   : > { %2205 = vrot.lane.b32.xlu0 %v7679_v62, %s6749_s23  ;;  %v1866_v33 = vpop.permute.xlu1 %1865 }
 0x13c   : > { %v7704_v46 = vsel %vm2056_vm3, %v2037_v58, %v1866_v33 }
 0x13d   : > { %v1766_v21 = vpop.permute.xlu0 %1765  ;;  %2240 = vrot.lane.b32.xlu1 %v2100_v4, %s6750_s24 }
 0x13e   : > { %v2039_v42 = vsel %vm1987_vm2, %v1962_v45, %v1766_v21 }
 0x13f   : > { %2238 = vrot.lane.b32.xlu0 %v2096_v53, %s6750_s24  ;;  %v1666_v34 = vpop.permute.xlu1 %1665 }
 0x140   : > { %v1965_v19 = vsel %vm388_vm0, %v1061_v29, %v1666_v34  ;;  %v1024_v34 = vld [vmem:[#allocation2 + $0x5d7] ss:$2 sm:$0xff]  ;;  %v1067_v29 = vpack.c.bf16 %v1030_v32, %v1028_v15 }
 0x141   : > { %v1868_v30 = vpop.permute.xlu0 %1867  ;;  %2163 = vrot.lane.b32.xlu1 %v2104_v26, %s6748_s22 }
 0x142   : > { %v2108_v18 = vsel %vm2056_vm3, %v2039_v42, %v1868_v30 }
 0x143   : > { %2161 = vrot.lane.b32.xlu0 %v2100_v4, %s6748_s22  ;;  %v1670_v27 = vpop.permute.xlu1 %1669 }
 0x144   : > { %v1971_v41 = vsel %vm388_vm0, %v1063_v52, %v1670_v27  ;;  %v1065_v27 = vpack.c.bf16 %v1022_v24, %v1020_v63 }
 0x145   : > { %v1668_v20 = vpop.permute.xlu0 %1667  ;;  %2211 = vrot.lane.b32.xlu1 %v7704_v46, %s6749_s23 }
 0x146   : > { %v1968_v35 = vsel %vm388_vm0, %v1062_v47, %v1668_v20 }
 0x147   : > { %2209 = vrot.lane.b32.xlu0 %v7707_v39, %s6749_s23  ;;  %v1770_v5 = vpop.permute.xlu1 %1769 }
 0x148   : > { %v2043_v1 = vsel %vm1987_vm2, %v1968_v35, %v1770_v5 }
 0x149   : > { %v1768_v3 = vpop.permute.xlu0 %1767  ;;  %2244 = vrot.lane.b32.xlu1 %v2108_v18, %s6750_s24 }
 0x14a   : > { %v2041_v8 = vsel %vm1987_vm2, %v1965_v19, %v1768_v3 }
 0x14b   : > { %2242 = vrot.lane.b32.xlu0 %v2104_v26, %s6750_s24  ;;  %v1772_v50 = vpop.permute.xlu1 %1771  ;;  %v1026_v26 = vld [vmem:[#allocation2 + $0x5e7] ss:$2 sm:$0xff] }
 0x14c   : > { %v2045_v14 = vsel %vm1987_vm2, %v1971_v41, %v1772_v50  ;;  %v1066_v58 = vpack.c.bf16 %v1026_v26, %v1024_v34  ;;  %v1034_v50 = vld [vmem:[#allocation2 + $0x647] ss:$2 sm:$0xff] }
 0x14d   : > { %v1672_v53 = vpop.permute.xlu0 %1671  ;;  %v1068_v35 = vpack.c.bf16 %v1034_v50, %v1032_v40 }
 0x14e   : > { %v1974_v54 = vsel %vm388_vm0, %v1064_v11, %v1672_v53 }
 0x14f   : > { %2165 = vrot.lane.b32.xlu0 %v2108_v18, %s6748_s22  ;;  %v1872_v22 = vpop.permute.xlu1 %1871 }
 0x150   : > { %v2112_v43 = vsel %vm2056_vm3, %v2043_v1, %v1872_v22 }
 0x151   : > { %v1870_v6 = vpop.permute.xlu0 %1869  ;;  %2167 = vrot.lane.b32.xlu1 %v2112_v43, %s6748_s22 }
 0x152   : > { %v7725_v48 = vsel %vm2056_vm3, %v2041_v8, %v1870_v6  ;;  %v900_v8 = vld [vmem:[#allocation2 + $0x7] ss:$2 sm:$0xff] }
 0x153   : > { %2213 = vrot.lane.b32.xlu0 %v7725_v48, %s6749_s23  ;;  %v1874_v36 = vpop.permute.xlu1 %1873  ;;  %v1035_v41 = vpack.c.bf16 %v902_v59, %v900_v8 }
 0x154   : > { %v7733_v33 = vsel %vm2056_vm3, %v2045_v14, %v1874_v36 }
 0x155   : > { %v1774_v9 = vpop.permute.xlu0 %1773  ;;  %2215 = vrot.lane.b32.xlu1 %v7733_v33, %s6749_s23 }
 0x156   : > { %v2047_v21 = vsel %vm1987_vm2, %v1974_v54, %v1774_v9 }
 0x157   : > { %2246 = vrot.lane.b32.xlu0 %v2112_v43, %s6750_s24  ;;  %v1674_v4 = vpop.permute.xlu1 %1673 }
 0x158   : > { %v1977_v42 = vsel %vm388_vm0, %v1065_v27, %v1674_v4 }
 0x159   : > { %v1876_v12 = vpop.permute.xlu0 %1875 }
 0x15a   : > { %v2116_v31 = vsel %vm2056_vm3, %v2047_v21, %v1876_v12 }
 0x15b   : > { %2248 = vrot.lane.b32.xlu1 %v2116_v31, %s6750_s24  ;;  %2169 = vrot.lane.b32.xlu0 %v2116_v31, %s6748_s22  ;;  %v1614_v28 = vpop.permute.xlu1 %1613 }
 0x15c   : > { %v1887_v54 = vsel %vm388_vm0, %v1035_v41, %v1614_v28 }
 0x15d   : > { %v1676_v7 = vpop.permute.xlu0 %1675 }
 0x15e   : > { %v1980_v45 = vsel %vm388_vm0, %v1066_v58, %v1676_v7 }
 0x15f   : > { %v1776_v60 = vpop.permute.xlu1 %1775 }
 0x160   : > { %v2049_v5 = vsel %vm1987_vm2, %v1977_v42, %v1776_v60 }
 0x161   : > { %v1678_v23 = vpop.permute.xlu0 %1677 }
 0x162   : > { %v1983_v52 = vsel %vm388_vm0, %v1067_v29, %v1678_v23 }
 0x163   : > { %v1680_v30 = vpop.permute.xlu1 %1679 }
 0x164   : > { %v1986_v43 = vsel %vm388_vm0, %v1068_v35, %v1680_v30 }
 0x165   : > { %v1778_v10 = vpop.permute.xlu0 %1777 }
 0x166   : > { %v2051_v25 = vsel %vm1987_vm2, %v1980_v45, %v1778_v10 }
 0x167   : > { %v1780_v49 = vpop.permute.xlu1 %1779 }
 0x168   : > { %v2053_v1 = vsel %vm1987_vm2, %v1983_v52, %v1780_v49 }
 0x169   : > { %v1716_v20 = vpop.permute.xlu0 %1715 }
 0x16a   : > { %v1989_v21 = vsel %vm1987_vm2, %v1887_v54, %v1716_v20 }
 0x16b   : > { %v1880_v56 = vpop.permute.xlu1 %1879 }
 0x16c   : > { %v2120_v18 = vsel %vm2056_vm3, %v2051_v25, %v1880_v56 }
 0x16d   : > { %v1878_v3 = vpop.permute.xlu0 %1877  ;;  %2171 = vrot.lane.b32.xlu1 %v2120_v18, %s6748_s22 }
 0x16e   : > { %v7749_v47 = vsel %vm2056_vm3, %v2049_v5, %v1878_v3 }
 0x16f   : > { %2217 = vrot.lane.b32.xlu0 %v7749_v47, %s6749_s23  ;;  %v1818_v37 = vpop.permute.xlu1 %1817 }
 0x170   : > { %v2058_v12 = vsel %vm2056_vm3, %v1989_v21, %v1818_v37 }
 0x171   : > { %v1782_v53 = vpop.permute.xlu0 %1781 }
 0x172   : > { %v2055_v14 = vsel %vm1987_vm2, %v1986_v43, %v1782_v53 }
 0x173   : > { %2250 = vrot.lane.b32.xlu0 %v2120_v18, %s6750_s24  ;;  %v1884_v19 = vpop.permute.xlu1 %1883 }
 0x174   : > { %v2124_v36 = vsel %vm2056_vm3, %v2055_v14, %v1884_v19 }
 0x175   : > { %v1882_v22 = vpop.permute.xlu0 %1881 }
 0x176   : > { %v2122_v57 = vsel %vm2056_vm3, %v2053_v1, %v1882_v22 }
 0x177   : > { %2219 = vrot.lane.b32.xlu1 %v2122_v57, %s6749_s23  ;;  %v2144_v6 = vpop.permute.xlu1 %2143 }
 0x178   : > { %v2258_v31 = vsel %vm2254_vm5, %v7503_v16, %v2144_v6 }
 0x179   : > { %v2142_v11 = vpop.permute.xlu0 %2141 }
 0x17a   : > { %v2256_v7 = vsel %vm2254_vm5, %v2058_v12, %v2142_v11 }
 0x17b   : > { %2252 = vrot.lane.b32.xlu1 %v2124_v36, %s6750_s24  ;;  %v2192_v9 = vpop.permute.xlu1 %2191 }
 0x17c   : > { %v2291_v60 = vsel %vm2287_vm6, %v2258_v31, %v2192_v9 }
 0x17d   : > { %v2190_v4 = vpop.permute.xlu0 %2189 }
 0x17e   : > { %v2289_v34 = vsel %vm2287_vm6, %v2256_v7, %v2190_v4 }
 0x17f   : > { %v2225_v23 = vpop.permute.xlu1 %2224 }
 0x180   : > { %v2324_v28 = vsel %vm2320_vm7, %v2291_v60, %v2225_v23 }
 0x181   : > { %v2223_v26 = vpop.permute.xlu0 %2222 }
 0x182   : > { %v2322_v30 = vsel %vm2320_vm7, %v2289_v34, %v2223_v26 }
 0x183   : > { %6490 = vmatprep.mubr.msk.bf16.mxu0 %vm2408_vm8, %v2322_v30  ;;  %v2148_v63 = vpop.permute.xlu1 %2147 }
 0x184   : > { %6491 = vmatmul.mubr.msk.bf16.vlgmr.msra.gmra.mrb[0].mxu0 %vm2408_vm8, %v2324_v28  ;;  %v2262_v58 = vsel %vm2254_vm5, %v7551_v61, %v2148_v63 }
 0x185   : > { %v2146_v24 = vpop.permute.xlu0 %2145 }
 0x186   : > { %v2260_v27 = vsel %vm2254_vm5, %v7497_v13, %v2146_v24 }
 0x187   : > { %v2196_v16 = vpop.permute.xlu1 %2195 }
 0x188   : > { %v2295_v49 = vsel %vm2287_vm6, %v2262_v58, %v2196_v16 }
 0x189   : > { %v2194_v10 = vpop.permute.xlu0 %2193 }
 0x18a   : > { %v2293_v45 = vsel %vm2287_vm6, %v2260_v27, %v2194_v10 }
 0x18b   : > { %v2229_v20 = vpop.permute.xlu1 %2228 }
 0x18c   : > { %v2328_v42 = vsel %vm2320_vm7, %v2295_v49, %v2229_v20 }
 0x18d   : > { %v2227_v25 = vpop.permute.xlu0 %2226 }
 0x18e   : > { %v2326_v56 = vsel %vm2320_vm7, %v2293_v45, %v2227_v25 }
 0x18f   : > { %6494 = vmatprep.mubr.msk.bf16.mxu0 %vm2408_vm8, %v2326_v56  ;;  %v2152_v5 = vpop.permute.xlu1 %2151 }
 0x190   : > { %6495 = vmatmul.mubr.msk.bf16.gmra.mrb[4].mxu0 %vm2408_vm8, %v2328_v42  ;;  %v2266_v13 = vsel %vm2254_vm5, %v7599_v2, %v2152_v5 }
 0x191   : > { %v2150_v15 = vpop.permute.xlu0 %2149 }
 0x192   : > { %v2264_v18 = vsel %vm2254_vm5, %v7545_v38, %v2150_v15  ;;  %v2724_v15 = vld [vmem:[#allocation3 + $0x228] ss:$2 sm:$0xff] }
 0x193   : > { %v2200_v61 = vpop.permute.xlu1 %2199 }
 0x194   : > { %v2299_v3 = vsel %vm2287_vm6, %v2266_v13, %v2200_v61 }
 0x195   : > { %v2198_v32 = vpop.permute.xlu0 %2197 }
 0x196   : > { %v2297_v37 = vsel %vm2287_vm6, %v2264_v18, %v2198_v32  ;;  %v2742_v32 = vpack.c.bf16 %v2724_v15, %v2724_v15 }
 0x197   : > { %v2233_v29 = vpop.permute.xlu1 %2232 }
 0x198   : > { %v2332_v40 = vsel %vm2320_vm7, %v2299_v3, %v2233_v29  ;;  %2903 = vrot.lane.b32.xlu0 %v2742_v32, %s6752_s26 }
 0x199   : > { %v2231_v50 = vpop.permute.xlu0 %2230 }
 0x19a   : > { %v2330_v53 = vsel %vm2320_vm7, %v2297_v37, %v2231_v50 }
 0x19b   : > { %6498 = vmatprep.mubr.msk.bf16.mxu0 %vm2408_vm8, %v2330_v53  ;;  %v2156_v52 = vpop.permute.xlu1 %2155 }
 0x19c   : > { %6499 = vmatmul.mubr.msk.bf16.gmra.mrb[8].mxu0 %vm2408_vm8, %v2332_v40  ;;  %v2270_v38 = vsel %vm2254_vm5, %v7643_v17, %v2156_v52 }
 0x19d   : > { %v2154_v35 = vpop.permute.xlu0 %2153 }
 0x19e   : > { %v2268_v1 = vsel %vm2254_vm5, %v7593_v55, %v2154_v35 }
 0x19f   : > { %v2204_v2 = vpop.permute.xlu1 %2203 }
 0x1a0   : > { %v2303_v22 = vsel %vm2287_vm6, %v2270_v38, %v2204_v2 }
 0x1a1   : > { %v2202_v19 = vpop.permute.xlu0 %2201 }
 0x1a2   : > { %v2301_v59 = vsel %vm2287_vm6, %v2268_v1, %v2202_v19 }
 0x1a3   : > { %v2237_v8 = vpop.permute.xlu1 %2236 }
 0x1a4   : > { %v2336_v57 = vsel %vm2320_vm7, %v2303_v22, %v2237_v8 }
 0x1a5   : > { %v2235_v43 = vpop.permute.xlu0 %2234 }
 0x1a6   : > { %v2334_v6 = vsel %vm2320_vm7, %v2301_v59, %v2235_v43 }
 0x1a7   : > { %6502 = vmatprep.mubr.msk.bf16.mxu0 %vm2408_vm8, %v2334_v6  ;;  %v2160_v41 = vpop.permute.xlu1 %2159 }
 0x1a8   : > { %6503 = vmatmul.mubr.msk.bf16.gmra.mrb[12].mxu0 %vm2408_vm8, %v2336_v57  ;;  %v2274_v55 = vsel %vm2254_vm5, %v7679_v62, %v2160_v41 }
 0x1a9   : > { %v2158_v14 = vpop.permute.xlu0 %2157 }
 0x1aa   : > { %v2272_v36 = vsel %vm2254_vm5, %v7639_v44, %v2158_v14 }
 0x1ab   : > { %v2208_v17 = vpop.permute.xlu1 %2207 }
 0x1ac   : > { %v2307_v9 = vsel %vm2287_vm6, %v2274_v55, %v2208_v17 }
 0x1ad   : > { %v2206_v11 = vpop.permute.xlu0 %2205 }
 0x1ae   : > { %v2305_v4 = vsel %vm2287_vm6, %v2272_v36, %v2206_v11 }
 0x1af   : > { %v2241_v54 = vpop.permute.xlu1 %2240 }
 0x1b0   : > { %v2340_v21 = vsel %vm2320_vm7, %v2307_v9, %v2241_v54 }
 0x1b1   : > { %v2239_v12 = vpop.permute.xlu0 %2238 }
 0x1b2   : > { %v2338_v31 = vsel %vm2320_vm7, %v2305_v4, %v2239_v12 }
 0x1b3   : > { %6506 = vmatprep.mubr.msk.bf16.mxu0 %vm2408_vm8, %v2338_v31  ;;  %v2164_v7 = vpop.permute.xlu1 %2163 }
 0x1b4   : > { %6507 = vmatmul.mubr.msk.bf16.gmra.mrb[16].mxu0 %vm2408_vm8, %v2340_v21  ;;  %v2278_v44 = vsel %vm2254_vm5, %v7707_v39, %v2164_v7 }
 0x1b5   : > { %v2162_v60 = vpop.permute.xlu0 %2161 }
 0x1b6   : > { %v2276_v34 = vsel %vm2254_vm5, %v7675_v51, %v2162_v60 }
 0x1b7   : > { %v2212_v62 = vpop.permute.xlu1 %2211 }
 0x1b8   : > { %v2311_v28 = vsel %vm2287_vm6, %v2278_v44, %v2212_v62 }
 0x1b9   : > { %v2210_v23 = vpop.permute.xlu0 %2209 }
 0x1ba   : > { %v2309_v30 = vsel %vm2287_vm6, %v2276_v34, %v2210_v23 }
 0x1bb   : > { %v2245_v26 = vpop.permute.xlu1 %2244 }
 0x1bc   : > { %v2344_v63 = vsel %vm2320_vm7, %v2311_v28, %v2245_v26 }
 0x1bd   : > { %v2243_v24 = vpop.permute.xlu0 %2242 }
 0x1be   : > { %v2342_v16 = vsel %vm2320_vm7, %v2309_v30, %v2243_v24 }
 0x1bf   : > { %6510 = vmatprep.mubr.msk.bf16.mxu0 %vm2408_vm8, %v2342_v16 }
 0x1c0   : > { %6511 = vmatmul.mubr.msk.bf16.gmra.mrb[20].mxu0 %vm2408_vm8, %v2344_v63 }
 0x1c1   : > { %v2166_v10 = vpop.permute.xlu0 %2165 }
 0x1c2   : > { %v2280_v51 = vsel %vm2254_vm5, %v7704_v46, %v2166_v10 }
 0x1c3   : > { %v2168_v58 = vpop.permute.xlu1 %2167 }
 0x1c4   : > { %v2282_v42 = vsel %vm2254_vm5, %v7725_v48, %v2168_v58  ;;  %v2778_v48 = vld [vmem:[#allocation3 + $0x229] ss:$2 sm:$0xff] }
 0x1c5   : > { %v2214_v39 = vpop.permute.xlu0 %2213  ;;  %v2796_v61 = vpack.c.bf16 %v2778_v48, %v2778_v48 }
 0x1c6   : > { %v2313_v49 = vsel %vm2287_vm6, %v2280_v51, %v2214_v39 }
 0x1c7   : > { %v2216_v27 = vpop.permute.xlu1 %2215  ;;  %2957 = vrot.lane.b32.xlu1 %v2796_v61, %s6751_s25 }
 0x1c8   : > { %v2315_v25 = vsel %vm2287_vm6, %v2282_v42, %v2216_v27 }
 0x1c9   : > { %v2247_v20 = vpop.permute.xlu0 %2246 }
 0x1ca   : > { %v2346_v45 = vsel %vm2320_vm7, %v2313_v49, %v2247_v20 }
 0x1cb   : > { %6514 = vmatprep.mubr.msk.bf16.mxu0 %vm2408_vm8, %v2346_v45 }
 0x1cd   : > { %v2249_v56 = vpop.permute.xlu1 %2248  ;;  %v2170_v46 = vpop.permute.xlu0 %2169 }
 0x1ce   : > { %v2348_v5 = vsel %vm2320_vm7, %v2315_v25, %v2249_v56  ;;  %v2284_v18 = vsel %vm2254_vm5, %v7733_v33, %v2170_v46  ;;  %v7938_v33 = vld [vmem:[%s9029_s2] ss:$0 sm:$0xff] }
 0x1cf   : > { %6515 = vmatmul.mubr.msk.bf16.gmra.mrb[24].mxu0 %vm2408_vm8, %v2348_v5 }
 0x1df   : > { %v2172_v3 = vpop.permute.xlu1 %2171 }
 0x1e0   : > { %v2286_v53 = vsel %vm2254_vm5, %v7749_v47, %v2172_v3 }
 0x1e1   : > { %v2218_v13 = vpop.permute.xlu0 %2217 }
 0x1e2   : > { %v2317_v29 = vsel %vm2287_vm6, %v2284_v18, %v2218_v13 }
 0x1e5   : > { %v2251_v37 = vpop.permute.xlu0 %2250 }
 0x1e6   : > { %v2350_v40 = vsel %vm2320_vm7, %v2317_v29, %v2251_v37 }
 0x1e7   : > { %6518 = vmatprep.mubr.msk.bf16.mxu0 %vm2408_vm8, %v2350_v40 }
 0x1e9   : > { %v2220_v50 = vpop.permute.xlu1 %2219 }
 0x1ea   : > { %v2319_v52 = vsel %vm2287_vm6, %v2286_v53, %v2220_v50 }
 0x1ed   : > { %v2253_v35 = vpop.permute.xlu1 %2252 }
 0x1ee   : > { %v2352_v2 = vsel %vm2320_vm7, %v2319_v52, %v2253_v35  ;;  %vm549_vm7 = vcmask 257024  }
 0x1ef   : > { %6519 = vmatmul.mubr.msk.bf16.gmra.mrb[28].mxu0 %vm2408_vm8, %v2352_v2 }
 0x257   : > { %v6492_v19 = vpop.f32.mrb[0].mxu0 }
 0x258   : > { %v2484_v38 = vadd.f32 %v6492_v19, %v7938_v33  ;;  %v2475_v1 = vpop.f32.mrb[1].mxu0 }
 0x259   : > { %v2476_v22 = vadd.f32 %v7938_v33, %v2475_v1  ;;  %v6493_v8 = vpop.f32.mrb[2].mxu0 }
 0x25a   : > { %2605 = vst.msk [vmem:[#allocation3 + $0x48] sm:$0xff] %vm471_vm4, %v2484_v38  ;;  %v2487_v47 = vadd.f32 %v6493_v8, %v7938_v33  ;;  %v2478_v59 = vpop.f32.mrb[3].mxu0 }
 0x25b   : > { %2603 = vst.msk [vmem:[#allocation3 + $0x28] sm:$0xff] %vm471_vm4, %v2476_v22  ;;  %v2479_v57 = vadd.f32 %v7938_v33, %v2478_v59 }
 0x25c   : > { %2606 = vst.msk [vmem:[#allocation3 + $0x50] sm:$0xff] %vm471_vm4, %v2487_v47 }
 0x25d   : > { %2604 = vst.msk [vmem:[#allocation3 + $0x30] sm:$0xff] %vm471_vm4, %v2479_v57 }
 0x263   : > { %v6496_v43 = vpop.f32.mrb[4].mxu0  ;;  %v2802_v6 = vld [vmem:[#allocation3 + $0x4a] ss:$2 sm:$0xff]  ;;  %v2748_v54 = vld [vmem:[#allocation3 + $0x49] ss:$2 sm:$0xff] }
 0x264   : > { %v2694_v41 = vld [vmem:[#allocation3 + $0x48] ss:$2 sm:$0xff]  ;;  %v2500_v14 = vadd.f32 %v6496_v43, %v7938_v33  ;;  %v2491_v17 = vpop.f32.mrb[5].mxu0  ;;  %v2835_v11 = vpack.c.bf16 %v2802_v6, %v2802_v6  ;;  %v2781_v31 = vpack.c.bf16 %v2748_v54, %v2748_v54  ;;  %v2746_v62 = vld [vmem:[#allocation3 + $0x29] ss:$2 sm:$0xff] }
 0x265   : > { %v2727_v55 = vpack.c.bf16 %v2694_v41, %v2694_v41  ;;  %v2492_v36 = vadd.f32 %v7938_v33, %v2491_v17  ;;  %v6497_v9 = vpop.f32.mrb[6].mxu0  ;;  %v2692_v7 = vld [vmem:[#allocation3 + $0x28] ss:$2 sm:$0xff]  ;;  %v2780_v26 = vpack.c.bf16 %v2746_v62, %v2746_v62 }
 0x266   : > { %2609 = vst.msk [vmem:[#allocation3 + $0x88] sm:$0xff] %vm471_vm4, %v2500_v14  ;;  %v2503_v4 = vadd.f32 %v6497_v9, %v7938_v33  ;;  %2981 = vrot.lane.b32.xlu1 %v2835_v11, %s6748_s22  ;;  %v2494_v21 = vpop.f32.mrb[7].mxu0  ;;  %v2726_v60 = vpack.c.bf16 %v2692_v7, %v2692_v7  ;;  %v2800_v16 = vld [vmem:[#allocation3 + $0x2a] ss:$2 sm:$0xff] }
 0x267   : > { %2873 = vrot.lane.b32.xlu0 %v2727_v55, %s6752_s26  ;;  %2607 = vst.msk [vmem:[#allocation3 + $0x68] sm:$0xff] %vm471_vm4, %v2492_v36  ;;  %v2495_v12 = vadd.f32 %v7938_v33, %v2494_v21  ;;  %v2834_v27 = vpack.c.bf16 %v2800_v16, %v2800_v16 }
 0x268   : > { %2610 = vst.msk [vmem:[#allocation3 + $0x90] sm:$0xff] %vm471_vm4, %v2503_v4 }
 0x269   : > { %2608 = vst.msk [vmem:[#allocation3 + $0x70] sm:$0xff] %vm471_vm4, %v2495_v12 }
 0x26b   : > { %2927 = vrot.lane.b32.xlu0 %v2781_v31, %s6751_s25 }
 0x26f   : > { %2871 = vrot.lane.b32.xlu0 %v2726_v60, %s6752_s26  ;;  %v6500_v23 = vpop.f32.mrb[8].mxu0  ;;  %v2698_v44 = vld [vmem:[#allocation3 + $0x88] ss:$2 sm:$0xff]  ;;  %v2752_v10 = vld [vmem:[#allocation3 + $0x89] ss:$2 sm:$0xff] }
 0x270   : > { %v2516_v34 = vadd.f32 %v6500_v23, %v7938_v33  ;;  %v2507_v28 = vpop.f32.mrb[9].mxu0  ;;  %v2729_v30 = vpack.c.bf16 %v2698_v44, %v2698_v44  ;;  %v2783_v49 = vpack.c.bf16 %v2752_v10, %v2752_v10  ;;  %v2806_v20 = vld [vmem:[#allocation3 + $0x8a] ss:$2 sm:$0xff]  ;;  %v2750_v56 = vld [vmem:[#allocation3 + $0x69] ss:$2 sm:$0xff] }
 0x271   : > { %v2508_v63 = vadd.f32 %v7938_v33, %v2507_v28  ;;  %v6501_v24 = vpop.f32.mrb[10].mxu0  ;;  %v2696_v45 = vld [vmem:[#allocation3 + $0x68] ss:$2 sm:$0xff]  ;;  %v2837_v42 = vpack.c.bf16 %v2806_v20, %v2806_v20  ;;  %v2782_v61 = vpack.c.bf16 %v2750_v56, %v2750_v56 }
 0x272   : > { %2613 = vst.msk [vmem:[#allocation3 + $0xc8] sm:$0xff] %vm471_vm4, %v2516_v34  ;;  %v2519_v58 = vadd.f32 %v6501_v24, %v7938_v33  ;;  %2877 = vrot.lane.b32.xlu1 %v2729_v30, %s6752_s26  ;;  %v2510_v39 = vpop.f32.mrb[11].mxu0  ;;  %v2728_v25 = vpack.c.bf16 %v2696_v45, %v2696_v45  ;;  %v2804_v3 = vld [vmem:[#allocation3 + $0x6a] ss:$2 sm:$0xff] }
 0x273   : > { %2925 = vrot.lane.b32.xlu0 %v2780_v26, %s6751_s25  ;;  %2611 = vst.msk [vmem:[#allocation3 + $0xa8] sm:$0xff] %vm471_vm4, %v2508_v63  ;;  %v2511_v51 = vadd.f32 %v7938_v33, %v2510_v39  ;;  %v2836_v53 = vpack.c.bf16 %v2804_v3, %v2804_v3 }
 0x274   : > { %2614 = vst.msk [vmem:[#allocation3 + $0xd0] sm:$0xff] %vm471_vm4, %v2519_v58 }
 0x275   : > { %2612 = vst.msk [vmem:[#allocation3 + $0xb0] sm:$0xff] %vm471_vm4, %v2511_v51 }
 0x276   : > { %2931 = vrot.lane.b32.xlu1 %v2783_v49, %s6751_s25 }
 0x277   : > { %2979 = vrot.lane.b32.xlu0 %v2834_v27, %s6748_s22 }
 0x27a   : > { %2875 = vrot.lane.b32.xlu1 %v2728_v25, %s6752_s26 }
 0x27b   : > { %2985 = vrot.lane.b32.xlu0 %v2837_v42, %s6748_s22  ;;  %v6504_v5 = vpop.f32.mrb[12].mxu0  ;;  %v2702_v46 = vld [vmem:[#allocation3 + $0xc8] ss:$2 sm:$0xff]  ;;  %v2756_v35 = vld [vmem:[#allocation3 + $0xc9] ss:$2 sm:$0xff] }
 0x27c   : > { %v2532_v48 = vadd.f32 %v6504_v5, %v7938_v33  ;;  %v2523_v15 = vpop.f32.mrb[13].mxu0  ;;  %v2731_v32 = vpack.c.bf16 %v2702_v46, %v2702_v46  ;;  %v2810_v29 = vld [vmem:[#allocation3 + $0xca] ss:$2 sm:$0xff]  ;;  %v2785_v19 = vpack.c.bf16 %v2756_v35, %v2756_v35  ;;  %v2754_v22 = vld [vmem:[#allocation3 + $0xa9] ss:$2 sm:$0xff] }
 0x27d   : > { %v2524_v13 = vadd.f32 %v7938_v33, %v2523_v15  ;;  %v6505_v18 = vpop.f32.mrb[14].mxu0  ;;  %v2839_v52 = vpack.c.bf16 %v2810_v29, %v2810_v29  ;;  %v2700_v2 = vld [vmem:[#allocation3 + $0xa8] ss:$2 sm:$0xff]  ;;  %v2784_v43 = vpack.c.bf16 %v2754_v22, %v2754_v22 }
 0x27e   : > { %2617 = vst.msk [vmem:[#allocation3 + $0x108] sm:$0xff] %vm471_vm4, %v2532_v48  ;;  %v2535_v37 = vadd.f32 %v6505_v18, %v7938_v33  ;;  %2929 = vrot.lane.b32.xlu1 %v2782_v61, %s6751_s25  ;;  %v2526_v40 = vpop.f32.mrb[15].mxu0  ;;  %v2730_v38 = vpack.c.bf16 %v2700_v2, %v2700_v2  ;;  %v2808_v1 = vld [vmem:[#allocation3 + $0xaa] ss:$2 sm:$0xff] }
 0x27f   : > { %2881 = vrot.lane.b32.xlu0 %v2731_v32, %s6752_s26  ;;  %2615 = vst.msk [vmem:[#allocation3 + $0xe8] sm:$0xff] %vm471_vm4, %v2524_v13  ;;  %v2527_v50 = vadd.f32 %v7938_v33, %v2526_v40  ;;  %v2838_v57 = vpack.c.bf16 %v2808_v1, %v2808_v1 }
 0x280   : > { %2618 = vst.msk [vmem:[#allocation3 + $0x110] sm:$0xff] %vm471_vm4, %v2535_v37 }
 0x281   : > { %2616 = vst.msk [vmem:[#allocation3 + $0xf0] sm:$0xff] %vm471_vm4, %v2527_v50 }
 0x282   : > { %2983 = vrot.lane.b32.xlu1 %v2836_v53, %s6748_s22 }
 0x283   : > { %2989 = vrot.lane.b32.xlu0 %v2839_v52, %s6748_s22 }
 0x286   : > { %2935 = vrot.lane.b32.xlu1 %v2785_v19, %s6751_s25 }
 0x287   : > { %2879 = vrot.lane.b32.xlu0 %v2730_v38, %s6752_s26  ;;  %v6508_v8 = vpop.f32.mrb[16].mxu0  ;;  %v2760_v14 = vld [vmem:[#allocation3 + $0x109] ss:$2 sm:$0xff]  ;;  %v2706_v17 = vld [vmem:[#allocation3 + $0x108] ss:$2 sm:$0xff] }
 0x288   : > { %v2548_v47 = vadd.f32 %v6508_v8, %v7938_v33  ;;  %v2539_v59 = vpop.f32.mrb[17].mxu0  ;;  %v2787_v9 = vpack.c.bf16 %v2760_v14, %v2760_v14  ;;  %v2733_v54 = vpack.c.bf16 %v2706_v17, %v2706_v17  ;;  %v2814_v4 = vld [vmem:[#allocation3 + $0x10a] ss:$2 sm:$0xff]  ;;  %v2758_v63 = vld [vmem:[#allocation3 + $0xe9] ss:$2 sm:$0xff] }
 0x289   : > { %v2540_v6 = vadd.f32 %v7938_v33, %v2539_v59  ;;  %v6509_v41 = vpop.f32.mrb[18].mxu0  ;;  %v2812_v21 = vld [vmem:[#allocation3 + $0xea] ss:$2 sm:$0xff]  ;;  %v2841_v12 = vpack.c.bf16 %v2814_v4, %v2814_v4  ;;  %v2786_v39 = vpack.c.bf16 %v2758_v63, %v2758_v63 }
 0x28a   : > { %2621 = vst.msk [vmem:[#allocation3 + $0x148] sm:$0xff] %vm471_vm4, %v2548_v47  ;;  %v2551_v11 = vadd.f32 %v6509_v41, %v7938_v33  ;;  %2987 = vrot.lane.b32.xlu1 %v2838_v57, %s6748_s22  ;;  %v2542_v55 = vpop.f32.mrb[19].mxu0  ;;  %v2840_v31 = vpack.c.bf16 %v2812_v21, %v2812_v21  ;;  %v2704_v7 = vld [vmem:[#allocation3 + $0xe8] ss:$2 sm:$0xff] }
 0x28b   : > { %2933 = vrot.lane.b32.xlu0 %v2784_v43, %s6751_s25  ;;  %2619 = vst.msk [vmem:[#allocation3 + $0x128] sm:$0xff] %vm471_vm4, %v2540_v6  ;;  %v2543_v36 = vadd.f32 %v7938_v33, %v2542_v55  ;;  %v2732_v34 = vpack.c.bf16 %v2704_v7, %v2704_v7 }
 0x28c   : > { %2622 = vst.msk [vmem:[#allocation3 + $0x150] sm:$0xff] %vm471_vm4, %v2551_v11 }
 0x28d   : > { %2620 = vst.msk [vmem:[#allocation3 + $0x130] sm:$0xff] %vm471_vm4, %v2543_v36 }
 0x28e   : > { %2885 = vrot.lane.b32.xlu1 %v2733_v54, %s6752_s26 }
 0x28f   : > { %2939 = vrot.lane.b32.xlu0 %v2787_v9, %s6751_s25 }
 0x292   : > { %2993 = vrot.lane.b32.xlu1 %v2841_v12, %s6748_s22 }
 0x293   : > { %2991 = vrot.lane.b32.xlu0 %v2840_v31, %s6748_s22  ;;  %v6512_v60 = vpop.f32.mrb[20].mxu0  ;;  %v2710_v62 = vld [vmem:[#allocation3 + $0x148] ss:$2 sm:$0xff]  ;;  %v2764_v27 = vld [vmem:[#allocation3 + $0x149] ss:$2 sm:$0xff] }
 0x294   : > { %v2564_v23 = vadd.f32 %v6512_v60, %v7938_v33  ;;  %v2555_v44 = vpop.f32.mrb[21].mxu0  ;;  %v2735_v28 = vpack.c.bf16 %v2710_v62, %v2710_v62  ;;  %v2708_v24 = vld [vmem:[#allocation3 + $0x128] ss:$2 sm:$0xff]  ;;  %v2789_v20 = vpack.c.bf16 %v2764_v27, %v2764_v27  ;;  %v2762_v46 = vld [vmem:[#allocation3 + $0x129] ss:$2 sm:$0xff] }
 0x295   : > { %v2556_v26 = vadd.f32 %v7938_v33, %v2555_v44  ;;  %v6513_v30 = vpop.f32.mrb[22].mxu0  ;;  %v2734_v51 = vpack.c.bf16 %v2708_v24, %v2708_v24  ;;  %v2816_v49 = vld [vmem:[#allocation3 + $0x12a] ss:$2 sm:$0xff]  ;;  %v2788_v3 = vpack.c.bf16 %v2762_v46, %v2762_v46  ;;  %v2640_v46 = vld [vmem:[#allocation3 + $0x47] ss:$2 sm:$0xff] }
 0x296   : > { %2625 = vst.msk [vmem:[#allocation3 + $0x188] sm:$0xff] %vm471_vm4, %v2564_v23  ;;  %v2567_v16 = vadd.f32 %v6513_v30, %v7938_v33  ;;  %2883 = vrot.lane.b32.xlu1 %v2732_v34, %s6752_s26  ;;  %v2558_v10 = vpop.f32.mrb[23].mxu0  ;;  %v2842_v45 = vpack.c.bf16 %v2816_v49, %v2816_v49  ;;  %v2818_v42 = vld [vmem:[#allocation3 + $0x14a] ss:$2 sm:$0xff]  ;;  %v8064_v30 = vpop.permute.xlu0 %2903 }
 0x297   : > { %2889 = vrot.lane.b32.xlu0 %v2735_v28, %s6752_s26  ;;  %2623 = vst.msk [vmem:[#allocation3 + $0x168] sm:$0xff] %vm471_vm4, %v2556_v26  ;;  %v2559_v58 = vadd.f32 %v7938_v33, %v2558_v10  ;;  %v2843_v56 = vpack.c.bf16 %v2818_v42, %v2818_v42  ;;  %v2690_v24 = vld [vmem:[#allocation3 + $0x8] ss:$2 sm:$0xff]  ;;  %v8069_v49 = vpop.permute.xlu1 %2957 }
 0x298   : > { %2626 = vst.msk [vmem:[#allocation3 + $0x190] sm:$0xff] %vm471_vm4, %v2567_v16  ;;  %v2725_v10 = vpack.c.bf16 %v2690_v24, %v2690_v24 }
 0x299   : > { %2624 = vst.msk [vmem:[#allocation3 + $0x170] sm:$0xff] %vm471_vm4, %v2559_v58 }
 0x29a   : > { %2937 = vrot.lane.b32.xlu1 %v2786_v39, %s6751_s25  ;;  %v2798_v39 = vld [vmem:[#allocation3 + $0xa] ss:$2 sm:$0xff] }
 0x29b   : > { %2887 = vrot.lane.b32.xlu0 %v2734_v51, %s6752_s26 }
 0x29e   : > { %2943 = vrot.lane.b32.xlu1 %v2789_v20, %s6751_s25  ;;  %v2832_v20 = vld [vmem:[#allocation3 + $0x22a] ss:$2 sm:$0xff] }
 0x29f   : > { %2995 = vrot.lane.b32.xlu0 %v2842_v45, %s6748_s22  ;;  %v2768_v25 = vld [vmem:[#allocation3 + $0x189] ss:$2 sm:$0xff]  ;;  %v2822_v48 = vld [vmem:[#allocation3 + $0x18a] ss:$2 sm:$0xff]  ;;  %v2833_v45 = vpack.c.bf16 %v2798_v39, %v2798_v39 }
 0x2a0   : > { %v2791_v5 = vpack.c.bf16 %v2768_v25, %v2768_v25  ;;  %v2845_v29 = vpack.c.bf16 %v2822_v48, %v2822_v48  ;;  %v2714_v50 = vld [vmem:[#allocation3 + $0x188] ss:$2 sm:$0xff]  ;;  %v2766_v53 = vld [vmem:[#allocation3 + $0x169] ss:$2 sm:$0xff] }
 0x2a1   : > { %v2737_v35 = vpack.c.bf16 %v2714_v50, %v2714_v50  ;;  %v2790_v2 = vpack.c.bf16 %v2766_v53, %v2766_v53  ;;  %v2712_v19 = vld [vmem:[#allocation3 + $0x168] ss:$2 sm:$0xff] }
 0x2a2   : > { %2997 = vrot.lane.b32.xlu1 %v2843_v56, %s6748_s22  ;;  %v6516_v15 = vpop.f32.mrb[24].mxu0  ;;  %v2736_v38 = vpack.c.bf16 %v2712_v19, %v2712_v19  ;;  %v2820_v1 = vld [vmem:[#allocation3 + $0x16a] ss:$2 sm:$0xff]  ;;  %v2850_v56 = vpack.c.bf16 %v2832_v20, %v2832_v20 }
 0x2a3   : > { %2947 = vrot.lane.b32.xlu0 %v2791_v5, %s6751_s25  ;;  %v2580_v61 = vadd.f32 %v6516_v15, %v7938_v33  ;;  %v2571_v32 = vpop.f32.mrb[25].mxu0  ;;  %v2844_v47 = vpack.c.bf16 %v2820_v1, %v2820_v1  ;;  %v2744_v5 = vld [vmem:[#allocation3 + $0x9] ss:$2 sm:$0xff] }
 0x2a4   : > { %v2572_v13 = vadd.f32 %v7938_v33, %v2571_v32  ;;  %v6517_v18 = vpop.f32.mrb[26].mxu0  ;;  %v2673_v32 = vpack.c.bf16 %v2640_v46, %v2640_v46 }
 0x2a5   : > { %2629 = vst.msk [vmem:[#allocation3 + $0x1c8] sm:$0xff] %vm471_vm4, %v2580_v61  ;;  %v2583_v37 = vadd.f32 %v6517_v18, %v7938_v33  ;;  %v2574_v40 = vpop.f32.mrb[27].mxu0  ;;  %v2779_v61 = vpack.c.bf16 %v2744_v5, %v2744_v5 }
 0x2a6   : > { %2627 = vst.msk [vmem:[#allocation3 + $0x1a8] sm:$0xff] %vm471_vm4, %v2572_v13  ;;  %v2575_v52 = vadd.f32 %v7938_v33, %v2574_v40  ;;  %2941 = vrot.lane.b32.xlu1 %v2788_v3, %s6751_s25  ;;  %v2644_v40 = vld [vmem:[#allocation3 + $0x87] ss:$2 sm:$0xff] }
 0x2a7   : > { %3001 = vrot.lane.b32.xlu0 %v2845_v29, %s6748_s22  ;;  %2630 = vst.msk [vmem:[#allocation3 + $0x1d0] sm:$0xff] %vm471_vm4, %v2583_v37  ;;  %v2638_v37 = vld [vmem:[#allocation3 + $0x27] ss:$2 sm:$0xff] }
 0x2a8   : > { %2628 = vst.msk [vmem:[#allocation3 + $0x1b0] sm:$0xff] %vm471_vm4, %v2575_v52  ;;  %v2672_v50 = vpack.c.bf16 %v2638_v37, %v2638_v37 }
 0x2aa   : > { %2893 = vrot.lane.b32.xlu1 %v2737_v35, %s6752_s26 }
 0x2ab   : > { %2945 = vrot.lane.b32.xlu0 %v2790_v2, %s6751_s25  ;;  %v2675_v2 = vpack.c.bf16 %v2644_v40, %v2644_v40 }
 0x2ae   : > { %2891 = vrot.lane.b32.xlu1 %v2736_v38, %s6752_s26  ;;  %v2826_v22 = vld [vmem:[#allocation3 + $0x1ca] ss:$2 sm:$0xff]  ;;  %v2772_v41 = vld [vmem:[#allocation3 + $0x1c9] ss:$2 sm:$0xff] }
 0x2af   : > { %v2847_v8 = vpack.c.bf16 %v2826_v22, %v2826_v22  ;;  %v2716_v59 = vld [vmem:[#allocation3 + $0x1a8] ss:$2 sm:$0xff]  ;;  %v2793_v14 = vpack.c.bf16 %v2772_v41, %v2772_v41  ;;  %v2770_v17 = vld [vmem:[#allocation3 + $0x1a9] ss:$2 sm:$0xff] }
 0x2b0   : > { %v2718_v57 = vld [vmem:[#allocation3 + $0x1c8] ss:$2 sm:$0xff]  ;;  %v2738_v43 = vpack.c.bf16 %v2716_v59, %v2716_v59  ;;  %v2792_v11 = vpack.c.bf16 %v2770_v17, %v2770_v17 }
 0x2b1   : > { %3005 = vrot.lane.b32.xlu0 %v2847_v8, %s6748_s22  ;;  %v2739_v6 = vpack.c.bf16 %v2718_v57, %v2718_v57  ;;  %v2824_v55 = vld [vmem:[#allocation3 + $0x1aa] ss:$2 sm:$0xff] }
 0x2b2   : > { %2999 = vrot.lane.b32.xlu1 %v2844_v47, %s6748_s22  ;;  %v2846_v36 = vpack.c.bf16 %v2824_v55, %v2824_v55 }
 0x2b5   : > { %2895 = vrot.lane.b32.xlu0 %v2738_v43, %s6752_s26  ;;  %v6573_v43 = vld [vmem:[%s9030_s3] sm:$0xff]  }
 0x2b6   : > { %2897 = vrot.lane.b32.xlu1 %v2739_v6, %s6752_s26  ;;  %v2642_v6 = vld [vmem:[#allocation3 + $0x67] ss:$2 sm:$0xff]  ;;  %6522 = vmatprep.subr.bf16.mxu1 %v6573_v43 }
 0x2b7   : > { %6523 = vmatpush3.bf16.msra.mxu1 %v6573_v43  ;;  %v2674_v17 = vpack.c.bf16 %v2642_v6, %v2642_v6 }
 0x2ba   : > { %2951 = vrot.lane.b32.xlu1 %v2793_v14, %s6751_s25 }
 0x2be   : > { %2949 = vrot.lane.b32.xlu1 %v2792_v11, %s6751_s25  ;;  %v6574_v11 = vld [vmem:[%s9030_s3 + $0x8] sm:$0xff]  }
 0x2bf   : > { %6524 = vmatprep.subr.bf16.mxu1 %v6574_v11 }
 0x2c0   : > { %6525 = vmatpush3.bf16.msra.mxu1 %v6574_v11 }
 0x2c2   : > { %3003 = vrot.lane.b32.xlu1 %v2846_v36, %s6748_s22  ;;  %v6520_v9 = vpop.f32.mrb[28].mxu0  ;;  %v2648_v36 = vld [vmem:[#allocation3 + $0xc7] ss:$2 sm:$0xff] }
 0x2c3   : > { %v2596_v54 = vadd.f32 %v6520_v9, %v7938_v33  ;;  %v2587_v4 = vpop.f32.mrb[29].mxu0 }
 0x2c4   : > { %v2588_v21 = vadd.f32 %v7938_v33, %v2587_v4  ;;  %v6521_v12 = vpop.f32.mrb[30].mxu0 }
 0x2c5   : > { %2633 = vst.msk [vmem:[#allocation3 + $0x208] sm:$0xff] %vm471_vm4, %v2596_v54  ;;  %v2599_v31 = vadd.f32 %v6521_v12, %v7938_v33  ;;  %v2590_v7 = vpop.f32.mrb[31].mxu0  ;;  %v2677_v12 = vpack.c.bf16 %v2648_v36, %v2648_v36 }
 0x2c6   : > { %2631 = vst.msk [vmem:[#allocation3 + $0x1e8] sm:$0xff] %vm471_vm4, %v2588_v21  ;;  %v2591_v60 = vadd.f32 %v7938_v33, %v2590_v7 }
 0x2c7   : > { %2634 = vst.msk [vmem:[#allocation3 + $0x210] sm:$0xff] %vm471_vm4, %v2599_v31  ;;  %v2646_v31 = vld [vmem:[#allocation3 + $0xa7] ss:$2 sm:$0xff] }
 0x2c8   : > { %2632 = vst.msk [vmem:[#allocation3 + $0x1f0] sm:$0xff] %vm471_vm4, %v2591_v60 }
 0x2ce   : > { %v2722_v62 = vld [vmem:[#allocation3 + $0x208] ss:$2 sm:$0xff]  ;;  %v2776_v28 = vld [vmem:[#allocation3 + $0x209] ss:$2 sm:$0xff] }
 0x2cf   : > { %v2741_v23 = vpack.c.bf16 %v2722_v62, %v2722_v62  ;;  %v2720_v44 = vld [vmem:[#allocation3 + $0x1e8] ss:$2 sm:$0xff]  ;;  %v2795_v63 = vpack.c.bf16 %v2776_v28, %v2776_v28  ;;  %v2774_v33 = vld [vmem:[#allocation3 + $0x1e9] ss:$2 sm:$0xff]  ;;  %v2676_v28 = vpack.c.bf16 %v2646_v31, %v2646_v31 }
 0x2d0   : > { %v2740_v34 = vpack.c.bf16 %v2720_v44, %v2720_v44  ;;  %v2830_v26 = vld [vmem:[#allocation3 + $0x20a] ss:$2 sm:$0xff]  ;;  %v2794_v58 = vpack.c.bf16 %v2774_v33, %v2774_v33  ;;  %v2652_v33 = vld [vmem:[#allocation3 + $0x107] ss:$2 sm:$0xff] }
 0x2d1   : > { %2901 = vrot.lane.b32.xlu0 %v2741_v23, %s6752_s26  ;;  %v2849_v16 = vpack.c.bf16 %v2830_v26, %v2830_v26  ;;  %v2828_v27 = vld [vmem:[#allocation3 + $0x1ea] ss:$2 sm:$0xff] }
 0x2d2   : > { %2899 = vrot.lane.b32.xlu1 %v2740_v34, %s6752_s26  ;;  %v2848_v42 = vpack.c.bf16 %v2828_v27, %v2828_v27  ;;  %v6575_v23 = vld [vmem:[%s9030_s3 + $0x10] sm:$0xff]   ;;  %v6576_v44 = vld [vmem:[%s9030_s3 + $0x18] sm:$0xff]  }
 0x2d3   : > { %6526 = vmatprep.subr.bf16.mxu1 %v6575_v23 }
 0x2d4   : > { %6527 = vmatpush3.bf16.msra.mxu1 %v6575_v23 }
 0x2d5   : > { %2955 = vrot.lane.b32.xlu0 %v2795_v63, %s6751_s25  ;;  %6528 = vmatprep.subr.bf16.mxu1 %v6576_v44 }
 0x2d6   : > { %3009 = vrot.lane.b32.xlu1 %v2849_v16, %s6748_s22 }
 0x2d8   : > { %v2982_v48 = vpop.permute.xlu1 %2981  ;;  %6529 = vmatpush3.bf16.msra.mxu1 %v6576_v44 }
 0x2d9   : > { %v2874_v51 = vpop.permute.xlu0 %2873  ;;  %2953 = vrot.lane.b32.xlu0 %v2794_v58, %s6751_s25  ;;  %v6577_v58 = vld [vmem:[%s9030_s3 + $0x20] sm:$0xff]  }
 0x2da   : > { %2869 = vrot.lane.b32.xlu1 %v2725_v10, %s6752_s26  ;;  %v3021_v13 = vsel %vm471_vm4, %v2673_v32, %v2874_v51  ;;  %v2679_v51 = vpack.c.bf16 %v2652_v33, %v2652_v33  ;;  %6530 = vmatprep.subr.bf16.mxu1 %v6577_v58  ;;  %v6579_v32 = vld [vmem:[%s9030_s3 + $0x30] sm:$0xff]  }
 0x2dc   : > { %6531 = vmatpush3.bf16.msra.mxu1 %v6577_v58 }
 0x2dd   : > { %v2928_v25 = vpop.permute.xlu0 %2927  ;;  %3007 = vrot.lane.b32.xlu0 %v2848_v42, %s6748_s22  ;;  %v6578_v42 = vld [vmem:[%s9030_s3 + $0x28] sm:$0xff]  }
 0x2de   : > { %2977 = vrot.lane.b32.xlu1 %v2833_v45, %s6748_s22  ;;  %v3072_v29 = vsel %vm518_vm10, %v3021_v13, %v2928_v25  ;;  %6532 = vmatprep.subr.bf16.mxu1 %v6578_v42  ;;  %v6580_v13 = vld [vmem:[%s9030_s3 + $0x38] sm:$0xff]  }
 0x2df   : > { %v8079_v35 = vsel %vm2254_vm5, %v3072_v29, %v2982_v48  ;;  %v2650_v48 = vld [vmem:[#allocation3 + $0xe7] ss:$2 sm:$0xff] }
 0x2e0   : > { %6533 = vmatpush3.bf16.msra.mxu1 %v6578_v42 }
 0x2e1   : > { %v2872_v15 = vpop.permute.xlu0 %2871  ;;  %3011 = vrot.lane.b32.xlu0 %v2850_v56, %s6748_s22  ;;  %6534 = vmatprep.subr.bf16.mxu1 %v6579_v32 }
 0x2e2   : > { %v3018_v19 = vsel %vm471_vm4, %v2672_v50, %v2872_v15  ;;  %v2656_v50 = vld [vmem:[#allocation3 + $0x147] ss:$2 sm:$0xff] }
 0x2e4   : > { %v2878_v18 = vpop.permute.xlu1 %2877  ;;  %6535 = vmatpush3.bf16.msra.mxu1 %v6579_v32 }
 0x2e5   : > { %v2926_v3 = vpop.permute.xlu0 %2925  ;;  %2923 = vrot.lane.b32.xlu0 %v2779_v61, %s6751_s25  ;;  %v3027_v38 = vsel %vm471_vm4, %v2675_v2, %v2878_v18  ;;  %v2678_v18 = vpack.c.bf16 %v2650_v48, %v2650_v48  ;;  %6536 = vmatprep.subr.bf16.mxu1 %v6580_v13  ;;  %v2681_v2 = vpack.c.bf16 %v2656_v50, %v2656_v50  ;;  %v2668_v48 = vld [vmem:[#allocation3 + $0x207] ss:$2 sm:$0xff] }
 0x2e6   : > { %v3070_v1 = vsel %vm518_vm10, %v3018_v19, %v2926_v3  ;;  %v2687_v32 = vpack.c.bf16 %v2668_v48, %v2668_v48 }
 0x2e8   : > { %v2932_v53 = vpop.permute.xlu1 %2931  ;;  %6537 = vmatpush3.bf16.msra.mxu1 %v6580_v13 }
 0x2e9   : > { %v2980_v52 = vpop.permute.xlu0 %2979  ;;  %3171 = vrot.lane.b32.xlu0 %v8079_v35, %s6753_s29  ;;  %v3076_v22 = vsel %vm518_vm10, %v3027_v38, %v2932_v53 }
 0x2ea   : > { %v3106_v8 = vsel %vm2254_vm5, %v3070_v1, %v2980_v52  ;;  %v2654_v1 = vld [vmem:[#allocation3 + $0x127] ss:$2 sm:$0xff] }
 0x2ec   : > { %v2876_v47 = vpop.permute.xlu1 %2875 }
 0x2ed   : > { %v2986_v59 = vpop.permute.xlu0 %2985  ;;  %3147 = vrot.lane.b32.xlu0 %v3106_v8, %s6754_s30  ;;  %v3024_v55 = vsel %vm471_vm4, %v2674_v17, %v2876_v47 }
 0x2ee   : > { %v8089_v57 = vsel %vm2254_vm5, %v3076_v22, %v2986_v59  ;;  %v2680_v59 = vpack.c.bf16 %v2654_v1, %v2654_v1 }
 0x2ef   : > { %3173 = vrot.lane.b32.xlu1 %v8089_v57, %s6753_s29 }
 0x2f0   : > { %v2930_v41 = vpop.permute.xlu1 %2929 }
 0x2f1   : > { %v2882_v14 = vpop.permute.xlu0 %2881  ;;  %v3074_v9 = vsel %vm518_vm10, %v3024_v55, %v2930_v41 }
 0x2f2   : > { %v3033_v7 = vsel %vm471_vm4, %v2677_v12, %v2882_v14  ;;  %v2660_v14 = vld [vmem:[#allocation3 + $0x187] ss:$2 sm:$0xff] }
 0x2f3   : > { %v2683_v55 = vpack.c.bf16 %v2660_v14, %v2660_v14  ;;  %v2636_v14 = vld [vmem:[#allocation3 + $0x7] ss:$2 sm:$0xff] }
 0x2f4   : > { %v2984_v54 = vpop.permute.xlu1 %2983 }
 0x2f5   : > { %v2990_v4 = vpop.permute.xlu0 %2989  ;;  %v3110_v21 = vsel %vm2254_vm5, %v3074_v9, %v2984_v54  ;;  %v2658_v9 = vld [vmem:[#allocation3 + $0x167] ss:$2 sm:$0xff] }
 0x2f6   : > { %3188 = vrot.lane.b32.xlu0 %v3110_v21, %s6755_s16  ;;  %3149 = vrot.lane.b32.xlu1 %v3110_v21, %s6754_s30  ;;  %v2682_v12 = vpack.c.bf16 %v2658_v9, %v2658_v9 }
 0x2f8   : > { %v2936_v60 = vpop.permute.xlu1 %2935 }
 0x2f9   : > { %v2880_v62 = vpop.permute.xlu0 %2879  ;;  %v3080_v34 = vsel %vm518_vm10, %v3033_v7, %v2936_v60 }
 0x2fa   : > { %v8114_v26 = vsel %vm2254_vm5, %v3080_v34, %v2990_v4  ;;  %v3030_v63 = vsel %vm471_vm4, %v2676_v28, %v2880_v62  ;;  %v2664_v28 = vld [vmem:[#allocation3 + $0x1c7] ss:$2 sm:$0xff] }
 0x2fb   : > { %3175 = vrot.lane.b32.xlu0 %v8114_v26, %s6753_s29 }
 0x2fc   : > { %v2988_v24 = vpop.permute.xlu1 %2987 }
 0x2fd   : > { %v2934_v16 = vpop.permute.xlu0 %2933 }
 0x2fe   : > { %v3078_v10 = vsel %vm518_vm10, %v3030_v63, %v2934_v16  ;;  %v2685_v16 = vpack.c.bf16 %v2664_v28, %v2664_v28 }
 0x2ff   : > { %v3114_v39 = vsel %vm2254_vm5, %v3078_v10, %v2988_v24 }
 0x300   : > { %3190 = vrot.lane.b32.xlu1 %v3114_v39, %s6755_s16  ;;  %3151 = vrot.lane.b32.xlu0 %v3114_v39, %s6754_s30  ;;  %v2886_v27 = vpop.permute.xlu1 %2885  ;;  %v2662_v39 = vld [vmem:[#allocation3 + $0x1a7] ss:$2 sm:$0xff] }
 0x301   : > { %v2940_v20 = vpop.permute.xlu0 %2939  ;;  %v3039_v45 = vsel %vm471_vm4, %v2679_v51, %v2886_v27 }
 0x302   : > { %v3084_v25 = vsel %vm518_vm10, %v3039_v45, %v2940_v20  ;;  %v2684_v45 = vpack.c.bf16 %v2662_v39, %v2662_v39 }
 0x304   : > { %v2994_v56 = vpop.permute.xlu1 %2993 }
 0x305   : > { %v2992_v5 = vpop.permute.xlu0 %2991  ;;  %v8132_v46 = vsel %vm2254_vm5, %v3084_v25, %v2994_v56 }
 0x306   : > { %3177 = vrot.lane.b32.xlu1 %v8132_v46, %s6753_s29 }
 0x308   : > { %v2884_v15 = vpop.permute.xlu1 %2883 }
 0x309   : > { %v2890_v61 = vpop.permute.xlu0 %2889  ;;  %v3036_v3 = vsel %vm471_vm4, %v2678_v18, %v2884_v15 }
 0x30a   : > { %v3045_v38 = vsel %vm471_vm4, %v2681_v2, %v2890_v61 }
 0x30c   : > { %v2938_v29 = vpop.permute.xlu1 %2937 }
 0x30d   : > { %v2888_v37 = vpop.permute.xlu0 %2887  ;;  %v3082_v40 = vsel %vm518_vm10, %v3036_v3, %v2938_v29 }
 0x30e   : > { %v3118_v53 = vsel %vm2254_vm5, %v3082_v40, %v2992_v5  ;;  %v3042_v6 = vsel %vm471_vm4, %v2680_v59, %v2888_v37  ;;  %v2670_v37 = vld [vmem:[#allocation3 + $0x227] ss:$2 sm:$0xff] }
 0x30f   : > { %3192 = vrot.lane.b32.xlu0 %v3118_v53, %s6755_s16  ;;  %3153 = vrot.lane.b32.xlu1 %v3118_v53, %s6754_s30  ;;  %v2666_v40 = vld [vmem:[#allocation3 + $0x1e7] ss:$2 sm:$0xff] }
 0x310   : > { %v2944_v52 = vpop.permute.xlu1 %2943  ;;  %v2686_v2 = vpack.c.bf16 %v2666_v40, %v2666_v40 }
 0x311   : > { %v2996_v19 = vpop.permute.xlu0 %2995  ;;  %v3088_v22 = vsel %vm518_vm10, %v3045_v38, %v2944_v52  ;;  %v2688_v52 = vpack.c.bf16 %v2670_v37, %v2670_v37 }
 0x314   : > { %v2998_v8 = vpop.permute.xlu1 %2997 }
 0x315   : > { %v8150_v47 = vsel %vm2254_vm5, %v3088_v22, %v2998_v8  ;;  %v2948_v43 = vpop.permute.xlu0 %2947  ;;  %v3066_v22 = vsel %vm471_vm4, %v2688_v52, %v8064_v30 }
 0x316   : > { %3179 = vrot.lane.b32.xlu0 %v8150_v47, %s6753_s29  ;;  %v3102_v59 = vsel %vm518_vm10, %v3066_v22, %v8069_v49 }
 0x318   : > { %v2942_v41 = vpop.permute.xlu1 %2941 }
 0x319   : > { %v3086_v17 = vsel %vm518_vm10, %v3042_v6, %v2942_v41  ;;  %v3002_v54 = vpop.permute.xlu0 %3001 }
 0x31a   : > { %v3122_v11 = vsel %vm2254_vm5, %v3086_v17, %v2996_v19 }
 0x31b   : > { %3155 = vrot.lane.b32.xlu0 %v3122_v11, %s6754_s30  ;;  %3194 = vrot.lane.b32.xlu1 %v3122_v11, %s6755_s16  ;;  %v2671_v11 = vpack.c.bf16 %v2636_v14, %v2636_v14 }
 0x31c   : > { %v2894_v36 = vpop.permute.xlu1 %2893 }
 0x31d   : > { %v3051_v4 = vsel %vm471_vm4, %v2683_v55, %v2894_v36  ;;  %v2946_v62 = vpop.permute.xlu0 %2945 }
 0x31e   : > { %v3092_v21 = vsel %vm518_vm10, %v3051_v4, %v2948_v43 }
 0x31f   : > { %v8162_v31 = vsel %vm2254_vm5, %v3092_v21, %v3002_v54 }
 0x320   : > { %v2892_v7 = vpop.permute.xlu1 %2891  ;;  %3181 = vrot.lane.b32.xlu1 %v8162_v31, %s6753_s29 }
 0x321   : > { %v3048_v60 = vsel %vm471_vm4, %v2682_v12, %v2892_v7 }
 0x322   : > { %v3090_v44 = vsel %vm518_vm10, %v3048_v60, %v2946_v62 }
 0x323   : > { %v3006_v24 = vpop.permute.xlu0 %3005 }
 0x324   : > { %v3000_v23 = vpop.permute.xlu1 %2999 }
 0x325   : > { %v3126_v34 = vsel %vm2254_vm5, %v3090_v44, %v3000_v23 }
 0x326   : > { %3196 = vrot.lane.b32.xlu0 %v3126_v34, %s6755_s16  ;;  %3157 = vrot.lane.b32.xlu1 %v3126_v34, %s6754_s30 }
 0x327   : > { %v2896_v27 = vpop.permute.xlu0 %2895 }
 0x328   : > { %v2898_v63 = vpop.permute.xlu1 %2897  ;;  %v3054_v42 = vsel %vm471_vm4, %v2684_v45, %v2896_v27 }
 0x329   : > { %v3057_v33 = vsel %vm471_vm4, %v2685_v16, %v2898_v63 }
 0x32c   : > { %v2952_v10 = vpop.permute.xlu1 %2951 }
 0x32d   : > { %v3096_v58 = vsel %vm518_vm10, %v3057_v33, %v2952_v10 }
 0x32e   : > { %v8174_v51 = vsel %vm2254_vm5, %v3096_v58, %v3006_v24 }
 0x32f   : > { %3183 = vrot.lane.b32.xlu0 %v8174_v51, %s6753_s29 }
 0x330   : > { %v2950_v20 = vpop.permute.xlu1 %2949 }
 0x331   : > { %v3094_v25 = vsel %vm518_vm10, %v3054_v42, %v2950_v20 }
 0x334   : > { %v3004_v56 = vpop.permute.xlu1 %3003 }
 0x335   : > { %v3130_v5 = vsel %vm2254_vm5, %v3094_v25, %v3004_v56 }
 0x336   : > { %3198 = vrot.lane.b32.xlu1 %v3130_v5, %s6755_s16  ;;  %3159 = vrot.lane.b32.xlu0 %v3130_v5, %s6754_s30 }
 0x343   : > { %v2902_v15 = vpop.permute.xlu0 %2901 }
 0x344   : > { %v2900_v61 = vpop.permute.xlu1 %2899  ;;  %v3063_v13 = vsel %vm471_vm4, %v2687_v32, %v2902_v15 }
 0x345   : > { %v3060_v19 = vsel %vm471_vm4, %v2686_v2, %v2900_v61 }
 0x347   : > { %v2956_v18 = vpop.permute.xlu0 %2955 }
 0x348   : > { %v3100_v3 = vsel %vm518_vm10, %v3063_v13, %v2956_v18  ;;  %v3010_v29 = vpop.permute.xlu1 %3009 }
 0x349   : > { %v3136_v50 = vsel %vm2254_vm5, %v3100_v3, %v3010_v29 }
 0x34a   : > { %3185 = vrot.lane.b32.xlu1 %v3136_v50, %s6753_s29 }
 0x34b   : > { %v2954_v53 = vpop.permute.xlu0 %2953 }
 0x34c   : > { %v3098_v38 = vsel %vm518_vm10, %v3060_v19, %v2954_v53  ;;  %v2870_v41 = vpop.permute.xlu1 %2869 }
 0x34d   : > { %v3015_v30 = vsel %vm471_vm4, %v2671_v11, %v2870_v41 }
 0x34f   : > { %v3008_v1 = vpop.permute.xlu0 %3007 }
 0x350   : > { %v3134_v8 = vsel %vm2254_vm5, %v3098_v38, %v3008_v1  ;;  %v2978_v55 = vpop.permute.xlu1 %2977 }
 0x351   : > { %3200 = vrot.lane.b32.xlu0 %v3134_v8, %s6755_s16  ;;  %3161 = vrot.lane.b32.xlu1 %v3134_v8, %s6754_s30 }
 0x353   : > { %v3012_v43 = vpop.permute.xlu0 %3011 }
 0x354   : > { %v3138_v6 = vsel %vm2254_vm5, %v3102_v59, %v3012_v43 }
 0x355   : > { %3202 = vrot.lane.b32.xlu1 %v3138_v6, %s6755_s16  ;;  %v6046_v6 = vld [vmem:[%s9031_s4] ss:$0 sm:$0xff] }
 0x357   : > { %v2924_v17 = vpop.permute.xlu0 %2923 }
 0x358   : > { %v3068_v54 = vsel %vm518_vm10, %v3015_v30, %v2924_v17 }
 0x359   : > { %v3104_v4 = vsel %vm2254_vm5, %v3068_v54, %v2978_v55 }
 0x35b   : > { %v3172_v36 = vpop.permute.xlu0 %3171 }
 0x35f   : > { %v3148_v49 = vpop.permute.xlu0 %3147 }
 0x360   : > { %v3206_v12 = vsel %vm3204_vm11, %v3104_v4, %v3148_v49 }
 0x361   : > { %v3174_v9 = vpop.permute.xlu1 %3173  ;;  %v3223_v23 = vsel %vm3221_vm12, %v3206_v12, %v3172_v36 }
 0x368   : > { %v3150_v21 = vpop.permute.xlu1 %3149  ;;  %v3189_v60 = vpop.permute.xlu0 %3188 }
 0x369   : > { %v3208_v7 = vsel %vm3204_vm11, %v8079_v35, %v3150_v21  ;;  %v3239_v34 = vsel %vm2408_vm8, %v3223_v23, %v3189_v60 }
 0x36a   : > { %v3225_v44 = vsel %vm3221_vm12, %v3208_v7, %v3174_v9  ;;  %v3567_v7 = vld [vmem:[#allocation4 + $0x128] ss:$2 sm:$0xff] }
 0x36b   : > { %v3577_v60 = vpack.c.bf16 %v3567_v7, %v3567_v7 }
 0x36d   : > { %v3176_v24 = vpop.permute.xlu0 %3175  ;;  %3666 = vrot.lane.b32.xlu0 %v3577_v60, %s6751_s25 }
 0x372   : > { %v3191_v62 = vpop.permute.xlu1 %3190  ;;  %v3152_v33 = vpop.permute.xlu0 %3151 }
 0x373   : > { %v3241_v28 = vsel %vm2408_vm8, %v3225_v44, %v3191_v62  ;;  %v3210_v35 = vsel %vm3204_vm11, %v8089_v57, %v3152_v33 }
 0x374   : > { %v6047_v63 = vcombine.low %v3239_v34, %v3241_v28  ;;  %v3227_v27 = vsel %vm3221_vm12, %v3210_v35, %v3176_v24 }
 0x376   : > { %6538 = vmatprep.mubr.bf16.mxu1 %v6047_v63 }
 0x378   : > { %v3178_v16 = vpop.permute.xlu1 %3177 }
 0x381   : > { %v3154_v10 = vpop.permute.xlu1 %3153  ;;  %v3193_v39 = vpop.permute.xlu0 %3192 }
 0x382   : > { %v3212_v58 = vsel %vm3204_vm11, %v8114_v26, %v3154_v10  ;;  %v3243_v42 = vsel %vm2408_vm8, %v3227_v27, %v3193_v39 }
 0x383   : > { %v3229_v20 = vsel %vm3221_vm12, %v3212_v58, %v3178_v16 }
 0x388   : > { %v3180_v5 = vpop.permute.xlu0 %3179 }
 0x38d   : > { %v3195_v45 = vpop.permute.xlu1 %3194  ;;  %v3156_v15 = vpop.permute.xlu0 %3155 }
 0x38e   : > { %v3245_v25 = vsel %vm2408_vm8, %v3229_v20, %v3195_v45  ;;  %v3214_v57 = vsel %vm3204_vm11, %v8132_v46, %v3156_v15 }
 0x38f   : > { %v6048_v56 = vcombine.low %v3243_v42, %v3245_v25  ;;  %v3231_v13 = vsel %vm3221_vm12, %v3214_v57, %v3180_v5 }
 0x391   : > { %6539 = vmatmul.mubr.bf16.vlgmr.msra.gmra.mrb[0].mxu1 %v6048_v56 }
 0x392   : > { %v3182_v48 = vpop.permute.xlu1 %3181 }
 0x398   : > { %v3158_v61 = vpop.permute.xlu1 %3157  ;;  %v3197_v32 = vpop.permute.xlu0 %3196 }
 0x399   : > { %v3216_v26 = vsel %vm3204_vm11, %v8150_v47, %v3158_v61  ;;  %v3247_v29 = vsel %vm2408_vm8, %v3231_v13, %v3197_v32 }
 0x39a   : > { %v3233_v18 = vsel %vm3221_vm12, %v3216_v26, %v3182_v48 }
 0x3a1   : > { %v3184_v50 = vpop.permute.xlu0 %3183 }
 0x3a8   : > { %v3199_v3 = vpop.permute.xlu1 %3198  ;;  %v3160_v52 = vpop.permute.xlu0 %3159 }
 0x3a9   : > { %v3249_v37 = vsel %vm2408_vm8, %v3233_v18, %v3199_v3  ;;  %v3218_v46 = vsel %vm3204_vm11, %v8162_v31, %v3160_v52 }
 0x3aa   : > { %v6049_v40 = vcombine.low %v3247_v29, %v3249_v37  ;;  %v3235_v38 = vsel %vm3221_vm12, %v3218_v46, %v3184_v50 }
 0x3ac   : > { %6542 = vmatprep.mubr.bf16.mxu1 %v6049_v40 }
 0x3bc   : > { %v3186_v53 = vpop.permute.xlu1 %3185 }
 0x3c3   : > { %v3162_v2 = vpop.permute.xlu1 %3161  ;;  %v3201_v19 = vpop.permute.xlu0 %3200 }
 0x3c4   : > { %v3220_v47 = vsel %vm3204_vm11, %v8174_v51, %v3162_v2  ;;  %v3251_v8 = vsel %vm2408_vm8, %v3235_v38, %v3201_v19 }
 0x3c5   : > { %v3237_v1 = vsel %vm3221_vm12, %v3220_v47, %v3186_v53 }
 0x3c7   : > { %v3203_v22 = vpop.permute.xlu1 %3202 }
 0x3c8   : > { %v3253_v59 = vsel %vm2408_vm8, %v3237_v1, %v3203_v22 }
 0x3c9   : > { %v6050_v43 = vcombine.low %v3251_v8, %v3253_v59 }
 0x3cb   : > { %6543 = vmatmul.mubr.bf16.gmra.mrb[4].mxu1 %v6050_v43 }
 0x464   : > { %v6540_v31 = vpop.f32.mrb[0].mxu1 }
 0x465   : > { %v3383_v41 = vpop.f32.mrb[1].mxu1  ;;  %v3392_v11 = vadd.f32 %v6540_v31, %v6046_v6 }
 0x466   : > { %v3384_v14 = vadd.f32 %v6046_v6, %v3383_v41  ;;  %v6541_v51 = vpop.f32.mrb[2].mxu1 }
 0x467   : > { %v3386_v17 = vpop.f32.mrb[3].mxu1  ;;  %v3395_v36 = vadd.f32 %v6541_v51, %v6046_v6  ;;  %v3417_v4 = vsel %vm518_vm10, %v3392_v11, 0.0 }
 0x468   : > { %v3387_v55 = vadd.f32 %v6046_v6, %v3386_v17  ;;  %v3414_v30 = vsel %vm518_vm10, %v3384_v14, 0.0 }
 0x469   : > { %v3419_v21 = vsel %vm518_vm10, %v3395_v36, 0.0 }
 0x46a   : > { %v3415_v9 = vsel %vm518_vm10, %v3387_v55, 0.0 }
 0x46b   : > { %v3416_v54 = vadd.f32 %v3415_v9, %v3414_v30 }
 0x46d   : > { %v3418_v49 = vadd.f32 %v3417_v4, %v3416_v54 }
 0x46f   : > { %v3420_v12 = vadd.f32 %v3419_v21, %v3418_v49 }
 0x49e   : > { %v6544_v62 = vpop.f32.mrb[4].mxu1 }
 0x49f   : > { %v3399_v23 = vpop.f32.mrb[5].mxu1  ;;  %v3408_v63 = vadd.f32 %v6544_v62, %v6046_v6 }
 0x4a0   : > { %v3400_v44 = vadd.f32 %v6046_v6, %v3399_v23  ;;  %v6545_v34 = vpop.f32.mrb[6].mxu1 }
 0x4a1   : > { %v3402_v28 = vpop.f32.mrb[7].mxu1  ;;  %v3411_v10 = vadd.f32 %v6545_v34, %v6046_v6  ;;  %v3425_v58 = vsel %vm518_vm10, %v3408_v63, 0.0 }
 0x4a2   : > { %v3421_v24 = vsel %vm518_vm10, %v3400_v44, 0.0  ;;  %v3403_v16 = vadd.f32 %v6046_v6, %v3402_v28 }
 0x4a3   : > { %v3422_v33 = vadd.f32 %v3421_v24, %v3420_v12  ;;  %v3427_v27 = vsel %vm518_vm10, %v3411_v10, 0.0 }
 0x4a4   : > { %v3423_v0 = vsel %vm518_vm10, %v3403_v16, 0.0 }
 0x4a5   : > { %v3424_v35 = vadd.f32 %v3423_v0, %v3422_v33 }
 0x4a7   : > { %v3426_v39 = vadd.f32 %v3425_v58, %v3424_v35 }
 0x4a9   : > { %v3428_v20 = vadd.f32 %v3427_v27, %v3426_v39 }
 0x4ab   : > { %v3429_v45 = vrot.slane %v3428_v20, 4 }
 0x4ad   : > { %v3430_v42 = vadd.f32 %v3429_v45, %v3428_v20 }
 0x4af   : > { %v3431_v25 = vrot.slane %v3430_v42, 2 }
 0x4b1   : > { %v3432_v56 = vadd.f32 %v3431_v25, %v3430_v42 }
 0x4b3   : > { %v3433_v5 = vrot.slane %v3432_v56, 1 }
 0x4b5   : > { %v3434_v48 = vadd.f32 %v3433_v5, %v3432_v56 }
 0x4b7   : > { %v3436_v15 = vmul.f32 0.015625, %v3434_v48 }
 0x4b9   : > { %v3437_v61 = vsub.f32 %v3384_v14, %v3436_v15  ;;  %v3438_v57 = vsub.f32 %v3387_v55, %v3436_v15  ;;  %v3439_v26 = vsub.f32 %v3392_v11, %v3436_v15  ;;  %v3440_v32 = vsub.f32 %v3395_v36, %v3436_v15 }
 0x4ba   : > { %v3441_v13 = vsub.f32 %v3400_v44, %v3436_v15  ;;  %v3442_v18 = vsub.f32 %v3403_v16, %v3436_v15  ;;  %v3443_v3 = vsub.f32 %v3408_v63, %v3436_v15  ;;  %v3444_v29 = vsub.f32 %v3411_v10, %v3436_v15 }
 0x4bb   : > { %v3445_v37 = vmul.f32 %v3437_v61, %v3437_v61  ;;  %v3446_v40 = vmul.f32 %v3438_v57, %v3438_v57  ;;  %v3447_v50 = vmul.f32 %v3439_v26, %v3439_v26  ;;  %v3448_v53 = vmul.f32 %v3440_v32, %v3440_v32 }
 0x4bc   : > { %v3449_v47 = vmul.f32 %v3441_v13, %v3441_v13  ;;  %v3450_v1 = vmul.f32 %v3442_v18, %v3442_v18  ;;  %v3451_v59 = vmul.f32 %v3443_v3, %v3443_v3  ;;  %v3452_v31 = vmul.f32 %v3444_v29, %v3444_v29 }
 0x4bd   : > { %v3453_v52 = vsel %vm518_vm10, %v3445_v37, 0.0  ;;  %v3454_v2 = vsel %vm518_vm10, %v3446_v40, 0.0  ;;  %v3456_v19 = vsel %vm518_vm10, %v3447_v50, 0.0  ;;  %v3458_v22 = vsel %vm518_vm10, %v3448_v53, 0.0 }
 0x4be   : > { %v3455_v46 = vadd.f32 %v3454_v2, %v3453_v52  ;;  %v3460_v43 = vsel %vm518_vm10, %v3449_v47, 0.0  ;;  %v3462_v41 = vsel %vm518_vm10, %v3450_v1, 0.0  ;;  %v3464_v51 = vsel %vm518_vm10, %v3451_v59, 0.0  ;;  %v3597_v1 = vld [vmem:[#allocation4 + $0x129] ss:$2 sm:$0xff] }
 0x4bf   : > { %v3466_v11 = vsel %vm518_vm10, %v3452_v31, 0.0 }
 0x4c0   : > { %v3457_v38 = vadd.f32 %v3456_v19, %v3455_v46 }
 0x4c2   : > { %v3459_v8 = vadd.f32 %v3458_v22, %v3457_v38 }
 0x4c4   : > { %v3461_v6 = vadd.f32 %v3460_v43, %v3459_v8  ;;  %v3607_v43 = vpack.c.bf16 %v3597_v1, %v3597_v1 }
 0x4c6   : > { %v3463_v14 = vadd.f32 %v3462_v41, %v3461_v6  ;;  %v3627_v6 = vld [vmem:[#allocation4 + $0x12a] ss:$2 sm:$0xff] }
 0x4c8   : > { %v3465_v17 = vadd.f32 %v3464_v51, %v3463_v14  ;;  %v3637_v14 = vpack.c.bf16 %v3627_v6, %v3627_v6  ;;  %v3549_v51 = vld [vmem:[#allocation4 + $0x8] ss:$2 sm:$0xff] }
 0x4ca   : > { %v3467_v55 = vadd.f32 %v3466_v11, %v3465_v17  ;;  %v3579_v17 = vld [vmem:[#allocation4 + $0x9] ss:$2 sm:$0xff] }
 0x4cc   : > { %v3468_v30 = vrot.slane %v3467_v55, 4 }
 0x4ce   : > { %v3469_v36 = vadd.f32 %v3468_v30, %v3467_v55  ;;  %v3568_v55 = vpack.c.bf16 %v3549_v51, %v3549_v51  ;;  %v3598_v30 = vpack.c.bf16 %v3579_v17, %v3579_v17 }
 0x4d0   : > { %v3470_v9 = vrot.slane %v3469_v36, 2 }
 0x4d2   : > { %v3471_v54 = vadd.f32 %v3470_v9, %v3469_v36  ;;  %v3609_v36 = vld [vmem:[#allocation4 + $0xa] ss:$2 sm:$0xff] }
 0x4d4   : > { %v3472_v4 = vrot.slane %v3471_v54, 1 }
 0x4d6   : > { %v3473_v49 = vadd.f32 %v3472_v4, %v3471_v54  ;;  %v3628_v54 = vpack.c.bf16 %v3609_v36, %v3609_v36 }
 0x4d8   : > { %v3474_v21 = vmul.f32 0.015625, %v3473_v49 }
 0x4da   : > { %v3475_v12 = vadd.f32 1e-05, %v3474_v21 }
 0x4dc   : > { %6722 = vrsqrt.f32 %v3475_v12 }
 0x4e6   : > { %v6723_v7 = vpop.eup %6722 }
 0x4e7   : > { %v3477_v60 = vmul.f32 %v6723_v7, %v3437_v61  ;;  %v3478_v62 = vmul.f32 %v6723_v7, %v3438_v57  ;;  %v3479_v23 = vmul.f32 %v6723_v7, %v3439_v26  ;;  %v3480_v44 = vmul.f32 %v6723_v7, %v3440_v32 }
 0x4e8   : > { %v3481_v34 = vmul.f32 %v6723_v7, %v3441_v13  ;;  %v3482_v28 = vmul.f32 %v6723_v7, %v3442_v18  ;;  %v3483_v63 = vmul.f32 %v6723_v7, %v3443_v3  ;;  %v3484_v24 = vmul.f32 %v6723_v7, %v3444_v29 }
 0x4e9   : > { %vm3485_vm14 = vcmp.gt.f32.partialorder %v3477_v60, 0.0  ;;  %vm3486_vm15 = vcmp.gt.f32.partialorder %v3478_v62, 0.0  ;;  %vm3487_vm0 = vcmp.gt.f32.partialorder %v3479_v23, 0.0  ;;  %vm3488_vm1 = vcmp.gt.f32.partialorder %v3480_v44, 0.0 }
 0x4ea   : > { %vm3489_vm2 = vcmp.gt.f32.partialorder %v3481_v34, 0.0  ;;  %vm3490_vm3 = vcmp.gt.f32.partialorder %v3482_v28, 0.0  ;;  %vm3491_vm4 = vcmp.gt.f32.partialorder %v3483_v63, 0.0  ;;  %vm3492_vm5 = vcmp.gt.f32.partialorder %v3484_v24, 0.0 }
 0x4eb   : > { %v3493_v16 = vmul.f32 0.2, %v3477_v60  ;;  %v3494_v33 = vmul.f32 0.2, %v3478_v62  ;;  %v3495_v10 = vmul.f32 0.2, %v3479_v23 }
 0x4ec   : > { %v3496_v0 = vmul.f32 0.2, %v3480_v44  ;;  %v3497_v35 = vmul.f32 0.2, %v3481_v34  ;;  %v3498_v58 = vmul.f32 0.2, %v3482_v28 }
 0x4ed   : > { %v3499_v39 = vmul.f32 0.2, %v3483_v63  ;;  %v3500_v27 = vmul.f32 0.2, %v3484_v24  ;;  %v3501_v20 = vsel %vm3485_vm14, %v3477_v60, %v3493_v16  ;;  %v3502_v45 = vsel %vm3486_vm15, %v3478_v62, %v3494_v33  ;;  %v6583_v16 = vld [vmem:[%s9032_s5 + $0x48] sm:$0xff]  }
 0x4ee   : > { %v3503_v42 = vsel %vm3487_vm0, %v3479_v23, %v3495_v10  ;;  %v3504_v25 = vsel %vm3488_vm1, %v3480_v44, %v3496_v0  ;;  %v3505_v56 = vsel %vm3489_vm2, %v3481_v34, %v3497_v35  ;;  %v3506_v5 = vsel %vm3490_vm3, %v3482_v28, %v3498_v58  ;;  %3510 = vst.msk [vmem:[#allocation4 + $0x28] sm:$0xff] %vm518_vm10, %v3501_v20  ;;  %v6584_v0 = vld [vmem:[%s9032_s5 + $0x8] sm:$0xff]  }
 0x4ef   : > { %3511 = vst.msk [vmem:[#allocation4 + $0x48] sm:$0xff] %vm518_vm10, %v3502_v45  ;;  %v3507_v48 = vsel %vm3491_vm4, %v3483_v63, %v3499_v39  ;;  %v3508_v15 = vsel %vm3492_vm5, %v3484_v24, %v3500_v27  ;;  %3512 = vst.msk [vmem:[#allocation4 + $0x68] sm:$0xff] %vm518_vm10, %v3503_v42  ;;  %v6581_v63 = vld [vmem:[%s9032_s5 + $0x40] sm:$0xff]   ;;  %v6585_v39 = vld [vmem:[%s9032_s5 + $0x50] sm:$0xff]   ;;  %vm558_vm14 = vsmask.f32 7950 }
 0x4f0   : > { %3513 = vst.msk [vmem:[#allocation4 + $0x88] sm:$0xff] %vm518_vm10, %v3504_v25  ;;  %3514 = vst.msk [vmem:[#allocation4 + $0xa8] sm:$0xff] %vm518_vm10, %v3505_v56  ;;  %v6582_v24 = vld [vmem:[%s9032_s5] sm:$0xff]   ;;  %6306 = vmatprep.subr.bf16.mxu1 %v6581_v63  ;;  %v6586_v45 = vld [vmem:[%s9032_s5 + $0x10] sm:$0xff]   ;;  %vm4085_vm4 = vcmask 254976  }
 0x4f1   : > { %3515 = vst.msk [vmem:[#allocation4 + $0xc8] sm:$0xff] %vm518_vm10, %v3506_v5  ;;  %3516 = vst.msk [vmem:[#allocation4 + $0xe8] sm:$0xff] %vm518_vm10, %v3507_v48  ;;  %6307 = vmatpush3.bf16.msra.mxu1 %v6582_v24  ;;  %v6587_v25 = vld [vmem:[%s9032_s5 + $0x58] sm:$0xff]   ;;  %v6589_v48 = vld [vmem:[%s9032_s5 + $0x60] sm:$0xff]   ;;  %vm4394_vm5 = vsmask.f32 256 }
 0x4f2   : > { %3517 = vst.msk [vmem:[#allocation4 + $0x108] sm:$0xff] %vm518_vm10, %v3508_v15  ;;  %6308 = vmatprep.subr.bf16.mxu1 %v6583_v16  ;;  %v6588_v5 = vld [vmem:[%s9032_s5 + $0x18] sm:$0xff]   ;;  %v6590_v15 = vld [vmem:[%s9032_s5 + $0x20] sm:$0xff]   ;;  %vm8458_vm15 = vmand %vm557_vm13, %vm558_vm14  ;;  %vm607_vm13 = vcmask 519171  }
 0x4f5   : > { %v3551_v18 = vld [vmem:[#allocation4 + $0x28] ss:$2 sm:$0xff]  ;;  %v3581_v37 = vld [vmem:[#allocation4 + $0x29] ss:$2 sm:$0xff]  ;;  %6309 = vmatpush3.bf16.msra.mxu1 %v6584_v0 }
 0x4f6   : > { %v3555_v57 = vld [vmem:[#allocation4 + $0x68] ss:$2 sm:$0xff]  ;;  %v3585_v13 = vld [vmem:[#allocation4 + $0x69] ss:$2 sm:$0xff]  ;;  %v3569_v29 = vpack.c.bf16 %v3551_v18, %v3551_v18  ;;  %v3599_v50 = vpack.c.bf16 %v3581_v37, %v3581_v37  ;;  %6310 = vmatprep.subr.bf16.mxu1 %v6585_v39 }
 0x4f7   : > { %v3559_v61 = vld [vmem:[#allocation4 + $0xa8] ss:$2 sm:$0xff]  ;;  %v3571_v32 = vpack.c.bf16 %v3555_v57, %v3555_v57  ;;  %v3601_v3 = vpack.c.bf16 %v3585_v13, %v3585_v13  ;;  %v3589_v40 = vld [vmem:[#allocation4 + $0xa9] ss:$2 sm:$0xff] }
 0x4f8   : > { %v3573_v26 = vpack.c.bf16 %v3559_v61, %v3559_v61  ;;  %v3603_v53 = vpack.c.bf16 %v3589_v40, %v3589_v40  ;;  %v3619_v52 = vld [vmem:[#allocation4 + $0xaa] ss:$2 sm:$0xff]  ;;  %v3593_v59 = vld [vmem:[#allocation4 + $0xe9] ss:$2 sm:$0xff] }
 0x4f9   : > { %3654 = vrot.lane.b32.xlu0 %v3571_v32, %s6751_s25  ;;  %v3615_v2 = vld [vmem:[#allocation4 + $0x6a] ss:$2 sm:$0xff]  ;;  %v3633_v46 = vpack.c.bf16 %v3619_v52, %v3619_v52  ;;  %v3605_v31 = vpack.c.bf16 %v3593_v59, %v3593_v59  ;;  %v3583_v21 = vld [vmem:[#allocation4 + $0x49] ss:$2 sm:$0xff]  ;;  %6311 = vmatpush3.bf16.msra.mxu1 %v6586_v45  ;;  %v3667_v32 = vpop.permute.xlu0 %3666 }
 0x4fa   : > { %3658 = vrot.lane.b32.xlu1 %v3573_v26, %s6751_s25  ;;  %v3631_v47 = vpack.c.bf16 %v3615_v2, %v3615_v2  ;;  %v3563_v19 = vld [vmem:[#allocation4 + $0xe8] ss:$2 sm:$0xff]  ;;  %v3600_v7 = vpack.c.bf16 %v3583_v21, %v3583_v21  ;;  %v3587_v60 = vld [vmem:[#allocation4 + $0x89] ss:$2 sm:$0xff]  ;;  %6312 = vmatprep.subr.bf16.mxu1 %v6587_v25  ;;  %v6596_v52 = vld [vmem:[%s9032_s5 + $0x38] sm:$0xff]  }
 0x4fb   : > { %v3611_v38 = vld [vmem:[#allocation4 + $0x2a] ss:$2 sm:$0xff]  ;;  %v3575_v22 = vpack.c.bf16 %v3563_v19, %v3563_v19  ;;  %v3602_v23 = vpack.c.bf16 %v3587_v60, %v3587_v60  ;;  %v3595_v58 = vld [vmem:[#allocation4 + $0x109] ss:$2 sm:$0xff] }
 0x4fc   : > { %v3629_v8 = vpack.c.bf16 %v3611_v38, %v3611_v38  ;;  %v3623_v41 = vld [vmem:[#allocation4 + $0xea] ss:$2 sm:$0xff]  ;;  %v3606_v20 = vpack.c.bf16 %v3595_v58, %v3595_v58  ;;  %v3591_v42 = vld [vmem:[#allocation4 + $0xc9] ss:$2 sm:$0xff] }
 0x4fd   : > { %3650 = vrot.lane.b32.xlu0 %v3569_v29, %s6751_s25  ;;  %v3635_v11 = vpack.c.bf16 %v3623_v41, %v3623_v41  ;;  %v3557_v9 = vld [vmem:[#allocation4 + $0x88] ss:$2 sm:$0xff]  ;;  %v3604_v56 = vpack.c.bf16 %v3591_v42, %v3591_v42  ;;  %6313 = vmatpush3.bf16.msra.mxu1 %v6588_v5  ;;  %v6595_v29 = vld [vmem:[%s9032_s5 + $0x78] sm:$0xff]   ;;  %v3521_v38 = vld [vmem:[#allocation4 + $0x27] ss:$2 sm:$0xff] }
 0x4fe   : > { %3684 = vrot.lane.b32.xlu1 %v3601_v3, %s6754_s30  ;;  %v3572_v4 = vpack.c.bf16 %v3557_v9, %v3557_v9  ;;  %v3553_v49 = vld [vmem:[#allocation4 + $0x48] ss:$2 sm:$0xff]  ;;  %6314 = vmatprep.subr.bf16.mxu1 %v6589_v48  ;;  %v3519_v5 = vld [vmem:[#allocation4 + $0x7] ss:$2 sm:$0xff] }
 0x4ff   : > { %v3570_v12 = vpack.c.bf16 %v3553_v49, %v3553_v49  ;;  %v3617_v62 = vld [vmem:[#allocation4 + $0x8a] ss:$2 sm:$0xff]  ;;  %v3533_v49 = vld [vmem:[#allocation4 + $0xe7] ss:$2 sm:$0xff] }
 0x500   : > { %v3632_v44 = vpack.c.bf16 %v3617_v62, %v3617_v62  ;;  %v3613_v34 = vld [vmem:[#allocation4 + $0x4a] ss:$2 sm:$0xff]  ;;  %v3545_v62 = vpack.c.bf16 %v3533_v49, %v3533_v49  ;;  %v3527_v48 = vld [vmem:[#allocation4 + $0x87] ss:$2 sm:$0xff] }
 0x501   : > { %3688 = vrot.lane.b32.xlu0 %v3603_v53, %s6754_s30  ;;  %v3565_v28 = vld [vmem:[#allocation4 + $0x108] ss:$2 sm:$0xff]  ;;  %v3630_v33 = vpack.c.bf16 %v3613_v34, %v3613_v34  ;;  %6315 = vmatpush3.bf16.msra.mxu1 %v6590_v15  ;;  %v3525_v53 = vld [vmem:[#allocation4 + $0x67] ss:$2 sm:$0xff] }
 0x502   : > { %3680 = vrot.lane.b32.xlu1 %v3599_v50, %s6754_s30  ;;  %v3576_v10 = vpack.c.bf16 %v3565_v28, %v3565_v28  ;;  %v3561_v35 = vld [vmem:[#allocation4 + $0xc8] ss:$2 sm:$0xff]  ;;  %v3529_v50 = vld [vmem:[#allocation4 + $0xa7] ss:$2 sm:$0xff]  ;;  %v3541_v19 = vpack.c.bf16 %v3525_v53, %v3525_v53 }
 0x503   : > { %v3574_v27 = vpack.c.bf16 %v3561_v35, %v3561_v35  ;;  %v6591_v61 = vld [vmem:[%s9032_s5 + $0x68] sm:$0xff]   ;;  %v6593_v26 = vld [vmem:[%s9032_s5 + $0x70] sm:$0xff]  }
 0x504   : > { %v6592_v57 = vld [vmem:[%s9032_s5 + $0x28] sm:$0xff]   ;;  %6316 = vmatprep.subr.bf16.mxu1 %v6591_v61  ;;  %v6594_v3 = vld [vmem:[%s9032_s5 + $0x30] sm:$0xff]   ;;  %v3538_v61 = vpack.c.bf16 %v3519_v5, %v3519_v5 }
 0x505   : > { %3714 = vrot.lane.b32.xlu0 %v3631_v47, %s6749_s23  ;;  %6317 = vmatpush3.bf16.msra.mxu1 %v6592_v57  ;;  %v3543_v47 = vpack.c.bf16 %v3529_v50, %v3529_v50  ;;  %v3621_v51 = vld [vmem:[#allocation4 + $0xca] ss:$2 sm:$0xff]  ;;  %v3523_v15 = vld [vmem:[#allocation4 + $0x47] ss:$2 sm:$0xff]  ;;  %v3542_v57 = vpack.c.bf16 %v3527_v48, %v3527_v48 }
 0x506   : > { %3718 = vrot.lane.b32.xlu1 %v3633_v46, %s6749_s23  ;;  %6318 = vmatprep.subr.bf16.mxu1 %v6593_v26  ;;  %v3634_v9 = vpack.c.bf16 %v3621_v51, %v3621_v51  ;;  %v3540_v26 = vpack.c.bf16 %v3523_v15, %v3523_v15  ;;  %v590_v15 = vld [vmem:[#allocation5 + $0x28] sm:$0x4] }
 0x509   : > { %3710 = vrot.lane.b32.xlu0 %v3629_v8, %s6749_s23  ;;  %6319 = vmatpush3.bf16.msra.mxu1 %v6594_v3 }
 0x50a   : > { %3662 = vrot.lane.b32.xlu1 %v3575_v22, %s6751_s25  ;;  %6320 = vmatprep.subr.bf16.mxu1 %v6595_v29 }
 0x50d   : > { %3696 = vrot.lane.b32.xlu0 %v3607_v43, %s6754_s30  ;;  %6321 = vmatpush3.bf16.msra.mxu1 %v6596_v52 }
 0x50e   : > { %3692 = vrot.lane.b32.xlu1 %v3605_v31, %s6754_s30  ;;  %v3539_v31 = vpack.c.bf16 %v3521_v38, %v3521_v38 }
 0x511   : > { %3726 = vrot.lane.b32.xlu0 %v3637_v14, %s6749_s23 }
 0x512   : > { %3722 = vrot.lane.b32.xlu1 %v3635_v11, %s6749_s23  ;;  %v3537_v11 = vld [vmem:[#allocation4 + $0x127] ss:$2 sm:$0xff] }
 0x513   : > { %v3547_v21 = vpack.c.bf16 %v3537_v11, %v3537_v11 }
 0x515   : > { %3678 = vrot.lane.b32.xlu0 %v3598_v30, %s6754_s30 }
 0x516   : > { %3648 = vrot.lane.b32.xlu1 %v3568_v55, %s6751_s25 }
 0x519   : > { %3656 = vrot.lane.b32.xlu0 %v3572_v4, %s6751_s25  ;;  %v3625_v4 = vld [vmem:[#allocation4 + $0x10a] ss:$2 sm:$0xff] }
 0x51a   : > { %3708 = vrot.lane.b32.xlu1 %v3628_v54, %s6749_s23  ;;  %v3636_v60 = vpack.c.bf16 %v3625_v4, %v3625_v4 }
 0x51d   : > { %3682 = vrot.lane.b32.xlu0 %v3600_v7, %s6754_s30 }
 0x51e   : > { %3652 = vrot.lane.b32.xlu1 %v3570_v12, %s6751_s25 }
 0x521   : > { %3716 = vrot.lane.b32.xlu0 %v3632_v44, %s6749_s23 }
 0x522   : > { %3686 = vrot.lane.b32.xlu1 %v3602_v23, %s6754_s30  ;;  %v3757_v23 = vsel %vm518_vm10, %v3547_v21, %v3667_v32 }
 0x525   : > { %3664 = vrot.lane.b32.xlu0 %v3576_v10, %s6751_s25 }
 0x526   : > { %3712 = vrot.lane.b32.xlu1 %v3630_v33, %s6749_s23 }
 0x529   : > { %3694 = vrot.lane.b32.xlu0 %v3606_v20, %s6754_s30 }
 0x52a   : > { %3660 = vrot.lane.b32.xlu1 %v3574_v27, %s6751_s25 }
 0x52e   : > { %3690 = vrot.lane.b32.xlu1 %v3604_v56, %s6754_s30 }
 0x56b   : > { %v3655_v18 = vpop.permute.xlu0 %3654 }
 0x56c   : > { %v3659_v13 = vpop.permute.xlu1 %3658  ;;  %v3739_v22 = vsel %vm518_vm10, %v3541_v19, %v3655_v18 }
 0x56d   : > { %v3745_v1 = vsel %vm518_vm10, %v3543_v47, %v3659_v13 }
 0x56f   : > { %v3651_v40 = vpop.permute.xlu0 %3650 }
 0x570   : > { %v3685_v37 = vpop.permute.xlu1 %3684  ;;  %v3733_v17 = vsel %vm518_vm10, %v3539_v31, %v3651_v40 }
 0x571   : > { %v3765_v8 = vsel %vm3204_vm11, %v3739_v22, %v3685_v37 }
 0x573   : > { %v3689_v46 = vpop.permute.xlu0 %3688 }
 0x574   : > { %v3681_v2 = vpop.permute.xlu1 %3680  ;;  %v3769_v59 = vsel %vm3204_vm11, %v3745_v1, %v3689_v46 }
 0x575   : > { %v3761_v55 = vsel %vm3204_vm11, %v3733_v17, %v3681_v2 }
 0x577   : > { %v3715_v6 = vpop.permute.xlu0 %3714 }
 0x578   : > { %v3719_v43 = vpop.permute.xlu1 %3718  ;;  %v3785_v14 = vsel %vm2287_vm6, %v3765_v8, %v3715_v6  ;;  %v3535_v8 = vld [vmem:[#allocation4 + $0x107] ss:$2 sm:$0xff] }
 0x579   : > { %v3789_v41 = vsel %vm2287_vm6, %v3769_v59, %v3719_v43  ;;  %3804 = vrot.lane.b32.xlu0 %v3785_v14, %s6753_s29  ;;  %v3531_v59 = vld [vmem:[#allocation4 + $0xc7] ss:$2 sm:$0xff]  ;;  %v3546_v31 = vpack.c.bf16 %v3535_v8, %v3535_v8 }
 0x57a   : > { %3806 = vrot.lane.b32.xlu1 %v3789_v41, %s6753_s29  ;;  %v3544_v41 = vpack.c.bf16 %v3531_v59, %v3531_v59  ;;  %v6617_v8 = vld [vmem:[%s9034_s7 + $0x8] sm:$0xff]  }
 0x57b   : > { %v3711_v36 = vpop.permute.xlu0 %3710 }
 0x57c   : > { %v3663_v30 = vpop.permute.xlu1 %3662  ;;  %v3781_v54 = vsel %vm2287_vm6, %v3761_v55, %v3711_v36 }
 0x57d   : > { %3802 = vrot.lane.b32.xlu0 %v3781_v54, %s6753_s29  ;;  %v3751_v44 = vsel %vm518_vm10, %v3545_v62, %v3663_v30 }
 0x57e   : > { %3720 = vrot.lane.b32.xlu1 %v3634_v9, %s6749_s23 }
 0x57f   : > { %v3697_v7 = vpop.permute.xlu0 %3696 }
 0x580   : > { %v3693_v12 = vpop.permute.xlu1 %3692  ;;  %v3777_v28 = vsel %vm3204_vm11, %v3757_v23, %v3697_v7 }
 0x581   : > { %3724 = vrot.lane.b32.xlu0 %v3636_v60, %s6749_s23  ;;  %v3773_v34 = vsel %vm3204_vm11, %v3751_v44, %v3693_v12  ;;  %v6756_v60 = vmov 0  }
 0x582   : > { %551 = vst.msk [vmem:[#allocation5 + $0x4] sm:$0xf] %vm549_vm7, %v6756_v60  ;;  %550 = vst.msk [vmem:[#allocation5] sm:$0xf] %vm549_vm7, %v6756_v60 }
 0x583   : > { %v3727_v24 = vpop.permute.xlu0 %3726  ;;  %552 = vst.msk [vmem:[#allocation5 + $0x8] sm:$0xf] %vm549_vm7, %v6756_v60  ;;  %554 = vst.msk [vmem:[#allocation5 + $0x3c] sm:$0xf] %vm549_vm7, %v6756_v60 }
 0x584   : > { %v3723_v63 = vpop.permute.xlu1 %3722  ;;  %v3797_v33 = vsel %vm2287_vm6, %v3777_v28, %v3727_v24  ;;  %555 = vst.msk [vmem:[#allocation5 + $0x40] sm:$0xf] %vm549_vm7, %v6756_v60  ;;  %556 = vst.msk [vmem:[#allocation5 + $0x44] sm:$0xf] %vm549_vm7, %v6756_v60 }
 0x585   : > { %v3793_v16 = vsel %vm2287_vm6, %v3773_v34, %v3723_v63  ;;  %3811 = vrot.lane.b32.xlu0 %v3797_v33, %s6753_s29 }
 0x586   : > { %3808 = vrot.lane.b32.xlu1 %v3793_v16, %s6753_s29 }
 0x587   : > { %v3679_v0 = vpop.permute.xlu0 %3678 }
 0x588   : > { %v3649_v10 = vpop.permute.xlu1 %3648 }
 0x589   : > { %v3730_v37 = vsel %vm518_vm10, %v3538_v61, %v3649_v10  ;;  %v581_v23 = vld [vmem:[#allocation5 + $0x4] sm:$0x4]  ;;  %v587_v10 = vld [vmem:[#allocation5 + $0x1c] sm:$0x4] }
 0x58a   : > { %v3759_v46 = vsel %vm3204_vm11, %v3730_v37, %v3679_v0  ;;  %v4102_v28 = vld [vmem:[#allocation5 + $0x8] sm:$0x1]  ;;  %v563_v37 = vld [vmem:[#allocation5 + $0xc] sm:$0x8] }
 0x58b   : > { %v3657_v58 = vpop.permute.xlu0 %3656 }
 0x58c   : > { %v3709_v35 = vpop.permute.xlu1 %3708  ;;  %v3742_v32 = vsel %vm518_vm10, %v3542_v57, %v3657_v58 }
 0x58d   : > { %v3779_v1 = vsel %vm2287_vm6, %v3759_v46, %v3709_v35  ;;  %v596_v46 = vld [vmem:[#allocation5 + $0x40] sm:$0x4] }
 0x58f   : > { %v3683_v27 = vpop.permute.xlu0 %3682 }
 0x590   : > { %v3653_v39 = vpop.permute.xlu1 %3652 }
 0x591   : > { %v3736_v13 = vsel %vm518_vm10, %v3540_v26, %v3653_v39  ;;  %v593_v26 = vld [vmem:[#allocation5 + $0x34] sm:$0x4] }
 0x592   : > { %v3763_v40 = vsel %vm3204_vm11, %v3736_v13, %v3683_v27 }
 0x593   : > { %v3717_v45 = vpop.permute.xlu0 %3716 }
 0x594   : > { %v3687_v20 = vpop.permute.xlu1 %3686 }
 0x595   : > { %v3767_v29 = vsel %vm3204_vm11, %v3742_v32, %v3687_v20 }
 0x596   : > { %v3787_v50 = vsel %vm2287_vm6, %v3767_v29, %v3717_v45 }
 0x597   : > { %v3665_v25 = vpop.permute.xlu0 %3664 }
 0x598   : > { %v3713_v42 = vpop.permute.xlu1 %3712  ;;  %v3754_v17 = vsel %vm518_vm10, %v3546_v31, %v3665_v25 }
 0x599   : > { %v3783_v53 = vsel %vm2287_vm6, %v3763_v40, %v3713_v42  ;;  %v569_v40 = vld [vmem:[#allocation5 + $0x24] sm:$0x8] }
 0x59b   : > { %v3695_v18 = vpop.permute.xlu0 %3694 }
 0x59c   : > { %v3661_v56 = vpop.permute.xlu1 %3660  ;;  %v3775_v55 = vsel %vm3204_vm11, %v3754_v17, %v3695_v18  ;;  %v566_v18 = vld [vmem:[#allocation5 + $0x18] sm:$0x8] }
 0x59d   : > { %v3748_v11 = vsel %vm518_vm10, %v3544_v41, %v3661_v56  ;;  %v584_v56 = vld [vmem:[#allocation5 + $0x10] sm:$0x4]  ;;  %v567_v29 = vsel %vm8458_vm15, 0, %v566_v18  ;;  %v6620_v41 = vld [vmem:[%s9034_s7 + $0x58] sm:$0xff]  }
 0x59e   : > { %568 = vst [vmem:[#allocation5 + $0x18] sm:$0x8] %v567_v29 }
 0x5a0   : > { %v3691_v3 = vpop.permute.xlu1 %3690 }
 0x5a1   : > { %v3771_v30 = vsel %vm3204_vm11, %v3748_v11, %v3691_v3 }
 0x5eb   : > { %v3805_v2 = vpop.permute.xlu0 %3804 }
 0x5ec   : > { %v3807_v52 = vpop.permute.xlu1 %3806  ;;  %v3816_v19 = vsel %vm3221_vm12, %v3783_v53, %v3805_v2  ;;  %v564_v53 = vsel %vm8458_vm15, 0, %v563_v37 }
 0x5ed   : > { %v3818_v47 = vsel %vm3221_vm12, %v3787_v50, %v3807_v52  ;;  %v572_v50 = vld [vmem:[#allocation5 + $0x30] sm:$0x8]  ;;  %v570_v52 = vsel %vm8458_vm15, 0, %v569_v40  ;;  %565 = vst [vmem:[#allocation5 + $0xc] sm:$0x8] %v564_v53 }
 0x5ee   : > { %v6061_v38 = vcombine.low %v3816_v19, %v3818_v47  ;;  %571 = vst [vmem:[#allocation5 + $0x24] sm:$0x8] %v570_v52  ;;  %v573_v2 = vsel %vm8458_vm15, 0, %v572_v50 }
 0x5ef   : > { %v3803_v22 = vpop.permute.xlu0 %3802  ;;  %574 = vst [vmem:[#allocation5 + $0x30] sm:$0x8] %v573_v2 }
 0x5f0   : > { %4008 = vmatprep.mubr.bf16.mxu1 %v6061_v38  ;;  %v3814_v43 = vsel %vm3221_vm12, %v3779_v1, %v3803_v22  ;;  %v3721_v14 = vpop.permute.xlu1 %3720  ;;  %v6615_v38 = vld [vmem:[%s9034_s7] sm:$0xff]   ;;  %v6616_v1 = vld [vmem:[%s9034_s7 + $0x48] sm:$0xff]  }
 0x5f1   : > { %v6060_v6 = vcombine.low %v3814_v43, %v3816_v19  ;;  %v3791_v36 = vsel %vm2287_vm6, %v3771_v30, %v3721_v14  ;;  %v6614_v19 = vld [vmem:[%s9034_s7 + $0x40] sm:$0xff]   ;;  %v6618_v43 = vld [vmem:[%s9034_s7 + $0x50] sm:$0xff]   ;;  %v6621_v30 = vld [vmem:[%s9034_s7 + $0x18] sm:$0xff]  }
 0x5f2   : > { %6334 = vmatprep.subr.bf16.mxu0 %v6614_v19  ;;  %v560_v22 = vld [vmem:[#allocation5] sm:$0x8]  ;;  %v6059_v14 = vld [vmem:[%s9033_s6] ss:$0 sm:$0xff] }
 0x5f3   : > { %4009 = vmatmul.mubr.bf16.vlgmr.msra.gmra.mrb[8].mxu1 %v6060_v6  ;;  %v3725_v51 = vpop.permute.xlu0 %3724  ;;  %6335 = vmatpush3.bf16.msra.mxu0 %v6615_v38  ;;  %v561_v59 = vsel %vm8458_vm15, 0, %v560_v22  ;;  %v6619_v6 = vld [vmem:[%s9034_s7 + $0x10] sm:$0xff]  }
 0x5f4   : > { %v3795_v9 = vsel %vm2287_vm6, %v3775_v55, %v3725_v51  ;;  %vm578_vm6 = vcmask 256002   ;;  %6336 = vmatprep.subr.bf16.mxu0 %v6616_v1  ;;  %562 = vst [vmem:[#allocation5] sm:$0x8] %v561_v59 }
 0x5f5   : > { %vm8437_vm10 = vmand %vm578_vm6, %vm579_vm9  ;;  %vm625_vm9 = vsmask.f32 7942 }
 0x5f6   : > { %v582_v44 = vsel %vm8437_vm10, 0, %v581_v23  ;;  %v588_v0 = vsel %vm8437_vm10, 0, %v587_v10  ;;  %v585_v48 = vsel %vm8437_vm10, 0, %v584_v56  ;;  %v591_v57 = vsel %vm8437_vm10, 0, %v590_v15 }
 0x5f7   : > { %v3812_v4 = vpop.permute.xlu0 %3811  ;;  %583 = vst [vmem:[#allocation5 + $0x4] sm:$0x4] %v582_v44  ;;  %589 = vst [vmem:[#allocation5 + $0x1c] sm:$0x4] %v588_v0  ;;  %v594_v32 = vsel %vm8437_vm10, 0, %v593_v26  ;;  %6337 = vmatpush3.bf16.msra.mxu0 %v6617_v8 }
 0x5f8   : > { %v3809_v54 = vpop.permute.xlu1 %3808  ;;  %v3822_v21 = vsel %vm3221_vm12, %v3795_v9, %v3812_v4  ;;  %586 = vst [vmem:[#allocation5 + $0x10] sm:$0x4] %v585_v48  ;;  %592 = vst [vmem:[#allocation5 + $0x28] sm:$0x4] %v591_v57  ;;  %6338 = vmatprep.subr.bf16.mxu0 %v6618_v43 }
 0x5f9   : > { %v3820_v49 = vsel %vm3221_vm12, %v3791_v36, %v3809_v54  ;;  %595 = vst [vmem:[#allocation5 + $0x34] sm:$0x4] %v594_v32  ;;  %v6622_v54 = vld [vmem:[%s9034_s7 + $0x60] sm:$0xff]  }
 0x5fa   : > { %v6062_v12 = vcombine.low %v3818_v47, %v3820_v49  ;;  %v6063_v7 = vcombine.low %v3820_v49, %v3822_v21  ;;  %v597_v47 = vsel %vm8437_vm10, 0, %v596_v46  ;;  %v6623_v49 = vld [vmem:[%s9034_s7 + $0x20] sm:$0xff]  }
 0x5fb   : > { %598 = vst [vmem:[#allocation5 + $0x40] sm:$0x4] %v597_v47  ;;  %6339 = vmatpush3.bf16.msra.mxu0 %v6619_v6 }
 0x5fc   : > { %4016 = vmatprep.mubr.bf16.mxu1 %v6063_v7  ;;  %6340 = vmatprep.subr.bf16.mxu0 %v6620_v41 }
 0x5fd   : > { %4017 = vmatmul.mubr.bf16.gmra.mrb[12].mxu1 %v6062_v12 }
 0x5fe   : > { %v8443_v34 = vld [vmem:[#allocation5 + $0x4] sm:$0xf] }
 0x5ff   : > { %v4108_v63 = vld [vmem:[#allocation5 + $0x4] sm:$0xe]  ;;  %v6086_v24 = vcombine.low %v8443_v34, %v8443_v34  ;;  %v6092_v16 = vcombine.low %v8443_v34, %v4102_v28  ;;  %6341 = vmatpush3.bf16.msra.mxu0 %v6621_v30 }
 0x600   : > { %v6098_v33 = vcombine.low %v4108_v63, %v4102_v28  ;;  %6342 = vmatprep.subr.bf16.mxu0 %v6622_v54 }
 0x601   : > { %v4151_v35 = vshrl.u32 %v6086_v24, 16  ;;  %v4154_v58 = vshll.u32 %v6086_v24, 16  ;;  %v4228_v39 = vrot.slane %v6092_v16, 5 }
 0x602   : > { %v4265_v27 = vshrl.u32 %v6098_v33, 16  ;;  %v4268_v20 = vshll.u32 %v6098_v33, 16 }
 0x603   : > { %v4153_v45 = vrot.slane %v4151_v35, 4  ;;  %v4156_v42 = vrot.slane %v4154_v58, 5  ;;  %4234 = vrot.lane.b32.xlu0 %v4228_v39, %s6753_s29  ;;  %6343 = vmatpush3.bf16.msra.mxu0 %v6623_v49 }
 0x604   : > { %v4267_v25 = vrot.slane %v4265_v27, 5  ;;  %v4270_v5 = vrot.slane %v4268_v20, 6 }
 0x605   : > { %v4157_v61 = vor.u32 %v4156_v42, %v4153_v45 }
 0x606   : > { %v4271_v3 = vor.u32 %v4270_v5, %v4267_v25 }
 0x607   : > { %4198 = vrot.lane.b32.xlu1 %v4157_v61, %s6754_s30 }
 0x60b   : > { %4312 = vrot.lane.b32.xlu1 %v4271_v3, %s6755_s16 }
 0x6c6   : > { %v6322_v31 = vpop.f32.mrb[8].mxu1 }
 0x6c7   : > { %v6323_v51 = vpop.f32.mrb[9].mxu1 }
 0x6c8   : > { %v6324_v17 = vadd.f32 %v6323_v51, %v6322_v31  ;;  %v6325_v11 = vpop.f32.mrb[10].mxu1 }
 0x6c9   : > { %v6326_v55 = vpop.f32.mrb[11].mxu1 }
 0x6ca   : > { %v4011_v36 = vadd.f32 %v6324_v17, %v6059_v14  ;;  %v6327_v9 = vadd.f32 %v6326_v55, %v6325_v11 }
 0x6cc   : > { %v4014_v4 = vadd.f32 %v6327_v9, %v6059_v14  ;;  %v4025_v21 = vsel %vm549_vm7, %v4011_v36, 0.0 }
 0x6ce   : > { %v4026_v12 = vsel %vm549_vm7, %v4014_v4, 0.0 }
 0x6cf   : > { %v4027_v7 = vadd.f32 %v4026_v12, %v4025_v21  ;;  %v6624_v21 = vld [vmem:[%s9034_s7 + $0xc0] sm:$0xff]  }
 0x6d0   : > { %v6328_v62 = vpop.f32.mrb[12].mxu1  ;;  %v6625_v12 = vld [vmem:[%s9034_s7 + $0x80] sm:$0xff]   ;;  %6362 = vmatprep.subr.bf16.mxu1 %v6624_v21 }
 0x6d1   : > { %v6329_v23 = vpop.f32.mrb[13].mxu1  ;;  %6363 = vmatpush3.bf16.msra.mxu1 %v6625_v12 }
 0x6d2   : > { %v6330_v44 = vadd.f32 %v6329_v23, %v6328_v62  ;;  %v6331_v28 = vpop.f32.mrb[14].mxu1  ;;  %v6626_v62 = vld [vmem:[%s9034_s7 + $0xc8] sm:$0xff]  }
 0x6d3   : > { %v6332_v63 = vpop.f32.mrb[15].mxu1  ;;  %v6627_v23 = vld [vmem:[%s9034_s7 + $0x68] sm:$0xff]   ;;  %6364 = vmatprep.subr.bf16.mxu1 %v6626_v62 }
 0x6d4   : > { %v4019_v24 = vadd.f32 %v6330_v44, %v6059_v14  ;;  %v6333_v16 = vadd.f32 %v6332_v63, %v6331_v28  ;;  %v6628_v44 = vld [vmem:[%s9034_s7 + $0x88] sm:$0xff]   ;;  %6344 = vmatprep.subr.bf16.mxu0 %v6627_v23  ;;  %v4104_v63 = vld [vmem:[#allocation5 + $0x20] sm:$0x1] }
 0x6d5   : > { %v6629_v28 = vld [vmem:[%s9034_s7 + $0x28] sm:$0xff]   ;;  %6365 = vmatpush3.bf16.msra.mxu1 %v6628_v44 }
 0x6d6   : > { %v4028_v33 = vsel %vm549_vm7, %v4019_v24, 0.0  ;;  %v4022_v10 = vadd.f32 %v6333_v16, %v6059_v14  ;;  %6345 = vmatpush3.bf16.msra.mxu0 %v6629_v28  ;;  %v4105_v16 = vld [vmem:[#allocation5 + $0x2c] sm:$0x1]  ;;  %v4107_v28 = vld [vmem:[#allocation5 + $0x44] sm:$0x1] }
 0x6d7   : > { %v4029_v0 = vadd.f32 %v4028_v33, %v4027_v7  ;;  %v4106_v33 = vld [vmem:[#allocation5 + $0x38] sm:$0x1] }
 0x6d8   : > { %v4030_v35 = vsel %vm549_vm7, %v4022_v10, 0.0 }
 0x6d9   : > { %v4031_v58 = vadd.f32 %v4030_v35, %v4029_v0 }
 0x6db   : > { %v4032_v39 = vrot.slane %v4031_v58, 4 }
 0x6dd   : > { %v4033_v27 = vadd.f32 %v4032_v39, %v4031_v58 }
 0x6df   : > { %v4034_v20 = vrot.slane %v4033_v27, 2 }
 0x6e1   : > { %v4035_v45 = vadd.f32 %v4034_v20, %v4033_v27 }
 0x6e3   : > { %v4036_v42 = vrot.slane %v4035_v45, 1 }
 0x6e5   : > { %v4037_v25 = vadd.f32 %v4036_v42, %v4035_v45 }
 0x6e7   : > { %v4039_v56 = vmul.f32 0.0625, %v4037_v25 }
 0x6e9   : > { %v4040_v5 = vsub.f32 %v4011_v36, %v4039_v56  ;;  %v4041_v48 = vsub.f32 %v4014_v4, %v4039_v56  ;;  %v4042_v15 = vsub.f32 %v4019_v24, %v4039_v56  ;;  %v4043_v61 = vsub.f32 %v4022_v10, %v4039_v56  ;;  %v4103_v24 = vld [vmem:[#allocation5 + $0x14] sm:$0x1] }
 0x6eb   : > { %v4044_v57 = vmul.f32 %v4040_v5, %v4040_v5  ;;  %v4045_v26 = vmul.f32 %v4041_v48, %v4041_v48  ;;  %v4046_v32 = vmul.f32 %v4042_v15, %v4042_v15  ;;  %v4047_v18 = vmul.f32 %v4043_v61, %v4043_v61 }
 0x6ed   : > { %v4048_v3 = vsel %vm549_vm7, %v4044_v57, 0.0  ;;  %v4049_v29 = vsel %vm549_vm7, %v4045_v26, 0.0  ;;  %v4051_v40 = vsel %vm549_vm7, %v4046_v32, 0.0  ;;  %v4053_v53 = vsel %vm549_vm7, %v4047_v18, 0.0  ;;  %v6631_v26 = vld [vmem:[%s9034_s7 + $0x90] sm:$0xff]  }
 0x6ee   : > { %v4050_v37 = vadd.f32 %v4049_v29, %v4048_v3  ;;  %vm4395_vm7 = vsmask.f32 4368 }
 0x6ef   : > { %vm8648_vm6 = vmor %vm4394_vm5, %vm4395_vm7 }
 0x6f0   : > { %v4052_v50 = vadd.f32 %v4051_v40, %v4050_v37  ;;  %v6632_v40 = vld [vmem:[%s9034_s7 + $0xd8] sm:$0xff]  }
 0x6f2   : > { %v4054_v52 = vadd.f32 %v4053_v53, %v4052_v50  ;;  %v6633_v50 = vld [vmem:[%s9034_s7 + $0x70] sm:$0xff]  }
 0x6f3   : > { %6346 = vmatprep.subr.bf16.mxu0 %v6633_v50  ;;  %v6638_v50 = vld [vmem:[%s9034_s7 + $0xe8] sm:$0xff]  }
 0x6f4   : > { %v4055_v2 = vrot.slane %v4054_v52, 4 }
 0x6f6   : > { %v4056_v46 = vadd.f32 %v4055_v2, %v4054_v52 }
 0x6f8   : > { %v4057_v47 = vrot.slane %v4056_v46, 2 }
 0x6fa   : > { %v4058_v19 = vadd.f32 %v4057_v47, %v4056_v46 }
 0x6fc   : > { %v4059_v38 = vrot.slane %v4058_v19, 1 }
 0x6fe   : > { %v4060_v1 = vadd.f32 %v4059_v38, %v4058_v19  ;;  %v6635_v19 = vld [vmem:[%s9034_s7 + $0x30] sm:$0xff]  }
 0x6ff   : > { %6347 = vmatpush3.bf16.msra.mxu0 %v6635_v19  ;;  %v6641_v19 = vld [vmem:[%s9034_s7 + $0x38] sm:$0xff]  }
 0x700   : > { %v4061_v22 = vmul.f32 0.0625, %v4060_v1 }
 0x702   : > { %v4062_v8 = vadd.f32 1e-05, %v4061_v22 }
 0x704   : > { %6724 = vrsqrt.f32 %v4062_v8 }
 0x70e   : > { %v6725_v59 = vpop.eup %6724 }
 0x70f   : > { %v4064_v43 = vmul.f32 %v6725_v59, %v4040_v5  ;;  %v4065_v6 = vmul.f32 %v6725_v59, %v4041_v48  ;;  %v4066_v31 = vmul.f32 %v6725_v59, %v4042_v15  ;;  %v4067_v41 = vmul.f32 %v6725_v59, %v4043_v61  ;;  %v6630_v5 = vld [vmem:[%s9034_s7 + $0xd0] sm:$0xff]   ;;  %v6634_v59 = vld [vmem:[%s9034_s7 + $0x98] sm:$0xff]  }
 0x710   : > { %6366 = vmatprep.subr.bf16.mxu1 %v6630_v5 }
 0x711   : > { %vm4068_vm0 = vcmp.gt.f32.partialorder %v4064_v43, 0.0  ;;  %vm4069_vm1 = vcmp.gt.f32.partialorder %v4065_v6, 0.0  ;;  %vm4070_vm2 = vcmp.gt.f32.partialorder %v4066_v31, 0.0  ;;  %vm4071_vm3 = vcmp.gt.f32.partialorder %v4067_v41, 0.0  ;;  %6367 = vmatpush3.bf16.msra.mxu1 %v6631_v26 }
 0x712   : > { %v4072_v14 = vmul.f32 0.2, %v4064_v43  ;;  %v4073_v51 = vmul.f32 0.2, %v4065_v6  ;;  %v4074_v17 = vmul.f32 0.2, %v4066_v31  ;;  %6368 = vmatprep.subr.bf16.mxu1 %v6632_v40 }
 0x713   : > { %v4075_v11 = vmul.f32 0.2, %v4067_v41 }
 0x714   : > { %v4076_v55 = vsel %vm4068_vm0, %v4064_v43, %v4072_v14  ;;  %v4077_v30 = vsel %vm4069_vm1, %v4065_v6, %v4073_v51  ;;  %v4078_v36 = vsel %vm4070_vm2, %v4066_v31, %v4074_v17  ;;  %vm4897_vm0 = vcmask 517120  }
 0x715   : > { %v4079_v9 = vsel %vm4071_vm3, %v4067_v41, %v4075_v11  ;;  %v4080_v54 = vpack.c.bf16 %v4076_v55, %v4076_v55  ;;  %v4081_v4 = vpack.c.bf16 %v4077_v30, %v4077_v30  ;;  %v4082_v49 = vpack.c.bf16 %v4078_v36, %v4078_v36  ;;  %6369 = vmatpush3.bf16.msra.mxu1 %v6634_v59 }
 0x716   : > { %v4083_v7 = vpack.c.bf16 %v4079_v9, %v4079_v9  ;;  %vm4898_vm1 = vsmask.f32 1280 }
 0x717   : > { %4086 = vst.msk [vmem:[#allocation5 + $0x10] sm:$0x3] %vm4085_vm4, %v4080_v54  ;;  %4087 = vst.msk [vmem:[#allocation5 + $0x1c] sm:$0x3] %vm4085_vm4, %v4081_v4  ;;  %v8577_v4 = vld [vmem:[#allocation5 + $0x40] sm:$0xf] }
 0x718   : > { %4088 = vst.msk [vmem:[#allocation5 + $0x28] sm:$0x3] %vm4085_vm4, %v4082_v49  ;;  %4089 = vst.msk [vmem:[#allocation5 + $0x34] sm:$0x3] %vm4085_vm4, %v4083_v7  ;;  %v6091_v44 = vcombine.low %v8577_v4, %v8577_v4  ;;  %v6097_v40 = vcombine.low %v8577_v4, %v4107_v28 }
 0x719   : > { %vm4899_vm5 = vmand %vm4897_vm0, %vm4898_vm1 }
 0x71a   : > { %v4191_v5 = vshrl.u32 %v6091_v44, 16 }
 0x71c   : > { %v4193_v13 = vrot.slane %v4191_v5, 4 }
 0x71e   : > { %v8535_v10 = vld [vmem:[#allocation5 + $0x1c] sm:$0xf]  ;;  %v8537_v35 = vld [vmem:[#allocation5 + $0x10] sm:$0xf] }
 0x71f   : > { %v4110_v0 = vld [vmem:[#allocation5 + $0x1c] sm:$0xe]  ;;  %v6094_v58 = vcombine.low %v8535_v10, %v4104_v63  ;;  %v4109_v39 = vld [vmem:[#allocation5 + $0x10] sm:$0xe]  ;;  %v6093_v27 = vcombine.low %v8537_v35, %v4103_v24  ;;  %v8541_v20 = vld [vmem:[#allocation5 + $0x28] sm:$0xf]  ;;  %v6088_v45 = vcombine.low %v8535_v10, %v8535_v10  ;;  %v6087_v56 = vcombine.low %v8537_v35, %v8537_v35 }
 0x720   : > { %v6095_v42 = vcombine.low %v8541_v20, %v4105_v16  ;;  %v8546_v25 = vld [vmem:[#allocation5 + $0x34] sm:$0xf]  ;;  %v6100_v15 = vcombine.low %v4110_v0, %v4104_v63  ;;  %v6099_v32 = vcombine.low %v4109_v39, %v4103_v24  ;;  %v4111_v18 = vld [vmem:[#allocation5 + $0x28] sm:$0xe]  ;;  %v6089_v46 = vcombine.low %v8541_v20, %v8541_v20  ;;  %v4113_v63 = vld [vmem:[#allocation5 + $0x40] sm:$0xe] }
 0x721   : > { %v4230_v48 = vrot.slane %v6094_v58, 5  ;;  %v4229_v61 = vrot.slane %v6093_v27, 5  ;;  %v6096_v57 = vcombine.low %v8546_v25, %v4106_v33  ;;  %v4167_v3 = vshrl.u32 %v6088_v45, 16  ;;  %v4112_v52 = vld [vmem:[#allocation5 + $0x34] sm:$0xe]  ;;  %v6636_v58 = vld [vmem:[%s9034_s7 + $0xe0] sm:$0xff]  }
 0x722   : > { %v4170_v29 = vshll.u32 %v6088_v45, 16  ;;  %v4159_v37 = vshrl.u32 %v6087_v56, 16  ;;  %v4231_v53 = vrot.slane %v6095_v42, 5  ;;  %v4162_v2 = vshll.u32 %v6087_v56, 16  ;;  %v6637_v39 = vld [vmem:[%s9034_s7 + $0xa0] sm:$0xff]   ;;  %6370 = vmatprep.subr.bf16.mxu1 %v6636_v58 }
 0x723   : > { %4238 = vrot.lane.b32.xlu0 %v4230_v48, %s6753_s29  ;;  %4236 = vrot.lane.b32.xlu1 %v4229_v61, %s6753_s29  ;;  %v6090_v47 = vcombine.low %v8546_v25, %v8546_v25  ;;  %v4232_v38 = vrot.slane %v6096_v57, 5  ;;  %v4169_v1 = vrot.slane %v4167_v3, 4  ;;  %v4175_v6 = vshrl.u32 %v6089_v46, 16 }
 0x724   : > { %v4172_v22 = vrot.slane %v4170_v29, 5  ;;  %v4161_v8 = vrot.slane %v4159_v37, 4  ;;  %v4164_v43 = vrot.slane %v4162_v2, 5  ;;  %v4178_v31 = vshll.u32 %v6089_v46, 16  ;;  %6371 = vmatpush3.bf16.msra.mxu1 %v6637_v39 }
 0x725   : > { %v4183_v41 = vshrl.u32 %v6090_v47, 16  ;;  %v4186_v14 = vshll.u32 %v6090_v47, 16  ;;  %v6101_v51 = vcombine.low %v4111_v18, %v4105_v16  ;;  %v6102_v17 = vcombine.low %v4112_v52, %v4106_v33  ;;  %v6640_v52 = vld [vmem:[%s9034_s7 + $0xa8] sm:$0xff]   ;;  %6372 = vmatprep.subr.bf16.mxu1 %v6638_v50 }
 0x726   : > { %v4281_v11 = vshrl.u32 %v6100_v15, 16  ;;  %v4284_v55 = vshll.u32 %v6100_v15, 16  ;;  %v4173_v30 = vor.u32 %v4172_v22, %v4169_v1  ;;  %v4165_v36 = vor.u32 %v4164_v43, %v4161_v8  ;;  %v6643_v8 = vld [vmem:[%s9034_s7 + $0xb0] sm:$0xff]  }
 0x727   : > { %4240 = vrot.lane.b32.xlu0 %v4231_v53, %s6753_s29  ;;  %4242 = vrot.lane.b32.xlu1 %v4232_v38, %s6753_s29  ;;  %v4177_v9 = vrot.slane %v4175_v6, 4  ;;  %v4180_v54 = vrot.slane %v4178_v31, 5  ;;  %v4185_v49 = vrot.slane %v4183_v41, 4  ;;  %v4188_v21 = vrot.slane %v4186_v14, 5  ;;  %v6639_v53 = vld [vmem:[%s9034_s7 + $0x78] sm:$0xff]   ;;  %v6642_v38 = vld [vmem:[%s9034_s7 + $0xf0] sm:$0xff]  }
 0x728   : > { %v4273_v12 = vshrl.u32 %v6099_v32, 16  ;;  %v4276_v7 = vshll.u32 %v6099_v32, 16  ;;  %v4283_v62 = vrot.slane %v4281_v11, 5  ;;  %v4286_v23 = vrot.slane %v4284_v55, 6  ;;  %v575_v32 = vld [vmem:[#allocation5 + $0x3c] sm:$0x8]  ;;  %6348 = vmatprep.subr.bf16.mxu0 %v6639_v53  ;;  %6373 = vmatpush3.bf16.msra.mxu1 %v6640_v52  ;;  %v4235_v11 = vpop.permute.xlu0 %4234 }
 0x729   : > { %v4181_v24 = vor.u32 %v4180_v54, %v4177_v9  ;;  %v4297_v16 = vshrl.u32 %v6102_v17, 16  ;;  %v4300_v33 = vshll.u32 %v6102_v17, 16  ;;  %v4289_v0 = vshrl.u32 %v6101_v51, 16  ;;  %6349 = vmatpush3.bf16.msra.mxu0 %v6641_v19  ;;  %6374 = vmatprep.subr.bf16.mxu1 %v6642_v38  ;;  %v6644_v41 = vld [vmem:[%s9034_s7 + $0xf8] sm:$0xff]   ;;  %v4199_v17 = vpop.permute.xlu1 %4198  ;;  %v4090_v9 = vld [vmem:[#allocation5] sm:$0x8] }
 0x72a   : > { %v4189_v27 = vor.u32 %v4188_v21, %v4185_v49  ;;  %v4275_v45 = vrot.slane %v4273_v12, 5  ;;  %v4278_v42 = vrot.slane %v4276_v7, 6  ;;  %v4292_v56 = vshll.u32 %v6101_v51, 16  ;;  %v6645_v14 = vld [vmem:[%s9034_s7 + $0xb8] sm:$0xff]  }
 0x72b   : > { %4202 = vrot.lane.b32.xlu1 %v4173_v30, %s6754_s30  ;;  %4200 = vrot.lane.b32.xlu0 %v4165_v36, %s6754_s30  ;;  %v4194_v48 = vshll.u32 %v6091_v44, 16  ;;  %v6103_v15 = vcombine.low %v4113_v63, %v4107_v28  ;;  %v4287_v61 = vor.u32 %v4286_v23, %v4283_v62  ;;  %v4299_v57 = vrot.slane %v4297_v16, 5  ;;  %v4094_v12 = vld [vmem:[#allocation5 + $0x18] sm:$0x8]  ;;  %v4092_v62 = vld [vmem:[#allocation5 + $0xc] sm:$0x8] }
 0x72c   : > { %v4302_v26 = vrot.slane %v4300_v33, 6  ;;  %v4279_v18 = vor.u32 %v4278_v42, %v4275_v45  ;;  %v4291_v3 = vrot.slane %v4289_v0, 5  ;;  %v4294_v29 = vrot.slane %v4292_v56, 6  ;;  %6375 = vmatpush3.bf16.msra.mxu1 %v6643_v8  ;;  %v4098_v33 = vld [vmem:[#allocation5 + $0x30] sm:$0x8] }
 0x72d   : > { %v576_v37 = vsel %vm8458_vm15, 0, %v575_v32  ;;  %v4196_v2 = vrot.slane %v4194_v48, 5  ;;  %v4305_v46 = vshrl.u32 %v6103_v15, 16  ;;  %v4308_v47 = vshll.u32 %v6103_v15, 16  ;;  %6376 = vmatprep.subr.bf16.mxu1 %v6644_v41  ;;  %v4313_v55 = vpop.permute.xlu1 %4312  ;;  %vm8694_vm15 = vmand %vm607_vm13, %vm558_vm14 }
 0x72e   : > { %577 = vst [vmem:[#allocation5 + $0x3c] sm:$0x8] %v576_v37  ;;  %v4303_v1 = vor.u32 %v4302_v26, %v4299_v57  ;;  %v4295_v22 = vor.u32 %v4294_v29, %v4291_v3  ;;  %v4233_v43 = vrot.slane %v6097_v40, 5  ;;  %v6080_v21 = vcombine.low %v4090_v9, %v8443_v34 }
 0x72f   : > { %4204 = vrot.lane.b32.xlu1 %v4181_v24, %s6754_s30  ;;  %4206 = vrot.lane.b32.xlu0 %v4189_v27, %s6754_s30  ;;  %v4197_v59 = vor.u32 %v4196_v2, %v4193_v13  ;;  %v4307_v6 = vrot.slane %v4305_v46, 5  ;;  %v4310_v31 = vrot.slane %v4308_v47, 6  ;;  %v6082_v28 = vcombine.low %v4094_v12, %v8535_v10  ;;  %v4096_v24 = vld [vmem:[#allocation5 + $0x24] sm:$0x8] }
 0x730   : > { %6377 = vmatpush3.bf16.msra.mxu1 %v6645_v14  ;;  %v4326_v44 = vsel %vm3204_vm11, %v6080_v21, %v4199_v17  ;;  %v6081_v63 = vcombine.low %v4092_v62, %v8537_v35  ;;  %v6083_v27 = vcombine.low %v4096_v24, %v8541_v20  ;;  %v6084_v45 = vcombine.low %v4098_v33, %v8546_v25 }
 0x731   : > { %v4311_v51 = vor.u32 %v4310_v31, %v4307_v6  ;;  %v4343_v58 = vsel %vm3221_vm12, %v4326_v44, %v4235_v11  ;;  %vm4847_vm14 = vcmask 518144  }
 0x732   : > { %v4355_v42 = vsel %vm2408_vm8, %v4343_v58, %v4313_v55 }
 0x733   : > { %4316 = vrot.lane.b32.xlu1 %v4287_v61, %s6755_s16  ;;  %4314 = vrot.lane.b32.xlu0 %v4279_v18, %s6755_s16 }
 0x735   : > { %v4100_v18 = vld [vmem:[#allocation5 + $0x3c] sm:$0x8] }
 0x736   : > { %v6085_v38 = vcombine.low %v4100_v18, %v8577_v4 }
 0x737   : > { %4320 = vrot.lane.b32.xlu1 %v4303_v1, %s6755_s16  ;;  %4318 = vrot.lane.b32.xlu0 %v4295_v22, %s6755_s16 }
 0x73b   : > { %4208 = vrot.lane.b32.xlu0 %v4197_v59, %s6754_s30  ;;  %4244 = vrot.lane.b32.xlu1 %v4233_v43, %s6753_s29  ;;  %v6704_v43 = vld [vmem:[%s9036_s9 + $0x160] sm:$0xff]   ;;  %s6271_s30 = sshll.u32 %s9051_s18, 2 }
 0x73c   : > { %s386_s27 = scalar_lea.vmem %s9038_s11, %s6271_s30 }
 0x73f   : > { %4322 = vrot.lane.b32.xlu0 %v4311_v51, %s6755_s16 }
 0x795   : > { %v4237_v30 = vpop.permute.xlu1 %4236  ;;  %v4239_v36 = vpop.permute.xlu0 %4238 }
 0x799   : > { %v4243_v54 = vpop.permute.xlu1 %4242  ;;  %v4241_v49 = vpop.permute.xlu0 %4240 }
 0x79d   : > { %v4203_v7 = vpop.permute.xlu1 %4202  ;;  %v4201_v23 = vpop.permute.xlu0 %4200 }
 0x79e   : > { %v4332_v39 = vsel %vm3204_vm11, %v6082_v28, %v4203_v7  ;;  %v4329_v34 = vsel %vm3204_vm11, %v6081_v63, %v4201_v23 }
 0x79f   : > { %v4347_v10 = vsel %vm3221_vm12, %v4332_v39, %v4239_v36  ;;  %v4345_v35 = vsel %vm3221_vm12, %v4329_v34, %v4237_v30 }
 0x7a1   : > { %v4205_v16 = vpop.permute.xlu1 %4204  ;;  %v4207_v0 = vpop.permute.xlu0 %4206 }
 0x7a2   : > { %v4335_v48 = vsel %vm3204_vm11, %v6083_v27, %v4205_v16  ;;  %v4338_v15 = vsel %vm3204_vm11, %v6084_v45, %v4207_v0 }
 0x7a3   : > { %v4351_v40 = vsel %vm3221_vm12, %v4338_v15, %v4243_v54  ;;  %v4349_v50 = vsel %vm3221_vm12, %v4335_v48, %v4241_v49 }
 0x7a5   : > { %v4317_v56 = vpop.permute.xlu1 %4316  ;;  %v4315_v5 = vpop.permute.xlu0 %4314 }
 0x7a6   : > { %v4359_v61 = vsel %vm2408_vm8, %v4347_v10, %v4317_v56  ;;  %v4357_v57 = vsel %vm2408_vm8, %v4345_v35, %v4315_v5 }
 0x7a7   : > { %v6104_v26 = vcombine.low %v4355_v42, %v4357_v57  ;;  %v6106_v20 = vcombine.high %v4355_v42, %v4357_v57  ;;  %v6108_v32 = vcombine.low %v4357_v57, %v4359_v61  ;;  %v6110_v25 = vcombine.high %v4357_v57, %v4359_v61 }
 0x7a9   : > { %v4398_v3 = vshrl.u32 %v6104_v26, 16  ;;  %v4403_v29 = vshrl.u32 %v6106_v20, 16  ;;  %v4321_v37 = vpop.permute.xlu1 %4320  ;;  %v4319_v53 = vpop.permute.xlu0 %4318  ;;  %v4429_v52 = vshrl.u32 %v6110_v25, 16  ;;  %v4406_v47 = vshll.u32 %v6106_v20, 16 }
 0x7aa   : > { %v4363_v13 = vsel %vm2408_vm8, %v4351_v40, %v4321_v37  ;;  %v4361_v2 = vsel %vm2408_vm8, %v4349_v50, %v4319_v53  ;;  %v4424_v1 = vshrl.u32 %v6108_v32, 16  ;;  %v4432_v4 = vshll.u32 %v6110_v25, 16  ;;  %v633_v37 = vld [vmem:[#allocation6 + $0x1c] sm:$0x2]  ;;  %v636_v40 = vld [vmem:[#allocation6 + $0x28] sm:$0x2] }
 0x7ab   : > { %v4405_v46 = vrot.slane %v4403_v29, 7  ;;  %v6105_v19 = vcombine.low %v4359_v61, %v4361_v2  ;;  %v6107_v22 = vcombine.high %v4359_v61, %v4361_v2  ;;  %v6109_v8 = vcombine.low %v4361_v2, %v4363_v13 }
 0x7ac   : > { %v6111_v59 = vcombine.high %v4361_v2, %v4363_v13  ;;  %v6114_v6 = vrot.slane %v4398_v3, 11  ;;  %v4431_v31 = vrot.slane %v4429_v52, 7  ;;  %v6116_v7 = vrot.slane %v4424_v1, 11  ;;  %v630_v3 = vld [vmem:[#allocation6 + $0x10] sm:$0x2] }
 0x7ad   : > { %v4411_v41 = vshrl.u32 %v6105_v19, 16  ;;  %v4209_v14 = vpop.permute.xlu0 %4208  ;;  %v4408_v51 = vor.u32 %v4406_v47, %v4405_v46  ;;  %v4416_v17 = vshrl.u32 %v6107_v22, 16  ;;  %v4437_v11 = vshrl.u32 %v6109_v8, 16  ;;  %v4245_v30 = vpop.permute.xlu1 %4244 }
 0x7ae   : > { %v4442_v55 = vshrl.u32 %v6111_v59, 16  ;;  %v4341_v36 = vsel %vm3204_vm11, %v6085_v38, %v4209_v14  ;;  %v4419_v49 = vshll.u32 %v6107_v22, 16  ;;  %v4445_v12 = vshll.u32 %v6111_v59, 16 }
 0x7af   : > { %v4409_v9 = vsel %vm8648_vm6, %v6114_v6, %v4408_v51  ;;  %v4418_v54 = vrot.slane %v4416_v17, 7  ;;  %v6115_v62 = vrot.slane %v4411_v41, 11  ;;  %v4353_v23 = vsel %vm3221_vm12, %v4341_v36, %v4245_v30  ;;  %v612_v36 = vld [vmem:[#allocation6 + $0xc] sm:$0x8]  ;;  %v6686_v30 = vld [vmem:[%s9036_s9 + $0x38] sm:$0xff]  }
 0x7b0   : > { %v4444_v21 = vrot.slane %v4442_v55, 7  ;;  %v4434_v28 = vor.u32 %v4432_v4, %v4431_v31  ;;  %v6117_v24 = vrot.slane %v4437_v11, 11  ;;  %vm624_vm11 = vcmask 517121   ;;  %v615_v4 = vld [vmem:[#allocation6 + $0x18] sm:$0x8] }
 0x7b1   : > { %v4323_v44 = vpop.permute.xlu0 %4322  ;;  %v4421_v63 = vor.u32 %v4419_v49, %v4418_v54  ;;  %vm8667_vm10 = vmand %vm624_vm11, %vm625_vm9  ;;  %v613_v54 = vsel %vm8694_vm15, 0, %v612_v36  ;;  %v618_v49 = vld [vmem:[#allocation6 + $0x24] sm:$0x8] }
 0x7b2   : > { %v4365_v16 = vsel %vm2408_vm8, %v4353_v23, %v4323_v44  ;;  %v4447_v33 = vor.u32 %v4445_v12, %v4444_v21  ;;  %v4435_v39 = vsel %vm8648_vm6, %v6116_v7, %v4434_v28  ;;  %vm599_vm8 = vcmask 519168   ;;  %614 = vst [vmem:[#allocation6 + $0xc] sm:$0x8] %v613_v54  ;;  %v6656_v12 = vld [vmem:[%s9036_s9 + $0x40] sm:$0xff]  }
 0x7b3   : > { %v6112_v0 = vcombine.low %v4363_v13, %v4365_v16  ;;  %v6113_v58 = vcombine.high %v4363_v13, %v4365_v16  ;;  %v6120_v34 = vcombine.low %v4409_v9, %v4435_v39  ;;  %v6121_v27 = vcombine.high %v4409_v9, %v4435_v39  ;;  %601 = vst.msk [vmem:[#allocation6 + $0x4] sm:$0xf] %vm599_vm8, %v6756_v60  ;;  %v6657_v7 = vld [vmem:[%s9036_s9] sm:$0xff]   ;;  %v6667_v39 = vld [vmem:[%s9036_s9 + $0xd0] sm:$0xff]  }
 0x7b4   : > { %v4422_v45 = vsel %vm8648_vm6, %v6115_v62, %v4421_v63  ;;  %v4448_v42 = vsel %vm8648_vm6, %v6117_v24, %v4447_v33  ;;  %605 = vst.msk [vmem:[#allocation6 + $0x34] sm:$0xf] %vm599_vm8, %v6756_v60  ;;  %600 = vst.msk [vmem:[#allocation6] sm:$0xf] %vm599_vm8, %v6756_v60  ;;  %v631_v50 = vsel %vm8667_vm10, 0, %v630_v3  ;;  %v634_v53 = vsel %vm8667_vm10, 0, %v633_v37  ;;  %6390 = vmatprep.subr.bf16.mxu0 %v6656_v12 }
 0x7b5   : > { %v4450_v56 = vshrl.u32 %v6112_v0, 16  ;;  %v4455_v10 = vshrl.u32 %v6113_v58, 16  ;;  %v6125_v35 = vcombine.high %v4422_v45, %v4422_v45  ;;  %4783 = vmatprep.mubr.bf16.mxu0 %v6121_v27  ;;  %v6122_v5 = vcombine.low %v4422_v45, %v4448_v42  ;;  %602 = vst.msk [vmem:[#allocation6 + $0x8] sm:$0xf] %vm599_vm8, %v6756_v60  ;;  %604 = vst.msk [vmem:[#allocation6 + $0x30] sm:$0xf] %vm599_vm8, %v6756_v60 }
 0x7b6   : > { %v6123_v48 = vcombine.high %v4422_v45, %v4448_v42  ;;  %v4458_v61 = vshll.u32 %v6113_v58, 16  ;;  %4784 = vmatmul.mubr.bf16.vlgmr.msra.gmra.mrb[32].mxu0 %v6120_v34  ;;  %v6124_v25 = vcombine.low %v4422_v45, %v4422_v45  ;;  %606 = vst.msk [vmem:[#allocation6 + $0x38] sm:$0xf] %vm599_vm8, %v6756_v60  ;;  %v637_v52 = vsel %vm8667_vm10, 0, %v636_v40  ;;  %632 = vst [vmem:[#allocation6 + $0x10] sm:$0x2] %v631_v50 }
 0x7b7   : > { %v4457_v15 = vrot.slane %v4455_v10, 7  ;;  %4791 = vmatprep.mubr.bf16.mxu0 %v6125_v35  ;;  %v6118_v57 = vrot.slane %v4450_v56, 11  ;;  %635 = vst [vmem:[#allocation6 + $0x1c] sm:$0x2] %v634_v53  ;;  %638 = vst [vmem:[#allocation6 + $0x28] sm:$0x2] %v637_v52  ;;  %6391 = vmatpush3.bf16.msra.mxu0 %v6657_v7 }
 0x7b8   : > { %4831 = vmatprep.mubr.bf16.mxu1 %v6123_v48  ;;  %v616_v9 = vsel %vm8694_vm15, 0, %v615_v4  ;;  %v619_v21 = vsel %vm8694_vm15, 0, %v618_v49  ;;  %v6658_v62 = vld [vmem:[%s9036_s9 + $0x48] sm:$0xff]   ;;  %v6659_v44 = vld [vmem:[%s9036_s9 + $0xc0] sm:$0xff]   ;;  %v6662_v0 = vld [vmem:[%s9036_s9 + $0x50] sm:$0xff]  }
 0x7b9   : > { %v4460_v26 = vor.u32 %v4458_v61, %v4457_v15  ;;  %4832 = vmatmul.mubr.bf16.vlgmr.msra.gmra.mrb[16].mxu1 %v6122_v5  ;;  %617 = vst [vmem:[#allocation6 + $0x18] sm:$0x8] %v616_v9  ;;  %620 = vst [vmem:[#allocation6 + $0x24] sm:$0x8] %v619_v21  ;;  %v6661_v28 = vld [vmem:[%s9036_s9 + $0x80] sm:$0xff]   ;;  %6412 = vmatprep.subr.bf16.mxu1 %v6659_v44  ;;  %v6660_v24 = vld [vmem:[%s9036_s9 + $0x8] sm:$0xff]  }
 0x7ba   : > { %v627_v13 = vld [vmem:[#allocation6 + $0x4] sm:$0x2]  ;;  %6392 = vmatprep.subr.bf16.mxu0 %v6658_v62  ;;  %6413 = vmatpush3.bf16.msra.mxu1 %v6661_v28  ;;  %v6664_v34 = vld [vmem:[%s9036_s9 + $0x10] sm:$0xff]   ;;  %v6666_v27 = vld [vmem:[%s9036_s9 + $0x58] sm:$0xff]  }
 0x7bb   : > { %v4461_v20 = vsel %vm8648_vm6, %v6118_v57, %v4460_v26  ;;  %v639_v2 = vld [vmem:[#allocation6 + $0x34] sm:$0x2]  ;;  %v628_v46 = vsel %vm8667_vm10, 0, %v627_v13  ;;  %v609_v63 = vld [vmem:[#allocation6] sm:$0x8]  ;;  %6393 = vmatpush3.bf16.msra.mxu0 %v6660_v24  ;;  %v6669_v45 = vld [vmem:[%s9036_s9 + $0x90] sm:$0xff]  }
 0x7bc   : > { %v6127_v32 = vcombine.high %v4461_v20, %v4461_v20  ;;  %v6126_v18 = vcombine.low %v4461_v20, %v4461_v20  ;;  %v640_v60 = vsel %vm8667_vm10, 0, %v639_v2  ;;  %629 = vst [vmem:[#allocation6 + $0x4] sm:$0x2] %v628_v46  ;;  %v8687_v19 = vld [vmem:[#allocation6 + $0x8] sm:$0x1]  ;;  %v610_v16 = vsel %vm8694_vm15, 0, %v609_v63  ;;  %6394 = vmatprep.subr.bf16.mxu0 %v6662_v0 }
 0x7bd   : > { %641 = vst [vmem:[#allocation6 + $0x34] sm:$0x2] %v640_v60  ;;  %v6663_v33 = vld [vmem:[%s9036_s9 + $0xc8] sm:$0xff]   ;;  %611 = vst [vmem:[#allocation6] sm:$0x8] %v610_v16  ;;  %v6668_v42 = vld [vmem:[%s9036_s9 + $0x18] sm:$0xff]  }
 0x7be   : > { %4839 = vmatprep.mubr.bf16.mxu1 %v6127_v32  ;;  %4792 = vmatmul.mubr.bf16.gmra.mrb[36].mxu0 %v6124_v25  ;;  %v6665_v58 = vld [vmem:[%s9036_s9 + $0x88] sm:$0xff]   ;;  %v6119_v10 = vld [vmem:[%s9035_s8] ss:$0 sm:$0xff] }
 0x7bf   : > { %6414 = vmatprep.subr.bf16.mxu1 %v6663_v33  ;;  %6395 = vmatpush3.bf16.msra.mxu0 %v6664_v34 }
 0x7c0   : > { %6415 = vmatpush3.bf16.msra.mxu1 %v6665_v58  ;;  %6396 = vmatprep.subr.bf16.mxu0 %v6666_v27 }
 0x7c1   : > { %4840 = vmatmul.mubr.bf16.gmra.mrb[20].mxu1 %v6126_v18  ;;  %6416 = vmatprep.subr.bf16.mxu1 %v6667_v39 }
 0x7c3   : > { %v8685_v47 = vld [vmem:[#allocation6 + $0x4] sm:$0xf]  ;;  %6397 = vmatpush3.bf16.msra.mxu0 %v6668_v42 }
 0x7c4   : > { %v6165_v38 = vcombine.low %v8685_v47, %v8685_v47  ;;  %v4924_v1 = vld [vmem:[#allocation6 + $0x4] sm:$0xe]  ;;  %v6170_v23 = vcombine.low %v8685_v47, %v8687_v19  ;;  %6417 = vmatpush3.bf16.msra.mxu1 %v6669_v45 }
 0x7c5   : > { %v6175_v22 = vcombine.low %v4924_v1, %v8687_v19 }
 0x7c6   : > { %v4960_v8 = vshrl.u32 %v6165_v38, 16  ;;  %v4963_v59 = vshll.u32 %v6165_v38, 16 }
 0x7c7   : > { %v5045_v6 = vshrl.u32 %v6175_v22, 16  ;;  %v5048_v31 = vshll.u32 %v6175_v22, 16 }
 0x7c8   : > { %v4962_v41 = vrot.slane %v4960_v8, 4  ;;  %v4965_v14 = vrot.slane %v4963_v59, 5 }
 0x7c9   : > { %v5047_v51 = vrot.slane %v5045_v6, 5  ;;  %v5050_v17 = vrot.slane %v5048_v31, 6 }
 0x7ca   : > { %v4966_v11 = vor.u32 %v4965_v14, %v4962_v41 }
 0x7cb   : > { %v5051_v55 = vor.u32 %v5050_v17, %v5047_v51 }
 0x7cc   : > { %4999 = vrot.lane.b32.xlu1 %v4966_v11, %s6753_s29 }
 0x7d0   : > { %5084 = vrot.lane.b32.xlu1 %v5051_v55, %s6753_s29 }
 0x889   : > { %v6350_v56 = vpop.f32.mrb[32].mxu0 }
 0x88a   : > { %v6351_v35 = vpop.f32.mrb[33].mxu0 }
 0x88b   : > { %v6352_v5 = vadd.f32 %v6351_v35, %v6350_v56  ;;  %v6353_v48 = vpop.f32.mrb[34].mxu0 }
 0x88c   : > { %v6378_v15 = vpop.f32.mrb[16].mxu1  ;;  %v6354_v61 = vpop.f32.mrb[35].mxu0 }
 0x88d   : > { %v6379_v57 = vpop.f32.mrb[17].mxu1  ;;  %v4786_v26 = vadd.f32 %v6352_v5, %v6119_v10  ;;  %v6355_v20 = vadd.f32 %v6354_v61, %v6353_v48 }
 0x88e   : > { %v6380_v32 = vadd.f32 %v6379_v57, %v6378_v15  ;;  %v6381_v25 = vpop.f32.mrb[18].mxu1  ;;  %v4909_v15 = vld [vmem:[#allocation6] sm:$0x8] }
 0x88f   : > { %v6382_v18 = vpop.f32.mrb[19].mxu1  ;;  %v4789_v3 = vadd.f32 %v6355_v20, %v6119_v10  ;;  %v6160_v20 = vcombine.low %v4909_v15, %v8685_v47  ;;  %v8770_v47 = vld [vmem:[#allocation6 + $0x14] sm:$0x1] }
 0x890   : > { %v4834_v29 = vadd.f32 %v6380_v32, %v4786_v26  ;;  %v6383_v37 = vadd.f32 %v6382_v18, %v6381_v25  ;;  %v4900_v25 = vld [vmem:[#allocation6 + $0x10] sm:$0x3]  ;;  %v5000_v18 = vpop.permute.xlu1 %4999 }
 0x891   : > { %v6356_v50 = vpop.f32.mrb[36].mxu0 }
 0x892   : > { %v4837_v40 = vadd.f32 %v6383_v37, %v4789_v3  ;;  %v6357_v53 = vpop.f32.mrb[37].mxu0  ;;  %v4848_v52 = vsel %vm4847_vm14, %v4834_v29, 0.0 }
 0x893   : > { %v6358_v2 = vadd.f32 %v6357_v53, %v6356_v50  ;;  %v6359_v46 = vpop.f32.mrb[38].mxu0  ;;  %v4906_v50 = vld [vmem:[#allocation6 + $0x28] sm:$0x3]  ;;  %v5024_v53 = vrot.slane %v6170_v23, 5  ;;  %v6670_v23 = vld [vmem:[%s9036_s9 + $0x60] sm:$0xff]  }
 0x894   : > { %v4849_v13 = vsel %vm4847_vm14, %v4837_v40, 0.0  ;;  %v6384_v60 = vpop.f32.mrb[20].mxu1  ;;  %v6360_v1 = vpop.f32.mrb[39].mxu0  ;;  %v5096_v46 = vsel %vm3221_vm12, %v6160_v20, %v5000_v18  ;;  %6398 = vmatprep.subr.bf16.mxu0 %v6670_v23 }
 0x895   : > { %v4850_v38 = vadd.f32 %v4849_v13, %v4848_v52  ;;  %v6385_v22 = vpop.f32.mrb[21].mxu1  ;;  %v4794_v8 = vadd.f32 %v6358_v2, %v6119_v10  ;;  %v8765_v1 = vld [vmem:[#allocation6 + $0x34] sm:$0xf] }
 0x896   : > { %v6386_v59 = vadd.f32 %v6385_v22, %v6384_v60  ;;  %v6387_v6 = vpop.f32.mrb[22].mxu1  ;;  %v5085_v22 = vpop.permute.xlu1 %5084  ;;  %v6169_v19 = vcombine.low %v8765_v1, %v8765_v1 }
 0x897   : > { %v6388_v31 = vpop.f32.mrb[23].mxu1 }
 0x898   : > { %v4842_v41 = vadd.f32 %v6386_v59, %v4794_v8  ;;  %v5111_v8 = vsel %vm3221_vm12, %v5024_v53, %v5085_v22  ;;  %v6671_v31 = vld [vmem:[%s9036_s9 + $0xd8] sm:$0xff]  }
 0x899   : > { %v6180_v59 = vcombine.low %v5096_v46, %v5111_v8  ;;  %v8768_v6 = vcombine.high %v5096_v46, %v5111_v8  ;;  %6418 = vmatprep.subr.bf16.mxu1 %v6671_v31 }
 0x89a   : > { %v4851_v14 = vsel %vm4847_vm14, %v4842_v41, 0.0 }
 0x89b   : > { %v4852_v51 = vadd.f32 %v4851_v14, %v4850_v38  ;;  %v8783_v14 = vld [vmem:[#allocation6 + $0x38] sm:$0x1] }
 0x89d   : > { %v4853_v17 = vrot.slane %v4852_v51, 4 }
 0x89f   : > { %v4854_v11 = vadd.f32 %v4853_v17, %v4852_v51  ;;  %v4928_v51 = vld [vmem:[#allocation6 + $0x34] sm:$0xe] }
 0x8a0   : > { %v6673_v17 = vld [vmem:[%s9036_s9 + $0x98] sm:$0xff]  }
 0x8a1   : > { %v4855_v55 = vrot.slane %v4854_v11, 2  ;;  %6419 = vmatpush3.bf16.msra.mxu1 %v6673_v17  ;;  %v6680_v17 = vld [vmem:[%s9036_s9 + $0xe8] sm:$0xff]  }
 0x8a3   : > { %v4856_v4 = vadd.f32 %v4855_v55, %v4854_v11  ;;  %v8788_v11 = vld [vmem:[#allocation6 + $0x20] sm:$0x1] }
 0x8a5   : > { %v4857_v36 = vrot.slane %v4856_v4, 1 }
 0x8a7   : > { %v4858_v9 = vadd.f32 %v4857_v36, %v4856_v4  ;;  %v4992_v36 = vshrl.u32 %v6169_v19, 16 }
 0x8a9   : > { %v4860_v54 = vmul.f32 0.11111111, %v4858_v9  ;;  %v4995_v9 = vshll.u32 %v6169_v19, 16 }
 0x8ab   : > { %v4861_v49 = vsub.f32 %v4834_v29, %v4860_v54  ;;  %v4862_v21 = vsub.f32 %v4837_v40, %v4860_v54  ;;  %v4863_v12 = vsub.f32 %v4842_v41, %v4860_v54  ;;  %v4903_v40 = vld [vmem:[#allocation6 + $0x1c] sm:$0x3]  ;;  %v4997_v46 = vrot.slane %v4995_v9, 5  ;;  %v6682_v9 = vld [vmem:[%s9036_s9 + $0xa8] sm:$0xff]  }
 0x8ac   : > { %v6672_v41 = vld [vmem:[%s9036_s9 + $0x20] sm:$0xff]  }
 0x8ad   : > { %v4864_v7 = vmul.f32 %v4861_v49, %v4861_v49  ;;  %v4865_v62 = vmul.f32 %v4862_v21, %v4862_v21  ;;  %v4866_v44 = vmul.f32 %v4863_v12, %v4863_v12  ;;  %6399 = vmatpush3.bf16.msra.mxu0 %v6672_v41 }
 0x8af   : > { %v4867_v28 = vsel %vm4847_vm14, %v4864_v7, 0.0  ;;  %v4868_v63 = vsel %vm4847_vm14, %v4865_v62, 0.0  ;;  %v4870_v16 = vsel %vm4847_vm14, %v4866_v44, 0.0  ;;  %v8800_v62 = vcombine.low %v4928_v51, %v8783_v14  ;;  %v6679_v51 = vld [vmem:[%s9036_s9 + $0x70] sm:$0xff]  }
 0x8b0   : > { %v4869_v24 = vadd.f32 %v4868_v63, %v4867_v28 }
 0x8b2   : > { %v4871_v33 = vadd.f32 %v4870_v16, %v4869_v24  ;;  %v5170_v24 = vshrl.u32 %v8768_v6, 16 }
 0x8b4   : > { %v4872_v0 = vrot.slane %v4871_v33, 4 }
 0x8b6   : > { %v4873_v58 = vadd.f32 %v4872_v0, %v4871_v33 }
 0x8b8   : > { %v4874_v39 = vrot.slane %v4873_v58, 2 }
 0x8ba   : > { %v4875_v34 = vadd.f32 %v4874_v39, %v4873_v58 }
 0x8bc   : > { %v4876_v27 = vrot.slane %v4875_v34, 1 }
 0x8be   : > { %v4877_v45 = vadd.f32 %v4876_v27, %v4875_v34 }
 0x8c0   : > { %v4878_v42 = vmul.f32 0.11111111, %v4877_v45 }
 0x8c2   : > { %v4879_v56 = vadd.f32 1e-05, %v4878_v42  ;;  %v8808_v42 = vld [vmem:[#allocation6 + $0x2c] sm:$0x1] }
 0x8c4   : > { %6726 = vrsqrt.f32 %v4879_v56 }
 0x8ce   : > { %v6727_v10 = vpop.eup %6726 }
 0x8cf   : > { %v4881_v35 = vmul.f32 %v6727_v10, %v4861_v49  ;;  %v4882_v5 = vmul.f32 %v6727_v10, %v4862_v21  ;;  %v4883_v48 = vmul.f32 %v6727_v10, %v4863_v12 }
 0x8d1   : > { %vm4884_vm2 = vcmp.gt.f32.partialorder %v4881_v35, 0.0  ;;  %vm4885_vm3 = vcmp.gt.f32.partialorder %v4882_v5, 0.0  ;;  %vm4886_vm4 = vcmp.gt.f32.partialorder %v4883_v48, 0.0  ;;  %v4887_v61 = vmul.f32 0.2, %v4881_v35 }
 0x8d2   : > { %v4888_v57 = vmul.f32 0.2, %v4882_v5  ;;  %v4889_v26 = vmul.f32 0.2, %v4883_v48 }
 0x8d3   : > { %v4890_v32 = vsel %vm4884_vm2, %v4881_v35, %v4887_v61 }
 0x8d4   : > { %v4891_v3 = vsel %vm4885_vm3, %v4882_v5, %v4888_v57  ;;  %v4892_v29 = vsel %vm4886_vm4, %v4883_v48, %v4889_v26  ;;  %v4893_v37 = vpack.c.bf16 %v4890_v32, %v4890_v32  ;;  %v5165_v5 = vshrl.u32 %v6180_v59, 16 }
 0x8d5   : > { %v4894_v52 = vpack.c.bf16 %v4891_v3, %v4891_v3  ;;  %v4895_v13 = vpack.c.bf16 %v4892_v29, %v4892_v29  ;;  %v5173_v48 = vshll.u32 %v8768_v6, 16  ;;  %v5172_v26 = vrot.slane %v5170_v24, 7  ;;  %v6675_v3 = vld [vmem:[%s9036_s9 + $0x68] sm:$0xff]   ;;  %v6676_v29 = vld [vmem:[%s9036_s9 + $0xe0] sm:$0xff]  }
 0x8d6   : > { %v4901_v2 = vsel %vm4899_vm5, %v4893_v37, %v4900_v25  ;;  %v6677_v37 = vld [vmem:[%s9036_s9 + $0x28] sm:$0xff]   ;;  %6400 = vmatprep.subr.bf16.mxu0 %v6675_v3  ;;  %v6190_v8 = vrot.slane %v5165_v5, 11  ;;  %6420 = vmatprep.subr.bf16.mxu1 %v6676_v29 }
 0x8d7   : > { %4902 = vst [vmem:[#allocation6 + $0x10] sm:$0x3] %v4901_v2  ;;  %v4904_v60 = vsel %vm4899_vm5, %v4894_v52, %v4903_v40  ;;  %v4907_v38 = vsel %vm4899_vm5, %v4895_v13, %v4906_v50  ;;  %v6678_v13 = vld [vmem:[%s9036_s9 + $0xa0] sm:$0xff]   ;;  %v4994_v2 = vrot.slane %v4992_v36, 4  ;;  %v5175_v59 = vor.u32 %v5173_v48, %v5172_v26  ;;  %6401 = vmatpush3.bf16.msra.mxu0 %v6677_v37  ;;  %v4911_v48 = vld [vmem:[#allocation6 + $0xc] sm:$0x8] }
 0x8d8   : > { %4905 = vst [vmem:[#allocation6 + $0x1c] sm:$0x3] %v4904_v60  ;;  %4908 = vst [vmem:[#allocation6 + $0x28] sm:$0x3] %v4907_v38  ;;  %6421 = vmatpush3.bf16.msra.mxu1 %v6678_v13  ;;  %6402 = vmatprep.subr.bf16.mxu0 %v6679_v51 }
 0x8d9   : > { %6422 = vmatprep.subr.bf16.mxu1 %v6680_v17 }
 0x8dc   : > { %6423 = vmatpush3.bf16.msra.mxu1 %v6682_v9 }
 0x8de   : > { %v8790_v55 = vld [vmem:[#allocation6 + $0x10] sm:$0xf] }
 0x8df   : > { %v4925_v4 = vld [vmem:[#allocation6 + $0x10] sm:$0xe]  ;;  %v8792_v54 = vld [vmem:[#allocation6 + $0x1c] sm:$0xf]  ;;  %v6166_v49 = vcombine.low %v8790_v55, %v8790_v55  ;;  %v8796_v21 = vld [vmem:[#allocation6 + $0x28] sm:$0xf]  ;;  %v6171_v60 = vcombine.low %v8790_v55, %v8770_v47 }
 0x8e0   : > { %v6176_v12 = vcombine.low %v4925_v4, %v8770_v47  ;;  %v4926_v7 = vld [vmem:[#allocation6 + $0x1c] sm:$0xe]  ;;  %v6167_v44 = vcombine.low %v8792_v54, %v8792_v54  ;;  %v6168_v28 = vcombine.low %v8796_v21, %v8796_v21  ;;  %v4927_v35 = vld [vmem:[#allocation6 + $0x28] sm:$0xe]  ;;  %v6172_v38 = vcombine.low %v8792_v54, %v8788_v11 }
 0x8e1   : > { %v6177_v63 = vcombine.low %v4926_v7, %v8788_v11  ;;  %v4968_v16 = vshrl.u32 %v6166_v49, 16  ;;  %v4971_v33 = vshll.u32 %v6166_v49, 16  ;;  %v6178_v52 = vcombine.low %v4927_v35, %v8808_v42  ;;  %v6681_v4 = vld [vmem:[%s9036_s9 + $0x30] sm:$0xff]   ;;  %v621_v49 = vld [vmem:[#allocation6 + $0x30] sm:$0x8]  ;;  %v6693_v35 = vld [vmem:[%s9036_s9 + $0x1c0] sm:$0xff]  }
 0x8e2   : > { %v5053_v0 = vshrl.u32 %v6176_v12, 16  ;;  %v5056_v58 = vshll.u32 %v6176_v12, 16  ;;  %v4976_v39 = vshrl.u32 %v6167_v44, 16  ;;  %v4979_v34 = vshll.u32 %v6167_v44, 16  ;;  %6403 = vmatpush3.bf16.msra.mxu0 %v6681_v4 }
 0x8e3   : > { %v4984_v27 = vshrl.u32 %v6168_v28, 16  ;;  %v4987_v45 = vshll.u32 %v6168_v28, 16  ;;  %v4970_v56 = vrot.slane %v4968_v16, 4  ;;  %v4973_v10 = vrot.slane %v4971_v33, 5  ;;  %v6684_v33 = vld [vmem:[%s9036_s9 + $0x78] sm:$0xff]  }
 0x8e4   : > { %v4978_v15 = vrot.slane %v4976_v39, 4  ;;  %v4981_v61 = vrot.slane %v4979_v34, 5  ;;  %v5055_v57 = vrot.slane %v5053_v0, 5  ;;  %v5058_v32 = vrot.slane %v5056_v58, 6  ;;  %v6687_v58 = vld [vmem:[%s9036_s9 + $0xb0] sm:$0xff]   ;;  %6404 = vmatprep.subr.bf16.mxu0 %v6684_v33 }
 0x8e5   : > { %v4974_v20 = vor.u32 %v4973_v10, %v4970_v56  ;;  %v5061_v25 = vshrl.u32 %v6177_v63, 16  ;;  %v5064_v18 = vshll.u32 %v6177_v63, 16  ;;  %v4986_v50 = vrot.slane %v4984_v27, 4  ;;  %v6689_v56 = vld [vmem:[%s9036_s9 + $0x140] sm:$0xff]   ;;  %v6690_v10 = vld [vmem:[%s9036_s9 + $0xb8] sm:$0xff]  }
 0x8e6   : > { %v4982_v40 = vor.u32 %v4981_v61, %v4978_v15  ;;  %v4989_v53 = vrot.slane %v4987_v45, 5  ;;  %v6173_v6 = vcombine.low %v8796_v21, %v8808_v42  ;;  %v5059_v19 = vor.u32 %v5058_v32, %v5055_v57  ;;  %6405 = vmatpush3.bf16.msra.mxu0 %v6686_v30  ;;  %v6688_v45 = vld [vmem:[%s9036_s9 + $0xf8] sm:$0xff]   ;;  %v6691_v30 = vld [vmem:[%s9036_s9 + $0x100] sm:$0xff]  }
 0x8e7   : > { %5001 = vrot.lane.b32.xlu0 %v4974_v20, %s6753_s29  ;;  %v5063_v22 = vrot.slane %v5061_v25, 5  ;;  %v5066_v23 = vrot.slane %v5064_v18, 6  ;;  %v5069_v31 = vshrl.u32 %v6178_v52, 16  ;;  %v5072_v41 = vshll.u32 %v6178_v52, 16  ;;  %6434 = vmatprep.subr.bf16.mxu0 %v6689_v56  ;;  %v4913_v20 = vld [vmem:[#allocation6 + $0x18] sm:$0x8] }
 0x8e8   : > { %5003 = vrot.lane.b32.xlu1 %v4982_v40, %s6753_s29  ;;  %v4990_v36 = vor.u32 %v4989_v53, %v4986_v50  ;;  %v5077_v12 = vshrl.u32 %v8800_v62, 16  ;;  %v5080_v7 = vshll.u32 %v8800_v62, 16  ;;  %v622_v44 = vsel %vm8694_vm15, 0, %v621_v49  ;;  %v6685_v62 = vld [vmem:[%s9036_s9 + $0xf0] sm:$0xff]   ;;  %v4915_v50 = vld [vmem:[#allocation6 + $0x24] sm:$0x8] }
 0x8e9   : > { %v4998_v28 = vor.u32 %v4997_v46, %v4994_v2  ;;  %623 = vst [vmem:[#allocation6 + $0x30] sm:$0x8] %v622_v44  ;;  %v5067_v63 = vor.u32 %v5066_v23, %v5063_v22  ;;  %v5071_v24 = vrot.slane %v5069_v31, 5  ;;  %v5074_v16 = vrot.slane %v5072_v41, 6  ;;  %6424 = vmatprep.subr.bf16.mxu1 %v6685_v62 }
 0x8ea   : > { %v8861_v0 = vsel %vm8648_vm6, %v6190_v8, %v5175_v59  ;;  %v5079_v39 = vrot.slane %v5077_v12, 5  ;;  %v5082_v34 = vrot.slane %v5080_v7, 6  ;;  %6425 = vmatpush3.bf16.msra.mxu1 %v6687_v58  ;;  %v6161_v57 = vcombine.low %v4911_v48, %v8790_v55 }
 0x8eb   : > { %5086 = vrot.lane.b32.xlu0 %v5059_v19, %s6753_s29  ;;  %v5075_v27 = vor.u32 %v5074_v16, %v5071_v24  ;;  %6426 = vmatprep.subr.bf16.mxu1 %v6688_v45  ;;  %v5025_v26 = vrot.slane %v6171_v60, 5  ;;  %v6162_v37 = vcombine.low %v4913_v20, %v8792_v54  ;;  %v5026_v40 = vrot.slane %v6172_v38, 5  ;;  %v6692_v45 = vld [vmem:[%s9036_s9 + $0x148] sm:$0xff]  }
 0x8ec   : > { %5005 = vrot.lane.b32.xlu1 %v4990_v36, %s6753_s29  ;;  %v5083_v5 = vor.u32 %v5082_v34, %v5079_v39  ;;  %v6174_v55 = vcombine.low %v8765_v1, %v8783_v14  ;;  %v6163_v11 = vcombine.low %v4915_v50, %v8796_v21  ;;  %v5027_v54 = vrot.slane %v6173_v6, 5  ;;  %v6698_v50 = vld [vmem:[%s9036_s9 + $0x110] sm:$0xff]  }
 0x8ee   : > { %6427 = vmatpush3.bf16.msra.mxu1 %v6690_v10  ;;  %v5028_v51 = vrot.slane %v6174_v55, 5 }
 0x8ef   : > { %5088 = vrot.lane.b32.xlu0 %v5067_v63, %s6753_s29  ;;  %6456 = vmatprep.subr.bf16.mxu1 %v6693_v35 }
 0x8f0   : > { %5007 = vrot.lane.b32.xlu1 %v4998_v28, %s6753_s29  ;;  %v4917_v47 = vld [vmem:[#allocation6 + $0x30] sm:$0x8] }
 0x8f1   : > { %v6164_v38 = vcombine.low %v4917_v47, %v8765_v1 }
 0x8f3   : > { %5090 = vrot.lane.b32.xlu0 %v5075_v27, %s6753_s29 }
 0x8f7   : > { %5092 = vrot.lane.b32.xlu0 %v5083_v5, %s6753_s29 }
 0x959   : > { %v5002_v15 = vpop.permute.xlu0 %5001 }
 0x95a   : > { %v5004_v61 = vpop.permute.xlu1 %5003  ;;  %v5099_v25 = vsel %vm3221_vm12, %v6161_v57, %v5002_v15  ;;  %v6694_v57 = vld [vmem:[%s9036_s9 + $0x108] sm:$0xff]  }
 0x95b   : > { %v5102_v2 = vsel %vm3221_vm12, %v6162_v37, %v5004_v61 }
 0x95d   : > { %v5087_v32 = vpop.permute.xlu0 %5086 }
 0x95e   : > { %v5114_v18 = vsel %vm3221_vm12, %v5025_v26, %v5087_v32  ;;  %v5006_v53 = vpop.permute.xlu1 %5005  ;;  %v6695_v26 = vld [vmem:[%s9036_s9 + $0x180] sm:$0xff]  }
 0x95f   : > { %v6181_v3 = vcombine.low %v5099_v25, %v5114_v18  ;;  %v6185_v29 = vcombine.high %v5099_v25, %v5114_v18  ;;  %v5105_v17 = vsel %vm3221_vm12, %v6163_v11, %v5006_v53  ;;  %v6696_v25 = vld [vmem:[%s9036_s9 + $0x150] sm:$0xff]   ;;  %v6699_v53 = vld [vmem:[%s9036_s9 + $0x188] sm:$0xff]  }
 0x960   : > { %v6710_v11 = vld [vmem:[%s9036_s9 + $0x128] sm:$0xff]  }
 0x961   : > { %v5183_v52 = vshrl.u32 %v6185_v29, 16  ;;  %v5089_v13 = vpop.permute.xlu0 %5088  ;;  %v5178_v46 = vshrl.u32 %v6181_v3, 16  ;;  %v5186_v8 = vshll.u32 %v6185_v29, 16  ;;  %v6697_v29 = vld [vmem:[%s9036_s9 + $0x1c8] sm:$0xff]  }
 0x962   : > { %v5117_v60 = vsel %vm3221_vm12, %v5026_v40, %v5089_v13  ;;  %v5008_v41 = vpop.permute.xlu1 %5007  ;;  %v6701_v13 = vld [vmem:[%s9036_s9 + $0x1d0] sm:$0xff]  }
 0x963   : > { %v5185_v22 = vrot.slane %v5183_v52, 7  ;;  %v6182_v59 = vcombine.low %v5102_v2, %v5117_v60  ;;  %v6186_v19 = vcombine.high %v5102_v2, %v5117_v60  ;;  %v6191_v4 = vrot.slane %v5178_v46, 11  ;;  %v6700_v52 = vld [vmem:[%s9036_s9 + $0x158] sm:$0xff]   ;;  %v6703_v46 = vld [vmem:[%s9036_s9 + $0x190] sm:$0xff]  }
 0x964   : > { %v5108_v21 = vsel %vm3221_vm12, %v6164_v38, %v5008_v41  ;;  %v6702_v2 = vld [vmem:[%s9036_s9 + $0x118] sm:$0xff]   ;;  %v6712_v38 = vld [vmem:[%s9036_s9 + $0x170] sm:$0xff]  }
 0x965   : > { %v5188_v23 = vor.u32 %v5186_v8, %v5185_v22  ;;  %v5196_v31 = vshrl.u32 %v6186_v19, 16  ;;  %v5091_v14 = vpop.permute.xlu0 %5090  ;;  %v5191_v36 = vshrl.u32 %v6182_v59, 16  ;;  %v5199_v12 = vshll.u32 %v6186_v19, 16  ;;  %v6705_v60 = vld [vmem:[%s9036_s9 + $0x1d8] sm:$0xff]   ;;  %v6706_v22 = vld [vmem:[%s9036_s9 + $0x120] sm:$0xff]   ;;  %v6708_v59 = vld [vmem:[%s9036_s9 + $0x168] sm:$0xff]  }
 0x966   : > { %v5120_v9 = vsel %vm3221_vm12, %v5027_v54, %v5091_v14  ;;  %v6707_v8 = vld [vmem:[%s9036_s9 + $0x198] sm:$0xff]   ;;  %v6709_v19 = vld [vmem:[%s9036_s9 + $0x1e0] sm:$0xff]   ;;  %v6715_v14 = vld [vmem:[%s9036_s9 + $0x1a8] sm:$0xff]  }
 0x967   : > { %v5198_v49 = vrot.slane %v5196_v31, 7  ;;  %v6183_v7 = vcombine.low %v5105_v17, %v5120_v9  ;;  %v6187_v44 = vcombine.high %v5105_v17, %v5120_v9  ;;  %v5189_v1 = vsel %vm8648_vm6, %v6191_v4, %v5188_v23  ;;  %v6711_v54 = vld [vmem:[%s9036_s9 + $0x1a0] sm:$0xff]   ;;  %v6713_v23 = vld [vmem:[%s9036_s9 + $0x1e8] sm:$0xff]   ;;  %v6714_v31 = vld [vmem:[%s9036_s9 + $0x130] sm:$0xff]  }
 0x968   : > { %v6192_v24 = vrot.slane %v5191_v36, 11  ;;  %v6196_v33 = vcombine.low %v8861_v0, %v5189_v1  ;;  %v6197_v62 = vcombine.high %v8861_v0, %v5189_v1  ;;  %v6716_v41 = vld [vmem:[%s9036_s9 + $0x178] sm:$0xff]   ;;  %v6719_v4 = vld [vmem:[%s9036_s9 + $0x1b0] sm:$0xff]  }
 0x969   : > { %v5201_v42 = vor.u32 %v5199_v12, %v5198_v49  ;;  %v5204_v6 = vshrl.u32 %v6183_v7, 16  ;;  %v5209_v28 = vshrl.u32 %v6187_v44, 16  ;;  %v5093_v63 = vpop.permute.xlu0 %5092  ;;  %v5212_v39 = vshll.u32 %v6187_v44, 16  ;;  %v6718_v17 = vld [vmem:[%s9036_s9 + $0x138] sm:$0xff]  }
 0x96a   : > { %v5123_v16 = vsel %vm3221_vm12, %v5028_v51, %v5093_v63  ;;  %5806 = vmatprep.mubr.bf16.mxu0 %v6197_v62  ;;  %v6717_v51 = vld [vmem:[%s9036_s9 + $0x1f0] sm:$0xff]   ;;  %v6720_v36 = vld [vmem:[%s9036_s9 + $0x1f8] sm:$0xff]  }
 0x96b   : > { %v5211_v58 = vrot.slane %v5209_v28, 7  ;;  %v6188_v34 = vcombine.low %v5108_v21, %v5123_v16  ;;  %v6189_v27 = vcombine.high %v5108_v21, %v5123_v16  ;;  %v6193_v56 = vrot.slane %v5204_v6, 11  ;;  %5807 = vmatmul.mubr.bf16.vlgmr.msra.gmra.mrb[40].mxu0 %v6196_v33  ;;  %v6721_v9 = vld [vmem:[%s9036_s9 + $0x1b8] sm:$0xff]  }
 0x96c   : > { %v8917_v10 = vsel %vm8648_vm6, %v6192_v24, %v5201_v42  ;;  %6435 = vmatpush3.bf16.msra.mxu0 %v6691_v30 }
 0x96d   : > { %v5214_v35 = vor.u32 %v5212_v39, %v5211_v58  ;;  %v5217_v0 = vshrl.u32 %v6188_v34, 16  ;;  %v5222_v5 = vshrl.u32 %v6189_v27, 16  ;;  %v5225_v48 = vshll.u32 %v6189_v27, 16  ;;  %6436 = vmatprep.subr.bf16.mxu0 %v6692_v45 }
 0x96e   : > { %v6199_v15 = vcombine.high %v5189_v1, %v8917_v10  ;;  %v6198_v61 = vcombine.low %v5189_v1, %v8917_v10  ;;  %v6195_v1 = vld [vmem:[%s9037_s10] ss:$0 sm:$0xff] }
 0x96f   : > { %v6194_v20 = vrot.slane %v5217_v0, 11  ;;  %v5224_v32 = vrot.slane %v5222_v5, 7  ;;  %v8932_v18 = vsel %vm8648_vm6, %v6193_v56, %v5214_v35 }
 0x970   : > { %5847 = vmatprep.mubr.bf16.mxu1 %v6199_v15  ;;  %v6201_v3 = vcombine.high %v8917_v10, %v8932_v18  ;;  %v6200_v37 = vcombine.low %v8917_v10, %v8932_v18  ;;  %6437 = vmatpush3.bf16.msra.mxu0 %v6694_v57 }
 0x971   : > { %v5227_v40 = vor.u32 %v5225_v48, %v5224_v32  ;;  %5848 = vmatmul.mubr.bf16.vlgmr.msra.gmra.mrb[24].mxu1 %v6198_v61  ;;  %6438 = vmatprep.subr.bf16.mxu0 %v6696_v25 }
 0x972   : > { %6457 = vmatpush3.bf16.msra.mxu1 %v6695_v26  ;;  %5888 = vmatprep.mubr.bf16.mxu0 %v6201_v3 }
 0x973   : > { %v5228_v47 = vsel %vm8648_vm6, %v6194_v20, %v5227_v40  ;;  %6458 = vmatprep.subr.bf16.mxu1 %v6697_v29  ;;  %vm5956_vm6 = vcmask 1024  }
 0x974   : > { %v6203_v55 = vcombine.high %v8932_v18, %v5228_v47  ;;  %6439 = vmatpush3.bf16.msra.mxu0 %v6698_v50  ;;  %v6202_v49 = vcombine.low %v8932_v18, %v5228_v47 }
 0x975   : > { %6440 = vmatprep.subr.bf16.mxu0 %v6700_v52 }
 0x976   : > { %6459 = vmatpush3.bf16.msra.mxu1 %v6699_v53  ;;  %5929 = vmatprep.mubr.bf16.mxu1 %v6203_v55 }
 0x977   : > { %6460 = vmatprep.subr.bf16.mxu1 %v6701_v13 }
 0x978   : > { %6441 = vmatpush3.bf16.msra.mxu0 %v6702_v2 }
 0x979   : > { %6442 = vmatprep.subr.bf16.mxu0 %v6704_v43 }
 0x97a   : > { %6461 = vmatpush3.bf16.msra.mxu1 %v6703_v46 }
 0x97b   : > { %6462 = vmatprep.subr.bf16.mxu1 %v6705_v60 }
 0x97c   : > { %6443 = vmatpush3.bf16.msra.mxu0 %v6706_v22 }
 0x97d   : > { %6444 = vmatprep.subr.bf16.mxu0 %v6708_v59 }
 0x97e   : > { %6463 = vmatpush3.bf16.msra.mxu1 %v6707_v8 }
 0x97f   : > { %6464 = vmatprep.subr.bf16.mxu1 %v6709_v19 }
 0x980   : > { %6445 = vmatpush3.bf16.msra.mxu0 %v6710_v11 }
 0x981   : > { %6446 = vmatprep.subr.bf16.mxu0 %v6712_v38 }
 0x982   : > { %6465 = vmatpush3.bf16.msra.mxu1 %v6711_v54 }
 0x983   : > { %6466 = vmatprep.subr.bf16.mxu1 %v6713_v23 }
 0x984   : > { %6447 = vmatpush3.bf16.msra.mxu0 %v6714_v31 }
 0x985   : > { %6448 = vmatprep.subr.bf16.mxu0 %v6716_v41 }
 0x986   : > { %6467 = vmatpush3.bf16.msra.mxu1 %v6715_v14 }
 0x987   : > { %6468 = vmatprep.subr.bf16.mxu1 %v6717_v51 }
 0x988   : > { %6449 = vmatpush3.bf16.msra.mxu0 %v6718_v17 }
 0x98a   : > { %6469 = vmatpush3.bf16.msra.mxu1 %v6719_v4 }
 0x98b   : > { %6470 = vmatprep.subr.bf16.mxu1 %v6720_v36  ;;  %5889 = vmatmul.mubr.bf16.vlgmr.msra.gmra.mrb[44].mxu0 %v6200_v37 }
 0x98e   : > { %6471 = vmatpush3.bf16.msra.mxu1 %v6721_v9 }
 0x991   : > { %5930 = vmatmul.mubr.bf16.vlgmr.msra.gmra.mrb[28].mxu1 %v6202_v49 }
 0xa3e   : > { %v6406_v12 = vpop.f32.mrb[40].mxu0 }
 0xa3f   : > { %v6407_v7 = vpop.f32.mrb[41].mxu0 }
 0xa40   : > { %v6408_v44 = vadd.f32 %v6407_v7, %v6406_v12  ;;  %v6409_v21 = vpop.f32.mrb[42].mxu0 }
 0xa41   : > { %v6410_v42 = vpop.f32.mrb[43].mxu0 }
 0xa42   : > { %v6411_v6 = vadd.f32 %v6410_v42, %v6409_v21  ;;  %v5809_v24 = vadd.f32 %v6408_v44, %v6195_v1 }
 0xa44   : > { %v6428_v28 = vpop.f32.mrb[24].mxu1  ;;  %v5812_v30 = vadd.f32 %v6411_v6, %v6195_v1 }
 0xa45   : > { %v6429_v63 = vpop.f32.mrb[25].mxu1 }
 0xa46   : > { %v6430_v16 = vadd.f32 %v6429_v63, %v6428_v28  ;;  %v6431_v33 = vpop.f32.mrb[26].mxu1 }
 0xa47   : > { %v6432_v62 = vpop.f32.mrb[27].mxu1 }
 0xa48   : > { %v5850_v58 = vadd.f32 %v6430_v16, %v5809_v24  ;;  %v6433_v39 = vadd.f32 %v6432_v62, %v6431_v33 }
 0xa4a   : > { %v5853_v34 = vadd.f32 %v6433_v39, %v5812_v30 }
 0xa5e   : > { %v6450_v27 = vpop.f32.mrb[44].mxu0 }
 0xa5f   : > { %v6451_v45 = vpop.f32.mrb[45].mxu0 }
 0xa60   : > { %v6452_v56 = vadd.f32 %v6451_v45, %v6450_v27  ;;  %v6453_v10 = vpop.f32.mrb[46].mxu0 }
 0xa61   : > { %v6454_v35 = vpop.f32.mrb[47].mxu0 }
 0xa62   : > { %v5891_v0 = vadd.f32 %v6452_v56, %v5850_v58  ;;  %v6455_v5 = vadd.f32 %v6454_v35, %v6453_v10 }
 0xa64   : > { %v6472_v48 = vpop.f32.mrb[28].mxu1  ;;  %v5894_v61 = vadd.f32 %v6455_v5, %v5853_v34 }
 0xa65   : > { %v6473_v15 = vpop.f32.mrb[29].mxu1 }
 0xa66   : > { %v6474_v57 = vadd.f32 %v6473_v15, %v6472_v48  ;;  %v6475_v26 = vpop.f32.mrb[30].mxu1 }
 0xa67   : > { %v6476_v20 = vpop.f32.mrb[31].mxu1 }
 0xa68   : > { %v5932_v32 = vadd.f32 %v6474_v57, %v5891_v0  ;;  %v6477_v25 = vadd.f32 %v6476_v20, %v6475_v26 }
 0xa6a   : > { %vm5938_vm12 = vcmp.gt.f32.partialorder %v5932_v32, 0.0  ;;  %v5940_v18 = vmul.f32 0.2, %v5932_v32  ;;  %v5935_v3 = vadd.f32 %v6477_v25, %v5894_v61 }
 0xa6c   : > { %v5942_v29 = vsel %vm5938_vm12, %v5932_v32, %v5940_v18  ;;  %vm5939_vm7 = vcmp.gt.f32.partialorder %v5935_v3, 0.0  ;;  %v5941_v37 = vmul.f32 0.2, %v5935_v3 }
 0xa6d   : > { %v5944_v40 = vsub.f32 0.0, %v5942_v29 }
 0xa6e   : > { %v5943_v50 = vsel %vm5939_vm7, %v5935_v3, %v5941_v37 }
 0xa6f   : > { %v5946_v53 = vmul.f32 1.442695, %v5944_v40  ;;  %v5945_v52 = vsub.f32 0.0, %v5943_v50 }
 0xa71   : > { %6728 = vpow2.f32 %v5946_v53  ;;  %v5948_v13 = vmul.f32 1.442695, %v5945_v52 }
 0xa73   : > { %6730 = vpow2.f32 %v5948_v13 }
 0xa7b   : > { %v6729_v47 = vpop.eup %6728 }
 0xa7c   : > { %v5950_v55 = vadd.f32 1.0, %v6729_v47 }
 0xa7d   : > { %v6731_v2 = vpop.eup %6730 }
 0xa7e   : > { %6732 = vrcp.f32 %v5950_v55  ;;  %v5951_v46 = vadd.f32 1.0, %v6731_v2 }
 0xa80   : > { %6734 = vrcp.f32 %v5951_v46 }
 0xa88   : > { %v6733_v43 = vpop.eup %6732 }
 0xa89   : > { %5957 = vst.msk [vmem:[%s386_s27] sm:$0x3] %vm5956_vm6, %v6733_v43 }
 0xa8a   : > { %v6735_v60 = vpop.eup %6734 }
 0xa8b   : > { %5958 = vst.msk [vmem:[%s386_s27 + $0x2] sm:$0x3] %vm5956_vm6, %v6735_v60 }
 0xa8c PF: > { %s21_s17 = sadd.s32 1, %s6742_s17  }
 0xa8d   : > { %p18_p4 = scmp.ge.s32.totalorder %s21_s17, 4  }
 0xa8f   :  { %20 = sbr.rel (!%p18_p4) target bundleno = 1 (0x1), region = 488 }

</bundles_post_ra>
